<compile_context>
chip_gen: v6e
topology: v6e:2x2x1
jax: 0.10.0
libtpu: 0.0.40
codegen_flags: <defaults>
</compile_context>

<pallas_src>
import math

import numpy as np
import jax
import jax.numpy as jnp
from jax.experimental import pallas as pl
from jax.experimental.pallas import tpu as pltpu

# ---------------- config (cfg the module would have been built from) ----------------
D_MODEL = 32          # dim_model
NUM_HEADS = 4         # num_heads
HEAD_DIM = D_MODEL // NUM_HEADS
DIM_FF = 64           # dim_feedforward
NUM_QUERIES = 8       # number of action queries
NUM_MODAL = 3         # [latent, proprio, object_state] tokens
NUM_ENC_LAYERS = 2    # encoder num_layers
NUM_DEC_LAYERS = 2    # decoder num_layers
EPS = 1e-5            # torch LayerNorm default
NEG_INF = -1e9        # additive mask value (exp underflows to exactly 0 in f32)

# ---------------- single lane-dense weight-slab layout (rows x 128 lanes) ----------------
ATTN_NAMES = ("enc0", "enc1", "dec0_sa", "dec0_ca", "dec1_sa", "dec1_ca")
ATTN_W_ROW = {n: i * D_MODEL for i, n in enumerate(ATTN_NAMES)}    # 32 rows each: [WqT|WkT|WvT|WoT]
FFN_NAMES = ("enc0", "enc1", "dec0", "dec1")
FF1_ROW = {"enc0": 192, "enc1": 192, "dec0": 224, "dec1": 224}     # 32 rows: two (32,64) W1^T side by side
FF1_COL = {"enc0": 0, "enc1": 64, "dec0": 0, "dec1": 64}
FF2_ROW = 256                                                      # 64 rows: four (64,32) W2^T side by side
FF2_COL = {"enc0": 0, "enc1": 32, "dec0": 64, "dec1": 96}
_VEC = 320
ATTN_B_ROW = {n: _VEC + i for i, n in enumerate(ATTN_NAMES)}       # [bq|bk|bv|bo]
ENC_LN_ROW = (326, 327)                                            # [ln1g|ln1b|ln2g|ln2b]
DEC_LN12_ROW = (328, 330)                                          # [ln1g|ln1b|ln2g|ln2b]
DEC_LN3_ROW = (329, 331)                                           # [ln3g|ln3b|--|--]
FF_B_ROW = {"enc0": 332, "enc1": 333, "dec0": 334, "dec1": 335}    # [b1(64)|b2(32)|--]
FINAL_ROW = 336                                                    # [enc_g|enc_b|dec_g|dec_b]
SLAB_ROWS = 337
SLAB_LANES = 128


# ---------------- fused forward kernel ----------------

def _act_forward_kernel(latent_ref, proprio_ref, obj_ref, mpos_ref, qemb_ref,
                        w_ref, out_ref):
    f32 = jnp.float32
    D, H, hd, F = D_MODEL, NUM_HEADS, HEAD_DIM, DIM_FF
    scale = 1.0 / math.sqrt(hd)

    B = latent_ref.shape[0]
    S = mpos_ref.shape[0]
    NQ = qemb_ref.shape[0]
    Re = B * S          # encoder rows (batch-major)
    Rd = B * NQ         # decoder rows (batch-major)

    # ---------- helpers ----------
    def layer_norm(x, row, c0):
        r = w_ref[row:row + 1, :]
        g = r[:, c0:c0 + D]
        b = r[:, c0 + D:c0 + 2 * D]
        mu = jnp.mean(x, axis=-1, keepdims=True)
        xc = x - mu
        var = jnp.mean(xc * xc, axis=-1, keepdims=True)
        return xc * jax.lax.rsqrt(var + EPS) * g + b

    def block_bias(nr, br, nc, bc):
        # additive bias: 0 where row-block == col-block (same head AND batch),
        # -1e9 otherwise.  Block ids built with comparison sums (no int div).
        r = jax.lax.broadcasted_iota(jnp.int32, (nr, nc), 0)
        c = jax.lax.broadcasted_iota(jnp.int32, (nr, nc), 1)
        rb = jnp.zeros((nr, nc), jnp.int32)
        for t in range(1, nr // br):
            rb = rb + jnp.where(r >= t * br, 1, 0)
        cb = jnp.zeros((nr, nc), jnp.int32)
        for t in range(1, nc // bc):
            cb = cb + jnp.where(c >= t * bc, 1, 0)
        return jnp.where(rb == cb, 0.0, NEG_INF).astype(f32)

    def stack_heads(z):             # (R, D) -> (H*R, hd), head-major rows
        return jnp.concatenate([z[:, h * hd:(h + 1) * hd] for h in range(H)], axis=0)

    def merge_heads(z, R):          # (H*R, hd) -> (R, D)
        return jnp.concatenate([z[h * R:(h + 1) * R, :] for h in range(H)], axis=1)

    def mha(q_in, k_in, v_in, name, bias, fuse_qk):
        r0 = ATTN_W_ROW[name]
        wblk = w_ref[r0:r0 + D, :]                     # (32,128) = [WqT|WkT|WvT|WoT]
        bvec = w_ref[ATTN_B_ROW[name]:ATTN_B_ROW[name] + 1, :]   # (1,128) = [bq|bk|bv|bo]
        Rq = q_in.shape[0]
        if fuse_qk:                                    # q_in == k_in: one (R,D)@(D,2D) dot
            qk = jnp.dot(q_in, wblk[:, 0:2 * D],
                         preferred_element_type=f32) + bvec[:, 0:2 * D]
            q, k = qk[:, 0:D], qk[:, D:2 * D]
        else:
            q = jnp.dot(q_in, wblk[:, 0:D], preferred_element_type=f32) + bvec[:, 0:D]
            k = jnp.dot(k_in, wblk[:, D:2 * D], preferred_element_type=f32) + bvec[:, D:2 * D]
        v = jnp.dot(v_in, wblk[:, 2 * D:3 * D], preferred_element_type=f32) + bvec[:, 2 * D:3 * D]

        qs = stack_heads(q) * scale                    # (H*Rq, hd)
        ks = stack_heads(k)                            # (H*Rk, hd)
        vs = stack_heads(v)                            # (H*Rk, hd)

        s = jax.lax.dot_general(qs, ks, (((1,), (1,)), ((), ())),
                                preferred_element_type=f32)       # (H*Rq, H*Rk)
        s = s + bias                                   # mask cross-head / cross-batch pairs
        m = jnp.max(s, axis=-1, keepdims=True)
        p = jnp.exp(s - m)
        p = p / jnp.sum(p, axis=-1, keepdims=True)     # exact division (parity with torch)
        o = jnp.dot(p, vs, preferred_element_type=f32) # (H*Rq, hd)
        om = merge_heads(o, Rq)                        # (Rq, D)
        return jnp.dot(om, wblk[:, 3 * D:4 * D],
                       preferred_element_type=f32) + bvec[:, 3 * D:4 * D]

    def ffn(x, name):
        w1 = w_ref[FF1_ROW[name]:FF1_ROW[name] + D, :][:, FF1_COL[name]:FF1_COL[name] + F]
        w2 = w_ref[FF2_ROW:FF2_ROW + F, :][:, FF2_COL[name]:FF2_COL[name] + D]
        bvec = w_ref[FF_B_ROW[name]:FF_B_ROW[name] + 1, :]
        h1 = jnp.maximum(jnp.dot(x, w1, preferred_element_type=f32) + bvec[:, 0:F], 0.0)
        return jnp.dot(h1, w2, preferred_element_type=f32) + bvec[:, F:F + D]

    # ---------- in-kernel data prep (was wrapper-side) ----------
    latent = latent_ref[...]
    proprio = proprio_ref[...]
    obj = obj_ref[...]
    mpos = mpos_ref[...]
    qemb = qemb_ref[...]

    rows = []
    for b in range(B):                                  # (batch, modality) row order
        rows += [latent[b:b + 1, :], proprio[b:b + 1, :], obj[b:b + 1, :]]
    x = jnp.concatenate(rows, axis=0)                   # (Re, D)
    pos = jnp.concatenate([mpos] * B, axis=0)           # (Re, D)
    qpos = jnp.concatenate([qemb] * B, axis=0)          # (Rd, D)

    enc_bias = block_bias(H * Re, S, H * Re, S)
    dec_self_bias = block_bias(H * Rd, NQ, H * Rd, NQ)
    dec_cross_bias = block_bias(H * Rd, NQ, H * Re, S)

    # ---------- encoder (forward_post) ----------
    for l in range(NUM_ENC_LAYERS):
        name = "enc%d" % l
        qk_in = x + pos
        sa = mha(qk_in, qk_in, x, name, enc_bias, True)
        x = layer_norm(x + sa, ENC_LN_ROW[l], 0)
        x = layer_norm(x + ffn(x, name), ENC_LN_ROW[l], 2 * D)
    memory = layer_norm(x, FINAL_ROW, 0)                # encoder final norm (layer_norm=True)
    mem_k = memory + pos                                # cross-attn keys; values = memory

    # ---------- decoder (forward_post) ----------
    y = jnp.zeros((Rd, D), f32)                         # tgt = zeros_like(query_embed)
    for l in range(NUM_DEC_LAYERS):
        qk_in = y + qpos
        sa = mha(qk_in, qk_in, y, "dec%d_sa" % l, dec_self_bias, True)
        y = layer_norm(y + sa, DEC_LN12_ROW[l], 0)
        ca = mha(y + qpos, mem_k, memory, "dec%d_ca" % l, dec_cross_bias, False)
        y = layer_norm(y + ca, DEC_LN12_ROW[l], 2 * D)
        y = layer_norm(y + ffn(y, "dec%d" % l), DEC_LN3_ROW[l], 0)
    y = layer_norm(y, FINAL_ROW, 2 * D)                 # decoder final norm

    out_ref[...] = y.astype(out_ref.dtype)


# ---------------- wrapper ----------------

def _full_spec(shape):
    nd = len(shape)
    return pl.BlockSpec(tuple(shape), lambda *_: (0,) * nd)


@jax.jit
def action_transformer_forward(weight_slab, query_embed, object_state_input,
                               latent_input, proprio_input,
                               additional_modal_pos_embedding):
    B, D = proprio_input.shape
    NQ = query_embed.shape[0]

    inputs = (latent_input, proprio_input, object_state_input,
              additional_modal_pos_embedding, query_embed, weight_slab)

    out = pl.pallas_call(
        _act_forward_kernel,
        out_shape=jax.ShapeDtypeStruct((B * NQ, D), jnp.float32),
        grid=(1,),
        in_specs=[_full_spec(a.shape) for a in inputs],
        out_specs=_full_spec((B * NQ, D)),
        compiler_params=pltpu.CompilerParams(dimension_semantics=("arbitrary",)),
    )(*inputs)

    hs = out.reshape(B, NQ, D)[None]    # (1, B, NQ, D) == torch hs.transpose(1, 2)
    return hs


# ---------------- deterministic parameter build: ONE lane-dense (337,128) slab ----------------

def _xavier(key, shape):
    fan_out, fan_in = shape
    limit = math.sqrt(6.0 / (fan_in + fan_out))
    return np.asarray(jax.random.uniform(key, shape, jnp.float32, -limit, limit))


def make_params(key):
    """Generate torch-layout weights, transpose to (in,out), and pack everything
    into a single lane-dense f32 slab (one DMA descriptor at kernel launch)."""
    D, F = D_MODEL, DIM_FF
    slab = np.zeros((SLAB_ROWS, SLAB_LANES), np.float32)
    keys = jax.random.split(key, 2 * len(ATTN_NAMES) + 2 * len(FFN_NAMES))
    ki = iter(range(len(keys)))

    for name in ATTN_NAMES:
        ipw = _xavier(keys[next(ki)], (3 * D, D))       # torch in_proj_weight
        opw = _xavier(keys[next(ki)], (D, D))           # torch out_proj.weight
        r0 = ATTN_W_ROW[name]
        slab[r0:r0 + D, 0 * D:1 * D] = ipw[0:D].T       # Wq^T
        slab[r0:r0 + D, 1 * D:2 * D] = ipw[D:2 * D].T   # Wk^T
        slab[r0:r0 + D, 2 * D:3 * D] = ipw[2 * D:3 * D].T  # Wv^T
        slab[r0:r0 + D, 3 * D:4 * D] = opw.T            # Wo^T
        # in_proj / out_proj biases are zero (torch MultiheadAttention default)

    for name in FFN_NAMES:
        w1 = _xavier(keys[next(ki)], (F, D))            # linear1.weight
        w2 = _xavier(keys[next(ki)], (D, F))            # linear2.weight
        slab[FF1_ROW[name]:FF1_ROW[name] + D, FF1_COL[name]:FF1_COL[name] + F] = w1.T
        slab[FF2_ROW:FF2_ROW + F, FF2_COL[name]:FF2_COL[name] + D] = w2.T
        # TODO(synk): torch nn.Linear biases default to U(+-1/sqrt(fan_in)); kept at 0 here.

    # LayerNorm gammas = 1 (betas = 0)
    for r in ENC_LN_ROW:
        slab[r, 0:D] = 1.0
        slab[r, 2 * D:3 * D] = 1.0
    for r in DEC_LN12_ROW:
        slab[r, 0:D] = 1.0
        slab[r, 2 * D:3 * D] = 1.0
    for r in DEC_LN3_ROW:
        slab[r, 0:D] = 1.0
    slab[FINAL_ROW, 0:D] = 1.0              # encoder final norm gamma
    slab[FINAL_ROW, 2 * D:3 * D] = 1.0      # decoder final norm gamma

    return jnp.asarray(slab)


if __name__ == "__main__":
    key = jax.random.PRNGKey(0)
    kp, k1, k2, k3, k4, k5 = jax.random.split(key, 6)
    weight_slab = make_params(kp)

    B = 2
    query_embed = jax.random.normal(k1, (NUM_QUERIES, D_MODEL), jnp.float32)
    object_state_input = jax.random.normal(k2, (B, D_MODEL), jnp.float32)
    latent_input = jax.random.normal(k3, (B, D_MODEL), jnp.float32)
    proprio_input = jax.random.normal(k4, (B, D_MODEL), jnp.float32)
    additional_modal_pos_embedding = jax.random.normal(k5, (NUM_MODAL, D_MODEL), jnp.float32)

    hs = action_transformer_forward(
        weight_slab, query_embed, object_state_input, latent_input, proprio_input,
        additional_modal_pos_embedding)
    hs = jax.block_until_ready(hs)
    assert hs.shape == (1, B, NUM_QUERIES, D_MODEL), hs.shape
    assert hs.dtype == jnp.float32
    print("KERNEL_OK")
</pallas_src>

<mosaic_0001>
module attributes {stable_mosaic.version = 11 : i64} {
  func.func @_act_forward_kernel(%arg0: i32, %arg1: memref<2x32xf32, #tpu.memory_space<vmem>>, %arg2: memref<2x32xf32, #tpu.memory_space<vmem>>, %arg3: memref<2x32xf32, #tpu.memory_space<vmem>>, %arg4: memref<3x32xf32, #tpu.memory_space<vmem>>, %arg5: memref<8x32xf32, #tpu.memory_space<vmem>>, %arg6: memref<337x128xf32, #tpu.memory_space<vmem>>, %arg7: memref<16x32xf32, #tpu.memory_space<vmem>>) attributes {dimension_semantics = [#tpu.dimension_semantics<arbitrary>], iteration_bounds = array<i64: 1>, scalar_prefetch = 0 : i64, scratch_operands = 0 : i64, tpu.core_type = #tpu.core_type<tc>, window_params = [{pipeline_mode = #tpu.pipeline_mode<synchronous>, transform_indices = @transform_0, window_bounds = array<i64: 2, 32>}, {pipeline_mode = #tpu.pipeline_mode<synchronous>, transform_indices = @transform_1, window_bounds = array<i64: 2, 32>}, {pipeline_mode = #tpu.pipeline_mode<synchronous>, transform_indices = @transform_2, window_bounds = array<i64: 2, 32>}, {pipeline_mode = #tpu.pipeline_mode<synchronous>, transform_indices = @transform_3, window_bounds = array<i64: 3, 32>}, {pipeline_mode = #tpu.pipeline_mode<synchronous>, transform_indices = @transform_4, window_bounds = array<i64: 8, 32>}, {pipeline_mode = #tpu.pipeline_mode<synchronous>, transform_indices = @transform_5, window_bounds = array<i64: 337, 128>}, {pipeline_mode = #tpu.pipeline_mode<synchronous>, transform_indices = @transform_6, window_bounds = array<i64: 16, 32>}]} {
    %c0 = arith.constant 0 : index
    %c0_0 = arith.constant 0 : index
    %0 = vector.load %arg1[%c0, %c0_0] : memref<2x32xf32, #tpu.memory_space<vmem>>, vector<2x32xf32>
    %c0_1 = arith.constant 0 : index
    %c0_2 = arith.constant 0 : index
    %1 = vector.load %arg2[%c0_1, %c0_2] : memref<2x32xf32, #tpu.memory_space<vmem>>, vector<2x32xf32>
    %c0_3 = arith.constant 0 : index
    %c0_4 = arith.constant 0 : index
    %2 = vector.load %arg3[%c0_3, %c0_4] : memref<2x32xf32, #tpu.memory_space<vmem>>, vector<2x32xf32>
    %c0_5 = arith.constant 0 : index
    %c0_6 = arith.constant 0 : index
    %3 = vector.load %arg4[%c0_5, %c0_6] : memref<3x32xf32, #tpu.memory_space<vmem>>, vector<3x32xf32>
    %c0_7 = arith.constant 0 : index
    %c0_8 = arith.constant 0 : index
    %4 = vector.load %arg5[%c0_7, %c0_8] : memref<8x32xf32, #tpu.memory_space<vmem>>, vector<8x32xf32>
    %5 = vector.extract_strided_slice %0 {offsets = [0, 0], sizes = [1, 32], strides = [1, 1]} : vector<2x32xf32> to vector<1x32xf32>
    %6 = vector.extract_strided_slice %1 {offsets = [0, 0], sizes = [1, 32], strides = [1, 1]} : vector<2x32xf32> to vector<1x32xf32>
    %7 = vector.extract_strided_slice %2 {offsets = [0, 0], sizes = [1, 32], strides = [1, 1]} : vector<2x32xf32> to vector<1x32xf32>
    %8 = vector.extract_strided_slice %0 {offsets = [1, 0], sizes = [1, 32], strides = [1, 1]} : vector<2x32xf32> to vector<1x32xf32>
    %9 = vector.extract_strided_slice %1 {offsets = [1, 0], sizes = [1, 32], strides = [1, 1]} : vector<2x32xf32> to vector<1x32xf32>
    %10 = vector.extract_strided_slice %2 {offsets = [1, 0], sizes = [1, 32], strides = [1, 1]} : vector<2x32xf32> to vector<1x32xf32>
    %11 = tpu.concatenate %5, %6, %7, %8, %9, %10 in 0 : vector<1x32xf32>, vector<1x32xf32>, vector<1x32xf32>, vector<1x32xf32>, vector<1x32xf32>, vector<1x32xf32> -> vector<6x32xf32>
    %12 = tpu.concatenate %3, %3 in 0 : vector<3x32xf32>, vector<3x32xf32> -> vector<6x32xf32>
    %13 = tpu.concatenate %4, %4 in 0 : vector<8x32xf32>, vector<8x32xf32> -> vector<16x32xf32>
    %14 = tpu.iota {dimensions = array<i32: 0>} : vector<24x24xi32>
    %15 = tpu.iota {dimensions = array<i32: 1>} : vector<24x24xi32>
    %c0_i32 = arith.constant 0 : i32
    %16 = vector.broadcast %c0_i32 : i32 to vector<24x24xi32>
    %c3_i32 = arith.constant 3 : i32
    %17 = vector.broadcast %c3_i32 : i32 to vector<24x24xi32>
    %18 = arith.cmpi sge, %14, %17 : vector<24x24xi32>
    %c1_i32 = arith.constant 1 : i32
    %c0_i32_9 = arith.constant 0 : i32
    %19 = vector.broadcast %c1_i32 : i32 to vector<24x24xi32>
    %20 = vector.broadcast %c0_i32_9 : i32 to vector<24x24xi32>
    %21 = arith.select %18, %19, %20 : vector<24x24xi1>, vector<24x24xi32>
    %22 = arith.addi %16, %21 : vector<24x24xi32>
    %c6_i32 = arith.constant 6 : i32
    %23 = vector.broadcast %c6_i32 : i32 to vector<24x24xi32>
    %24 = arith.cmpi sge, %14, %23 : vector<24x24xi32>
    %c1_i32_10 = arith.constant 1 : i32
    %c0_i32_11 = arith.constant 0 : i32
    %25 = vector.broadcast %c1_i32_10 : i32 to vector<24x24xi32>
    %26 = vector.broadcast %c0_i32_11 : i32 to vector<24x24xi32>
    %27 = arith.select %24, %25, %26 : vector<24x24xi1>, vector<24x24xi32>
    %28 = arith.addi %22, %27 : vector<24x24xi32>
    %c9_i32 = arith.constant 9 : i32
    %29 = vector.broadcast %c9_i32 : i32 to vector<24x24xi32>
    %30 = arith.cmpi sge, %14, %29 : vector<24x24xi32>
    %c1_i32_12 = arith.constant 1 : i32
    %c0_i32_13 = arith.constant 0 : i32
    %31 = vector.broadcast %c1_i32_12 : i32 to vector<24x24xi32>
    %32 = vector.broadcast %c0_i32_13 : i32 to vector<24x24xi32>
    %33 = arith.select %30, %31, %32 : vector<24x24xi1>, vector<24x24xi32>
    %34 = arith.addi %28, %33 : vector<24x24xi32>
    %c12_i32 = arith.constant 12 : i32
    %35 = vector.broadcast %c12_i32 : i32 to vector<24x24xi32>
    %36 = arith.cmpi sge, %14, %35 : vector<24x24xi32>
    %c1_i32_14 = arith.constant 1 : i32
    %c0_i32_15 = arith.constant 0 : i32
    %37 = vector.broadcast %c1_i32_14 : i32 to vector<24x24xi32>
    %38 = vector.broadcast %c0_i32_15 : i32 to vector<24x24xi32>
    %39 = arith.select %36, %37, %38 : vector<24x24xi1>, vector<24x24xi32>
    %40 = arith.addi %34, %39 : vector<24x24xi32>
    %c15_i32 = arith.constant 15 : i32
    %41 = vector.broadcast %c15_i32 : i32 to vector<24x24xi32>
    %42 = arith.cmpi sge, %14, %41 : vector<24x24xi32>
    %c1_i32_16 = arith.constant 1 : i32
    %c0_i32_17 = arith.constant 0 : i32
    %43 = vector.broadcast %c1_i32_16 : i32 to vector<24x24xi32>
    %44 = vector.broadcast %c0_i32_17 : i32 to vector<24x24xi32>
    %45 = arith.select %42, %43, %44 : vector<24x24xi1>, vector<24x24xi32>
    %46 = arith.addi %40, %45 : vector<24x24xi32>
    %c18_i32 = arith.constant 18 : i32
    %47 = vector.broadcast %c18_i32 : i32 to vector<24x24xi32>
    %48 = arith.cmpi sge, %14, %47 : vector<24x24xi32>
    %c1_i32_18 = arith.constant 1 : i32
    %c0_i32_19 = arith.constant 0 : i32
    %49 = vector.broadcast %c1_i32_18 : i32 to vector<24x24xi32>
    %50 = vector.broadcast %c0_i32_19 : i32 to vector<24x24xi32>
    %51 = arith.select %48, %49, %50 : vector<24x24xi1>, vector<24x24xi32>
    %52 = arith.addi %46, %51 : vector<24x24xi32>
    %c21_i32 = arith.constant 21 : i32
    %53 = vector.broadcast %c21_i32 : i32 to vector<24x24xi32>
    %54 = arith.cmpi sge, %14, %53 : vector<24x24xi32>
    %c1_i32_20 = arith.constant 1 : i32
    %c0_i32_21 = arith.constant 0 : i32
    %55 = vector.broadcast %c1_i32_20 : i32 to vector<24x24xi32>
    %56 = vector.broadcast %c0_i32_21 : i32 to vector<24x24xi32>
    %57 = arith.select %54, %55, %56 : vector<24x24xi1>, vector<24x24xi32>
    %58 = arith.addi %52, %57 : vector<24x24xi32>
    %c0_i32_22 = arith.constant 0 : i32
    %59 = vector.broadcast %c0_i32_22 : i32 to vector<24x24xi32>
    %c3_i32_23 = arith.constant 3 : i32
    %60 = vector.broadcast %c3_i32_23 : i32 to vector<24x24xi32>
    %61 = arith.cmpi sge, %15, %60 : vector<24x24xi32>
    %c1_i32_24 = arith.constant 1 : i32
    %c0_i32_25 = arith.constant 0 : i32
    %62 = vector.broadcast %c1_i32_24 : i32 to vector<24x24xi32>
    %63 = vector.broadcast %c0_i32_25 : i32 to vector<24x24xi32>
    %64 = arith.select %61, %62, %63 : vector<24x24xi1>, vector<24x24xi32>
    %65 = arith.addi %59, %64 : vector<24x24xi32>
    %c6_i32_26 = arith.constant 6 : i32
    %66 = vector.broadcast %c6_i32_26 : i32 to vector<24x24xi32>
    %67 = arith.cmpi sge, %15, %66 : vector<24x24xi32>
    %c1_i32_27 = arith.constant 1 : i32
    %c0_i32_28 = arith.constant 0 : i32
    %68 = vector.broadcast %c1_i32_27 : i32 to vector<24x24xi32>
    %69 = vector.broadcast %c0_i32_28 : i32 to vector<24x24xi32>
    %70 = arith.select %67, %68, %69 : vector<24x24xi1>, vector<24x24xi32>
    %71 = arith.addi %65, %70 : vector<24x24xi32>
    %c9_i32_29 = arith.constant 9 : i32
    %72 = vector.broadcast %c9_i32_29 : i32 to vector<24x24xi32>
    %73 = arith.cmpi sge, %15, %72 : vector<24x24xi32>
    %c1_i32_30 = arith.constant 1 : i32
    %c0_i32_31 = arith.constant 0 : i32
    %74 = vector.broadcast %c1_i32_30 : i32 to vector<24x24xi32>
    %75 = vector.broadcast %c0_i32_31 : i32 to vector<24x24xi32>
    %76 = arith.select %73, %74, %75 : vector<24x24xi1>, vector<24x24xi32>
    %77 = arith.addi %71, %76 : vector<24x24xi32>
    %c12_i32_32 = arith.constant 12 : i32
    %78 = vector.broadcast %c12_i32_32 : i32 to vector<24x24xi32>
    %79 = arith.cmpi sge, %15, %78 : vector<24x24xi32>
    %c1_i32_33 = arith.constant 1 : i32
    %c0_i32_34 = arith.constant 0 : i32
    %80 = vector.broadcast %c1_i32_33 : i32 to vector<24x24xi32>
    %81 = vector.broadcast %c0_i32_34 : i32 to vector<24x24xi32>
    %82 = arith.select %79, %80, %81 : vector<24x24xi1>, vector<24x24xi32>
    %83 = arith.addi %77, %82 : vector<24x24xi32>
    %c15_i32_35 = arith.constant 15 : i32
    %84 = vector.broadcast %c15_i32_35 : i32 to vector<24x24xi32>
    %85 = arith.cmpi sge, %15, %84 : vector<24x24xi32>
    %c1_i32_36 = arith.constant 1 : i32
    %c0_i32_37 = arith.constant 0 : i32
    %86 = vector.broadcast %c1_i32_36 : i32 to vector<24x24xi32>
    %87 = vector.broadcast %c0_i32_37 : i32 to vector<24x24xi32>
    %88 = arith.select %85, %86, %87 : vector<24x24xi1>, vector<24x24xi32>
    %89 = arith.addi %83, %88 : vector<24x24xi32>
    %c18_i32_38 = arith.constant 18 : i32
    %90 = vector.broadcast %c18_i32_38 : i32 to vector<24x24xi32>
    %91 = arith.cmpi sge, %15, %90 : vector<24x24xi32>
    %c1_i32_39 = arith.constant 1 : i32
    %c0_i32_40 = arith.constant 0 : i32
    %92 = vector.broadcast %c1_i32_39 : i32 to vector<24x24xi32>
    %93 = vector.broadcast %c0_i32_40 : i32 to vector<24x24xi32>
    %94 = arith.select %91, %92, %93 : vector<24x24xi1>, vector<24x24xi32>
    %95 = arith.addi %89, %94 : vector<24x24xi32>
    %c21_i32_41 = arith.constant 21 : i32
    %96 = vector.broadcast %c21_i32_41 : i32 to vector<24x24xi32>
    %97 = arith.cmpi sge, %15, %96 : vector<24x24xi32>
    %c1_i32_42 = arith.constant 1 : i32
    %c0_i32_43 = arith.constant 0 : i32
    %98 = vector.broadcast %c1_i32_42 : i32 to vector<24x24xi32>
    %99 = vector.broadcast %c0_i32_43 : i32 to vector<24x24xi32>
    %100 = arith.select %97, %98, %99 : vector<24x24xi1>, vector<24x24xi32>
    %101 = arith.addi %95, %100 : vector<24x24xi32>
    %102 = arith.cmpi eq, %58, %101 : vector<24x24xi32>
    %cst = arith.constant 0.000000e+00 : f32
    %cst_44 = arith.constant -1.000000e+09 : f32
    %103 = vector.broadcast %cst : f32 to vector<24x24xf32>
    %104 = vector.broadcast %cst_44 : f32 to vector<24x24xf32>
    %105 = arith.select %102, %103, %104 : vector<24x24xi1>, vector<24x24xf32>
    %106 = tpu.iota {dimensions = array<i32: 0>} : vector<64x64xi32>
    %107 = tpu.iota {dimensions = array<i32: 1>} : vector<64x64xi32>
    %c0_i32_45 = arith.constant 0 : i32
    %108 = vector.broadcast %c0_i32_45 : i32 to vector<64x64xi32>
    %c8_i32 = arith.constant 8 : i32
    %109 = vector.broadcast %c8_i32 : i32 to vector<64x64xi32>
    %110 = arith.cmpi sge, %106, %109 : vector<64x64xi32>
    %c1_i32_46 = arith.constant 1 : i32
    %c0_i32_47 = arith.constant 0 : i32
    %111 = vector.broadcast %c1_i32_46 : i32 to vector<64x64xi32>
    %112 = vector.broadcast %c0_i32_47 : i32 to vector<64x64xi32>
    %113 = arith.select %110, %111, %112 : vector<64x64xi1>, vector<64x64xi32>
    %114 = arith.addi %108, %113 : vector<64x64xi32>
    %c16_i32 = arith.constant 16 : i32
    %115 = vector.broadcast %c16_i32 : i32 to vector<64x64xi32>
    %116 = arith.cmpi sge, %106, %115 : vector<64x64xi32>
    %c1_i32_48 = arith.constant 1 : i32
    %c0_i32_49 = arith.constant 0 : i32
    %117 = vector.broadcast %c1_i32_48 : i32 to vector<64x64xi32>
    %118 = vector.broadcast %c0_i32_49 : i32 to vector<64x64xi32>
    %119 = arith.select %116, %117, %118 : vector<64x64xi1>, vector<64x64xi32>
    %120 = arith.addi %114, %119 : vector<64x64xi32>
    %c24_i32 = arith.constant 24 : i32
    %121 = vector.broadcast %c24_i32 : i32 to vector<64x64xi32>
    %122 = arith.cmpi sge, %106, %121 : vector<64x64xi32>
    %c1_i32_50 = arith.constant 1 : i32
    %c0_i32_51 = arith.constant 0 : i32
    %123 = vector.broadcast %c1_i32_50 : i32 to vector<64x64xi32>
    %124 = vector.broadcast %c0_i32_51 : i32 to vector<64x64xi32>
    %125 = arith.select %122, %123, %124 : vector<64x64xi1>, vector<64x64xi32>
    %126 = arith.addi %120, %125 : vector<64x64xi32>
    %c32_i32 = arith.constant 32 : i32
    %127 = vector.broadcast %c32_i32 : i32 to vector<64x64xi32>
    %128 = arith.cmpi sge, %106, %127 : vector<64x64xi32>
    %c1_i32_52 = arith.constant 1 : i32
    %c0_i32_53 = arith.constant 0 : i32
    %129 = vector.broadcast %c1_i32_52 : i32 to vector<64x64xi32>
    %130 = vector.broadcast %c0_i32_53 : i32 to vector<64x64xi32>
    %131 = arith.select %128, %129, %130 : vector<64x64xi1>, vector<64x64xi32>
    %132 = arith.addi %126, %131 : vector<64x64xi32>
    %c40_i32 = arith.constant 40 : i32
    %133 = vector.broadcast %c40_i32 : i32 to vector<64x64xi32>
    %134 = arith.cmpi sge, %106, %133 : vector<64x64xi32>
    %c1_i32_54 = arith.constant 1 : i32
    %c0_i32_55 = arith.constant 0 : i32
    %135 = vector.broadcast %c1_i32_54 : i32 to vector<64x64xi32>
    %136 = vector.broadcast %c0_i32_55 : i32 to vector<64x64xi32>
    %137 = arith.select %134, %135, %136 : vector<64x64xi1>, vector<64x64xi32>
    %138 = arith.addi %132, %137 : vector<64x64xi32>
    %c48_i32 = arith.constant 48 : i32
    %139 = vector.broadcast %c48_i32 : i32 to vector<64x64xi32>
    %140 = arith.cmpi sge, %106, %139 : vector<64x64xi32>
    %c1_i32_56 = arith.constant 1 : i32
    %c0_i32_57 = arith.constant 0 : i32
    %141 = vector.broadcast %c1_i32_56 : i32 to vector<64x64xi32>
    %142 = vector.broadcast %c0_i32_57 : i32 to vector<64x64xi32>
    %143 = arith.select %140, %141, %142 : vector<64x64xi1>, vector<64x64xi32>
    %144 = arith.addi %138, %143 : vector<64x64xi32>
    %c56_i32 = arith.constant 56 : i32
    %145 = vector.broadcast %c56_i32 : i32 to vector<64x64xi32>
    %146 = arith.cmpi sge, %106, %145 : vector<64x64xi32>
    %c1_i32_58 = arith.constant 1 : i32
    %c0_i32_59 = arith.constant 0 : i32
    %147 = vector.broadcast %c1_i32_58 : i32 to vector<64x64xi32>
    %148 = vector.broadcast %c0_i32_59 : i32 to vector<64x64xi32>
    %149 = arith.select %146, %147, %148 : vector<64x64xi1>, vector<64x64xi32>
    %150 = arith.addi %144, %149 : vector<64x64xi32>
    %c0_i32_60 = arith.constant 0 : i32
    %151 = vector.broadcast %c0_i32_60 : i32 to vector<64x64xi32>
    %c8_i32_61 = arith.constant 8 : i32
    %152 = vector.broadcast %c8_i32_61 : i32 to vector<64x64xi32>
    %153 = arith.cmpi sge, %107, %152 : vector<64x64xi32>
    %c1_i32_62 = arith.constant 1 : i32
    %c0_i32_63 = arith.constant 0 : i32
    %154 = vector.broadcast %c1_i32_62 : i32 to vector<64x64xi32>
    %155 = vector.broadcast %c0_i32_63 : i32 to vector<64x64xi32>
    %156 = arith.select %153, %154, %155 : vector<64x64xi1>, vector<64x64xi32>
    %157 = arith.addi %151, %156 : vector<64x64xi32>
    %c16_i32_64 = arith.constant 16 : i32
    %158 = vector.broadcast %c16_i32_64 : i32 to vector<64x64xi32>
    %159 = arith.cmpi sge, %107, %158 : vector<64x64xi32>
    %c1_i32_65 = arith.constant 1 : i32
    %c0_i32_66 = arith.constant 0 : i32
    %160 = vector.broadcast %c1_i32_65 : i32 to vector<64x64xi32>
    %161 = vector.broadcast %c0_i32_66 : i32 to vector<64x64xi32>
    %162 = arith.select %159, %160, %161 : vector<64x64xi1>, vector<64x64xi32>
    %163 = arith.addi %157, %162 : vector<64x64xi32>
    %c24_i32_67 = arith.constant 24 : i32
    %164 = vector.broadcast %c24_i32_67 : i32 to vector<64x64xi32>
    %165 = arith.cmpi sge, %107, %164 : vector<64x64xi32>
    %c1_i32_68 = arith.constant 1 : i32
    %c0_i32_69 = arith.constant 0 : i32
    %166 = vector.broadcast %c1_i32_68 : i32 to vector<64x64xi32>
    %167 = vector.broadcast %c0_i32_69 : i32 to vector<64x64xi32>
    %168 = arith.select %165, %166, %167 : vector<64x64xi1>, vector<64x64xi32>
    %169 = arith.addi %163, %168 : vector<64x64xi32>
    %c32_i32_70 = arith.constant 32 : i32
    %170 = vector.broadcast %c32_i32_70 : i32 to vector<64x64xi32>
    %171 = arith.cmpi sge, %107, %170 : vector<64x64xi32>
    %c1_i32_71 = arith.constant 1 : i32
    %c0_i32_72 = arith.constant 0 : i32
    %172 = vector.broadcast %c1_i32_71 : i32 to vector<64x64xi32>
    %173 = vector.broadcast %c0_i32_72 : i32 to vector<64x64xi32>
    %174 = arith.select %171, %172, %173 : vector<64x64xi1>, vector<64x64xi32>
    %175 = arith.addi %169, %174 : vector<64x64xi32>
    %c40_i32_73 = arith.constant 40 : i32
    %176 = vector.broadcast %c40_i32_73 : i32 to vector<64x64xi32>
    %177 = arith.cmpi sge, %107, %176 : vector<64x64xi32>
    %c1_i32_74 = arith.constant 1 : i32
    %c0_i32_75 = arith.constant 0 : i32
    %178 = vector.broadcast %c1_i32_74 : i32 to vector<64x64xi32>
    %179 = vector.broadcast %c0_i32_75 : i32 to vector<64x64xi32>
    %180 = arith.select %177, %178, %179 : vector<64x64xi1>, vector<64x64xi32>
    %181 = arith.addi %175, %180 : vector<64x64xi32>
    %c48_i32_76 = arith.constant 48 : i32
    %182 = vector.broadcast %c48_i32_76 : i32 to vector<64x64xi32>
    %183 = arith.cmpi sge, %107, %182 : vector<64x64xi32>
    %c1_i32_77 = arith.constant 1 : i32
    %c0_i32_78 = arith.constant 0 : i32
    %184 = vector.broadcast %c1_i32_77 : i32 to vector<64x64xi32>
    %185 = vector.broadcast %c0_i32_78 : i32 to vector<64x64xi32>
    %186 = arith.select %183, %184, %185 : vector<64x64xi1>, vector<64x64xi32>
    %187 = arith.addi %181, %186 : vector<64x64xi32>
    %c56_i32_79 = arith.constant 56 : i32
    %188 = vector.broadcast %c56_i32_79 : i32 to vector<64x64xi32>
    %189 = arith.cmpi sge, %107, %188 : vector<64x64xi32>
    %c1_i32_80 = arith.constant 1 : i32
    %c0_i32_81 = arith.constant 0 : i32
    %190 = vector.broadcast %c1_i32_80 : i32 to vector<64x64xi32>
    %191 = vector.broadcast %c0_i32_81 : i32 to vector<64x64xi32>
    %192 = arith.select %189, %190, %191 : vector<64x64xi1>, vector<64x64xi32>
    %193 = arith.addi %187, %192 : vector<64x64xi32>
    %194 = arith.cmpi eq, %150, %193 : vector<64x64xi32>
    %cst_82 = arith.constant 0.000000e+00 : f32
    %cst_83 = arith.constant -1.000000e+09 : f32
    %195 = vector.broadcast %cst_82 : f32 to vector<64x64xf32>
    %196 = vector.broadcast %cst_83 : f32 to vector<64x64xf32>
    %197 = arith.select %194, %195, %196 : vector<64x64xi1>, vector<64x64xf32>
    %198 = tpu.iota {dimensions = array<i32: 0>} : vector<64x24xi32>
    %199 = tpu.iota {dimensions = array<i32: 1>} : vector<64x24xi32>
    %c0_i32_84 = arith.constant 0 : i32
    %200 = vector.broadcast %c0_i32_84 : i32 to vector<64x24xi32>
    %c8_i32_85 = arith.constant 8 : i32
    %201 = vector.broadcast %c8_i32_85 : i32 to vector<64x24xi32>
    %202 = arith.cmpi sge, %198, %201 : vector<64x24xi32>
    %c1_i32_86 = arith.constant 1 : i32
    %c0_i32_87 = arith.constant 0 : i32
    %203 = vector.broadcast %c1_i32_86 : i32 to vector<64x24xi32>
    %204 = vector.broadcast %c0_i32_87 : i32 to vector<64x24xi32>
    %205 = arith.select %202, %203, %204 : vector<64x24xi1>, vector<64x24xi32>
    %206 = arith.addi %200, %205 : vector<64x24xi32>
    %c16_i32_88 = arith.constant 16 : i32
    %207 = vector.broadcast %c16_i32_88 : i32 to vector<64x24xi32>
    %208 = arith.cmpi sge, %198, %207 : vector<64x24xi32>
    %c1_i32_89 = arith.constant 1 : i32
    %c0_i32_90 = arith.constant 0 : i32
    %209 = vector.broadcast %c1_i32_89 : i32 to vector<64x24xi32>
    %210 = vector.broadcast %c0_i32_90 : i32 to vector<64x24xi32>
    %211 = arith.select %208, %209, %210 : vector<64x24xi1>, vector<64x24xi32>
    %212 = arith.addi %206, %211 : vector<64x24xi32>
    %c24_i32_91 = arith.constant 24 : i32
    %213 = vector.broadcast %c24_i32_91 : i32 to vector<64x24xi32>
    %214 = arith.cmpi sge, %198, %213 : vector<64x24xi32>
    %c1_i32_92 = arith.constant 1 : i32
    %c0_i32_93 = arith.constant 0 : i32
    %215 = vector.broadcast %c1_i32_92 : i32 to vector<64x24xi32>
    %216 = vector.broadcast %c0_i32_93 : i32 to vector<64x24xi32>
    %217 = arith.select %214, %215, %216 : vector<64x24xi1>, vector<64x24xi32>
    %218 = arith.addi %212, %217 : vector<64x24xi32>
    %c32_i32_94 = arith.constant 32 : i32
    %219 = vector.broadcast %c32_i32_94 : i32 to vector<64x24xi32>
    %220 = arith.cmpi sge, %198, %219 : vector<64x24xi32>
    %c1_i32_95 = arith.constant 1 : i32
    %c0_i32_96 = arith.constant 0 : i32
    %221 = vector.broadcast %c1_i32_95 : i32 to vector<64x24xi32>
    %222 = vector.broadcast %c0_i32_96 : i32 to vector<64x24xi32>
    %223 = arith.select %220, %221, %222 : vector<64x24xi1>, vector<64x24xi32>
    %224 = arith.addi %218, %223 : vector<64x24xi32>
    %c40_i32_97 = arith.constant 40 : i32
    %225 = vector.broadcast %c40_i32_97 : i32 to vector<64x24xi32>
    %226 = arith.cmpi sge, %198, %225 : vector<64x24xi32>
    %c1_i32_98 = arith.constant 1 : i32
    %c0_i32_99 = arith.constant 0 : i32
    %227 = vector.broadcast %c1_i32_98 : i32 to vector<64x24xi32>
    %228 = vector.broadcast %c0_i32_99 : i32 to vector<64x24xi32>
    %229 = arith.select %226, %227, %228 : vector<64x24xi1>, vector<64x24xi32>
    %230 = arith.addi %224, %229 : vector<64x24xi32>
    %c48_i32_100 = arith.constant 48 : i32
    %231 = vector.broadcast %c48_i32_100 : i32 to vector<64x24xi32>
    %232 = arith.cmpi sge, %198, %231 : vector<64x24xi32>
    %c1_i32_101 = arith.constant 1 : i32
    %c0_i32_102 = arith.constant 0 : i32
    %233 = vector.broadcast %c1_i32_101 : i32 to vector<64x24xi32>
    %234 = vector.broadcast %c0_i32_102 : i32 to vector<64x24xi32>
    %235 = arith.select %232, %233, %234 : vector<64x24xi1>, vector<64x24xi32>
    %236 = arith.addi %230, %235 : vector<64x24xi32>
    %c56_i32_103 = arith.constant 56 : i32
    %237 = vector.broadcast %c56_i32_103 : i32 to vector<64x24xi32>
    %238 = arith.cmpi sge, %198, %237 : vector<64x24xi32>
    %c1_i32_104 = arith.constant 1 : i32
    %c0_i32_105 = arith.constant 0 : i32
    %239 = vector.broadcast %c1_i32_104 : i32 to vector<64x24xi32>
    %240 = vector.broadcast %c0_i32_105 : i32 to vector<64x24xi32>
    %241 = arith.select %238, %239, %240 : vector<64x24xi1>, vector<64x24xi32>
    %242 = arith.addi %236, %241 : vector<64x24xi32>
    %c0_i32_106 = arith.constant 0 : i32
    %243 = vector.broadcast %c0_i32_106 : i32 to vector<64x24xi32>
    %c3_i32_107 = arith.constant 3 : i32
    %244 = vector.broadcast %c3_i32_107 : i32 to vector<64x24xi32>
    %245 = arith.cmpi sge, %199, %244 : vector<64x24xi32>
    %c1_i32_108 = arith.constant 1 : i32
    %c0_i32_109 = arith.constant 0 : i32
    %246 = vector.broadcast %c1_i32_108 : i32 to vector<64x24xi32>
    %247 = vector.broadcast %c0_i32_109 : i32 to vector<64x24xi32>
    %248 = arith.select %245, %246, %247 : vector<64x24xi1>, vector<64x24xi32>
    %249 = arith.addi %243, %248 : vector<64x24xi32>
    %c6_i32_110 = arith.constant 6 : i32
    %250 = vector.broadcast %c6_i32_110 : i32 to vector<64x24xi32>
    %251 = arith.cmpi sge, %199, %250 : vector<64x24xi32>
    %c1_i32_111 = arith.constant 1 : i32
    %c0_i32_112 = arith.constant 0 : i32
    %252 = vector.broadcast %c1_i32_111 : i32 to vector<64x24xi32>
    %253 = vector.broadcast %c0_i32_112 : i32 to vector<64x24xi32>
    %254 = arith.select %251, %252, %253 : vector<64x24xi1>, vector<64x24xi32>
    %255 = arith.addi %249, %254 : vector<64x24xi32>
    %c9_i32_113 = arith.constant 9 : i32
    %256 = vector.broadcast %c9_i32_113 : i32 to vector<64x24xi32>
    %257 = arith.cmpi sge, %199, %256 : vector<64x24xi32>
    %c1_i32_114 = arith.constant 1 : i32
    %c0_i32_115 = arith.constant 0 : i32
    %258 = vector.broadcast %c1_i32_114 : i32 to vector<64x24xi32>
    %259 = vector.broadcast %c0_i32_115 : i32 to vector<64x24xi32>
    %260 = arith.select %257, %258, %259 : vector<64x24xi1>, vector<64x24xi32>
    %261 = arith.addi %255, %260 : vector<64x24xi32>
    %c12_i32_116 = arith.constant 12 : i32
    %262 = vector.broadcast %c12_i32_116 : i32 to vector<64x24xi32>
    %263 = arith.cmpi sge, %199, %262 : vector<64x24xi32>
    %c1_i32_117 = arith.constant 1 : i32
    %c0_i32_118 = arith.constant 0 : i32
    %264 = vector.broadcast %c1_i32_117 : i32 to vector<64x24xi32>
    %265 = vector.broadcast %c0_i32_118 : i32 to vector<64x24xi32>
    %266 = arith.select %263, %264, %265 : vector<64x24xi1>, vector<64x24xi32>
    %267 = arith.addi %261, %266 : vector<64x24xi32>
    %c15_i32_119 = arith.constant 15 : i32
    %268 = vector.broadcast %c15_i32_119 : i32 to vector<64x24xi32>
    %269 = arith.cmpi sge, %199, %268 : vector<64x24xi32>
    %c1_i32_120 = arith.constant 1 : i32
    %c0_i32_121 = arith.constant 0 : i32
    %270 = vector.broadcast %c1_i32_120 : i32 to vector<64x24xi32>
    %271 = vector.broadcast %c0_i32_121 : i32 to vector<64x24xi32>
    %272 = arith.select %269, %270, %271 : vector<64x24xi1>, vector<64x24xi32>
    %273 = arith.addi %267, %272 : vector<64x24xi32>
    %c18_i32_122 = arith.constant 18 : i32
    %274 = vector.broadcast %c18_i32_122 : i32 to vector<64x24xi32>
    %275 = arith.cmpi sge, %199, %274 : vector<64x24xi32>
    %c1_i32_123 = arith.constant 1 : i32
    %c0_i32_124 = arith.constant 0 : i32
    %276 = vector.broadcast %c1_i32_123 : i32 to vector<64x24xi32>
    %277 = vector.broadcast %c0_i32_124 : i32 to vector<64x24xi32>
    %278 = arith.select %275, %276, %277 : vector<64x24xi1>, vector<64x24xi32>
    %279 = arith.addi %273, %278 : vector<64x24xi32>
    %c21_i32_125 = arith.constant 21 : i32
    %280 = vector.broadcast %c21_i32_125 : i32 to vector<64x24xi32>
    %281 = arith.cmpi sge, %199, %280 : vector<64x24xi32>
    %c1_i32_126 = arith.constant 1 : i32
    %c0_i32_127 = arith.constant 0 : i32
    %282 = vector.broadcast %c1_i32_126 : i32 to vector<64x24xi32>
    %283 = vector.broadcast %c0_i32_127 : i32 to vector<64x24xi32>
    %284 = arith.select %281, %282, %283 : vector<64x24xi1>, vector<64x24xi32>
    %285 = arith.addi %279, %284 : vector<64x24xi32>
    %286 = arith.cmpi eq, %242, %285 : vector<64x24xi32>
    %cst_128 = arith.constant 0.000000e+00 : f32
    %cst_129 = arith.constant -1.000000e+09 : f32
    %287 = vector.broadcast %cst_128 : f32 to vector<64x24xf32>
    %288 = vector.broadcast %cst_129 : f32 to vector<64x24xf32>
    %289 = arith.select %286, %287, %288 : vector<64x24xi1>, vector<64x24xf32>
    %290 = arith.addf %11, %12 : vector<6x32xf32>
    %c0_130 = arith.constant 0 : index
    %c0_131 = arith.constant 0 : index
    %291 = vector.load %arg6[%c0_130, %c0_131] : memref<337x128xf32, #tpu.memory_space<vmem>>, vector<32x128xf32>
    %c320 = arith.constant 320 : index
    %c0_132 = arith.constant 0 : index
    %292 = vector.load %arg6[%c320, %c0_132] : memref<337x128xf32, #tpu.memory_space<vmem>>, vector<1x128xf32>
    %293 = vector.extract_strided_slice %291 {offsets = [0, 0], sizes = [32, 64], strides = [1, 1]} : vector<32x128xf32> to vector<32x64xf32>
    %cst_133 = arith.constant dense<0.000000e+00> : vector<6x64xf32>
    %294 = tpu.matmul %290, %293, %cst_133 {dimension_numbers = #tpu.dot_dimension_numbers<[1], [0], [0], [1], [0, 0, 1, 1], [], []>} : vector<6x32xf32>, vector<32x64xf32>, vector<6x64xf32> -> vector<6x64xf32>
    %295 = vector.extract_strided_slice %292 {offsets = [0, 0], sizes = [1, 64], strides = [1, 1]} : vector<1x128xf32> to vector<1x64xf32>
    %296 = vector.broadcast %295 : vector<1x64xf32> to vector<6x64xf32>
    %297 = arith.addf %294, %296 : vector<6x64xf32>
    %298 = vector.extract_strided_slice %297 {offsets = [0, 0], sizes = [6, 32], strides = [1, 1]} : vector<6x64xf32> to vector<6x32xf32>
    %299 = vector.extract_strided_slice %297 {offsets = [0, 32], sizes = [6, 32], strides = [1, 1]} : vector<6x64xf32> to vector<6x32xf32>
    %300 = vector.extract_strided_slice %291 {offsets = [0, 64], sizes = [32, 32], strides = [1, 1]} : vector<32x128xf32> to vector<32x32xf32>
    %cst_134 = arith.constant dense<0.000000e+00> : vector<6x32xf32>
    %301 = tpu.matmul %11, %300, %cst_134 {dimension_numbers = #tpu.dot_dimension_numbers<[1], [0], [0], [1], [0, 0, 1, 1], [], []>} : vector<6x32xf32>, vector<32x32xf32>, vector<6x32xf32> -> vector<6x32xf32>
    %302 = vector.extract_strided_slice %292 {offsets = [0, 64], sizes = [1, 32], strides = [1, 1]} : vector<1x128xf32> to vector<1x32xf32>
    %303 = vector.broadcast %302 : vector<1x32xf32> to vector<6x32xf32>
    %304 = arith.addf %301, %303 : vector<6x32xf32>
    %305 = vector.extract_strided_slice %298 {offsets = [0, 0], sizes = [6, 8], strides = [1, 1]} : vector<6x32xf32> to vector<6x8xf32>
    %306 = vector.extract_strided_slice %298 {offsets = [0, 8], sizes = [6, 8], strides = [1, 1]} : vector<6x32xf32> to vector<6x8xf32>
    %307 = vector.extract_strided_slice %298 {offsets = [0, 16], sizes = [6, 8], strides = [1, 1]} : vector<6x32xf32> to vector<6x8xf32>
    %308 = vector.extract_strided_slice %298 {offsets = [0, 24], sizes = [6, 8], strides = [1, 1]} : vector<6x32xf32> to vector<6x8xf32>
    %309 = tpu.concatenate %305, %306, %307, %308 in 0 : vector<6x8xf32>, vector<6x8xf32>, vector<6x8xf32>, vector<6x8xf32> -> vector<24x8xf32>
    %cst_135 = arith.constant 0.353553385 : f32
    %310 = vector.broadcast %cst_135 : f32 to vector<24x8xf32>
    %311 = arith.mulf %309, %310 : vector<24x8xf32>
    %312 = vector.extract_strided_slice %299 {offsets = [0, 0], sizes = [6, 8], strides = [1, 1]} : vector<6x32xf32> to vector<6x8xf32>
    %313 = vector.extract_strided_slice %299 {offsets = [0, 8], sizes = [6, 8], strides = [1, 1]} : vector<6x32xf32> to vector<6x8xf32>
    %314 = vector.extract_strided_slice %299 {offsets = [0, 16], sizes = [6, 8], strides = [1, 1]} : vector<6x32xf32> to vector<6x8xf32>
    %315 = vector.extract_strided_slice %299 {offsets = [0, 24], sizes = [6, 8], strides = [1, 1]} : vector<6x32xf32> to vector<6x8xf32>
    %316 = tpu.concatenate %312, %313, %314, %315 in 0 : vector<6x8xf32>, vector<6x8xf32>, vector<6x8xf32>, vector<6x8xf32> -> vector<24x8xf32>
    %317 = vector.extract_strided_slice %304 {offsets = [0, 0], sizes = [6, 8], strides = [1, 1]} : vector<6x32xf32> to vector<6x8xf32>
    %318 = vector.extract_strided_slice %304 {offsets = [0, 8], sizes = [6, 8], strides = [1, 1]} : vector<6x32xf32> to vector<6x8xf32>
    %319 = vector.extract_strided_slice %304 {offsets = [0, 16], sizes = [6, 8], strides = [1, 1]} : vector<6x32xf32> to vector<6x8xf32>
    %320 = vector.extract_strided_slice %304 {offsets = [0, 24], sizes = [6, 8], strides = [1, 1]} : vector<6x32xf32> to vector<6x8xf32>
    %321 = tpu.concatenate %317, %318, %319, %320 in 0 : vector<6x8xf32>, vector<6x8xf32>, vector<6x8xf32>, vector<6x8xf32> -> vector<24x8xf32>
    %cst_136 = arith.constant dense<0.000000e+00> : vector<24x24xf32>
    %322 = tpu.matmul %311, %316, %cst_136 {dimension_numbers = #tpu.dot_dimension_numbers<[1], [1], [0], [0], [0, 0, 1, 0], [], []>} : vector<24x8xf32>, vector<24x8xf32>, vector<24x24xf32> -> vector<24x24xf32>
    %323 = arith.addf %322, %105 : vector<24x24xf32>
    %cst_137 = arith.constant dense<0xFF800000> : vector<24xf32>
    %324 = vector.multi_reduction <maximumf>, %323, %cst_137 [1] : vector<24x24xf32> to vector<24xf32>
    %325 = vector.shape_cast %324 : vector<24xf32> to vector<24x1xf32>
    %326 = vector.broadcast %325 : vector<24x1xf32> to vector<24x24xf32>
    %327 = arith.subf %323, %326 : vector<24x24xf32>
    %328 = math.exp %327 : vector<24x24xf32>
    %cst_138 = arith.constant dense<0.000000e+00> : vector<24xf32>
    %329 = vector.multi_reduction <add>, %328, %cst_138 [1] : vector<24x24xf32> to vector<24xf32>
    %330 = vector.shape_cast %329 : vector<24xf32> to vector<24x1xf32>
    %331 = vector.broadcast %330 : vector<24x1xf32> to vector<24x24xf32>
    %332 = arith.divf %328, %331 : vector<24x24xf32>
    %cst_139 = arith.constant dense<0.000000e+00> : vector<24x8xf32>
    %333 = tpu.matmul %332, %321, %cst_139 {dimension_numbers = #tpu.dot_dimension_numbers<[1], [0], [0], [1], [0, 0, 1, 1], [], []>} : vector<24x24xf32>, vector<24x8xf32>, vector<24x8xf32> -> vector<24x8xf32>
    %334 = vector.extract_strided_slice %333 {offsets = [0, 0], sizes = [6, 8], strides = [1, 1]} : vector<24x8xf32> to vector<6x8xf32>
    %335 = vector.extract_strided_slice %333 {offsets = [6, 0], sizes = [6, 8], strides = [1, 1]} : vector<24x8xf32> to vector<6x8xf32>
    %336 = vector.extract_strided_slice %333 {offsets = [12, 0], sizes = [6, 8], strides = [1, 1]} : vector<24x8xf32> to vector<6x8xf32>
    %337 = vector.extract_strided_slice %333 {offsets = [18, 0], sizes = [6, 8], strides = [1, 1]} : vector<24x8xf32> to vector<6x8xf32>
    %338 = tpu.concatenate %334, %335, %336, %337 in 1 : vector<6x8xf32>, vector<6x8xf32>, vector<6x8xf32>, vector<6x8xf32> -> vector<6x32xf32>
    %339 = vector.extract_strided_slice %291 {offsets = [0, 96], sizes = [32, 32], strides = [1, 1]} : vector<32x128xf32> to vector<32x32xf32>
    %cst_140 = arith.constant dense<0.000000e+00> : vector<6x32xf32>
    %340 = tpu.matmul %338, %339, %cst_140 {dimension_numbers = #tpu.dot_dimension_numbers<[1], [0], [0], [1], [0, 0, 1, 1], [], []>} : vector<6x32xf32>, vector<32x32xf32>, vector<6x32xf32> -> vector<6x32xf32>
    %341 = vector.extract_strided_slice %292 {offsets = [0, 96], sizes = [1, 32], strides = [1, 1]} : vector<1x128xf32> to vector<1x32xf32>
    %342 = vector.broadcast %341 : vector<1x32xf32> to vector<6x32xf32>
    %343 = arith.addf %340, %342 : vector<6x32xf32>
    %344 = arith.addf %11, %343 : vector<6x32xf32>
    %c326 = arith.constant 326 : index
    %c0_141 = arith.constant 0 : index
    %345 = vector.load %arg6[%c326, %c0_141] : memref<337x128xf32, #tpu.memory_space<vmem>>, vector<1x128xf32>
    %346 = vector.extract_strided_slice %345 {offsets = [0, 0], sizes = [1, 32], strides = [1, 1]} : vector<1x128xf32> to vector<1x32xf32>
    %347 = vector.extract_strided_slice %345 {offsets = [0, 32], sizes = [1, 32], strides = [1, 1]} : vector<1x128xf32> to vector<1x32xf32>
    %cst_142 = arith.constant dense<0.000000e+00> : vector<6xf32>
    %348 = vector.multi_reduction <add>, %344, %cst_142 [1] : vector<6x32xf32> to vector<6xf32>
    %349 = vector.shape_cast %348 : vector<6xf32> to vector<6x1xf32>
    %cst_143 = arith.constant 3.200000e+01 : f32
    %350 = vector.broadcast %cst_143 : f32 to vector<6x1xf32>
    %351 = arith.divf %349, %350 : vector<6x1xf32>
    %352 = vector.broadcast %351 : vector<6x1xf32> to vector<6x32xf32>
    %353 = arith.subf %344, %352 : vector<6x32xf32>
    %354 = arith.mulf %353, %353 : vector<6x32xf32>
    %cst_144 = arith.constant dense<0.000000e+00> : vector<6xf32>
    %355 = vector.multi_reduction <add>, %354, %cst_144 [1] : vector<6x32xf32> to vector<6xf32>
    %356 = vector.shape_cast %355 : vector<6xf32> to vector<6x1xf32>
    %cst_145 = arith.constant 3.200000e+01 : f32
    %357 = vector.broadcast %cst_145 : f32 to vector<6x1xf32>
    %358 = arith.divf %356, %357 : vector<6x1xf32>
    %cst_146 = arith.constant 9.99999974E-6 : f32
    %359 = vector.broadcast %cst_146 : f32 to vector<6x1xf32>
    %360 = arith.addf %358, %359 : vector<6x1xf32>
    %361 = math.rsqrt %360 : vector<6x1xf32>
    %362 = vector.broadcast %361 : vector<6x1xf32> to vector<6x32xf32>
    %363 = arith.mulf %353, %362 : vector<6x32xf32>
    %364 = vector.broadcast %346 : vector<1x32xf32> to vector<6x32xf32>
    %365 = arith.mulf %363, %364 : vector<6x32xf32>
    %366 = vector.broadcast %347 : vector<1x32xf32> to vector<6x32xf32>
    %367 = arith.addf %365, %366 : vector<6x32xf32>
    %c192 = arith.constant 192 : index
    %c0_147 = arith.constant 0 : index
    %368 = vector.load %arg6[%c192, %c0_147] : memref<337x128xf32, #tpu.memory_space<vmem>>, vector<32x128xf32>
    %369 = vector.extract_strided_slice %368 {offsets = [0, 0], sizes = [32, 64], strides = [1, 1]} : vector<32x128xf32> to vector<32x64xf32>
    %c256 = arith.constant 256 : index
    %c0_148 = arith.constant 0 : index
    %370 = vector.load %arg6[%c256, %c0_148] : memref<337x128xf32, #tpu.memory_space<vmem>>, vector<64x128xf32>
    %371 = vector.extract_strided_slice %370 {offsets = [0, 0], sizes = [64, 32], strides = [1, 1]} : vector<64x128xf32> to vector<64x32xf32>
    %c332 = arith.constant 332 : index
    %c0_149 = arith.constant 0 : index
    %372 = vector.load %arg6[%c332, %c0_149] : memref<337x128xf32, #tpu.memory_space<vmem>>, vector<1x128xf32>
    %cst_150 = arith.constant dense<0.000000e+00> : vector<6x64xf32>
    %373 = tpu.matmul %367, %369, %cst_150 {dimension_numbers = #tpu.dot_dimension_numbers<[1], [0], [0], [1], [0, 0, 1, 1], [], []>} : vector<6x32xf32>, vector<32x64xf32>, vector<6x64xf32> -> vector<6x64xf32>
    %374 = vector.extract_strided_slice %372 {offsets = [0, 0], sizes = [1, 64], strides = [1, 1]} : vector<1x128xf32> to vector<1x64xf32>
    %375 = vector.broadcast %374 : vector<1x64xf32> to vector<6x64xf32>
    %376 = arith.addf %373, %375 : vector<6x64xf32>
    %cst_151 = arith.constant 0.000000e+00 : f32
    %377 = vector.broadcast %cst_151 : f32 to vector<6x64xf32>
    %378 = arith.maximumf %376, %377 : vector<6x64xf32>
    %cst_152 = arith.constant dense<0.000000e+00> : vector<6x32xf32>
    %379 = tpu.matmul %378, %371, %cst_152 {dimension_numbers = #tpu.dot_dimension_numbers<[1], [0], [0], [1], [0, 0, 1, 1], [], []>} : vector<6x64xf32>, vector<64x32xf32>, vector<6x32xf32> -> vector<6x32xf32>
    %380 = vector.extract_strided_slice %372 {offsets = [0, 64], sizes = [1, 32], strides = [1, 1]} : vector<1x128xf32> to vector<1x32xf32>
    %381 = vector.broadcast %380 : vector<1x32xf32> to vector<6x32xf32>
    %382 = arith.addf %379, %381 : vector<6x32xf32>
    %383 = arith.addf %367, %382 : vector<6x32xf32>
    %c326_153 = arith.constant 326 : index
    %c0_154 = arith.constant 0 : index
    %384 = vector.load %arg6[%c326_153, %c0_154] : memref<337x128xf32, #tpu.memory_space<vmem>>, vector<1x128xf32>
    %385 = vector.extract_strided_slice %384 {offsets = [0, 64], sizes = [1, 32], strides = [1, 1]} : vector<1x128xf32> to vector<1x32xf32>
    %386 = vector.extract_strided_slice %384 {offsets = [0, 96], sizes = [1, 32], strides = [1, 1]} : vector<1x128xf32> to vector<1x32xf32>
    %cst_155 = arith.constant dense<0.000000e+00> : vector<6xf32>
    %387 = vector.multi_reduction <add>, %383, %cst_155 [1] : vector<6x32xf32> to vector<6xf32>
    %388 = vector.shape_cast %387 : vector<6xf32> to vector<6x1xf32>
    %cst_156 = arith.constant 3.200000e+01 : f32
    %389 = vector.broadcast %cst_156 : f32 to vector<6x1xf32>
    %390 = arith.divf %388, %389 : vector<6x1xf32>
    %391 = vector.broadcast %390 : vector<6x1xf32> to vector<6x32xf32>
    %392 = arith.subf %383, %391 : vector<6x32xf32>
    %393 = arith.mulf %392, %392 : vector<6x32xf32>
    %cst_157 = arith.constant dense<0.000000e+00> : vector<6xf32>
    %394 = vector.multi_reduction <add>, %393, %cst_157 [1] : vector<6x32xf32> to vector<6xf32>
    %395 = vector.shape_cast %394 : vector<6xf32> to vector<6x1xf32>
    %cst_158 = arith.constant 3.200000e+01 : f32
    %396 = vector.broadcast %cst_158 : f32 to vector<6x1xf32>
    %397 = arith.divf %395, %396 : vector<6x1xf32>
    %cst_159 = arith.constant 9.99999974E-6 : f32
    %398 = vector.broadcast %cst_159 : f32 to vector<6x1xf32>
    %399 = arith.addf %397, %398 : vector<6x1xf32>
    %400 = math.rsqrt %399 : vector<6x1xf32>
    %401 = vector.broadcast %400 : vector<6x1xf32> to vector<6x32xf32>
    %402 = arith.mulf %392, %401 : vector<6x32xf32>
    %403 = vector.broadcast %385 : vector<1x32xf32> to vector<6x32xf32>
    %404 = arith.mulf %402, %403 : vector<6x32xf32>
    %405 = vector.broadcast %386 : vector<1x32xf32> to vector<6x32xf32>
    %406 = arith.addf %404, %405 : vector<6x32xf32>
    %407 = arith.addf %406, %12 : vector<6x32xf32>
    %c32 = arith.constant 32 : index
    %c0_160 = arith.constant 0 : index
    %408 = vector.load %arg6[%c32, %c0_160] : memref<337x128xf32, #tpu.memory_space<vmem>>, vector<32x128xf32>
    %c321 = arith.constant 321 : index
    %c0_161 = arith.constant 0 : index
    %409 = vector.load %arg6[%c321, %c0_161] : memref<337x128xf32, #tpu.memory_space<vmem>>, vector<1x128xf32>
    %410 = vector.extract_strided_slice %408 {offsets = [0, 0], sizes = [32, 64], strides = [1, 1]} : vector<32x128xf32> to vector<32x64xf32>
    %cst_162 = arith.constant dense<0.000000e+00> : vector<6x64xf32>
    %411 = tpu.matmul %407, %410, %cst_162 {dimension_numbers = #tpu.dot_dimension_numbers<[1], [0], [0], [1], [0, 0, 1, 1], [], []>} : vector<6x32xf32>, vector<32x64xf32>, vector<6x64xf32> -> vector<6x64xf32>
    %412 = vector.extract_strided_slice %409 {offsets = [0, 0], sizes = [1, 64], strides = [1, 1]} : vector<1x128xf32> to vector<1x64xf32>
    %413 = vector.broadcast %412 : vector<1x64xf32> to vector<6x64xf32>
    %414 = arith.addf %411, %413 : vector<6x64xf32>
    %415 = vector.extract_strided_slice %414 {offsets = [0, 0], sizes = [6, 32], strides = [1, 1]} : vector<6x64xf32> to vector<6x32xf32>
    %416 = vector.extract_strided_slice %414 {offsets = [0, 32], sizes = [6, 32], strides = [1, 1]} : vector<6x64xf32> to vector<6x32xf32>
    %417 = vector.extract_strided_slice %408 {offsets = [0, 64], sizes = [32, 32], strides = [1, 1]} : vector<32x128xf32> to vector<32x32xf32>
    %cst_163 = arith.constant dense<0.000000e+00> : vector<6x32xf32>
    %418 = tpu.matmul %406, %417, %cst_163 {dimension_numbers = #tpu.dot_dimension_numbers<[1], [0], [0], [1], [0, 0, 1, 1], [], []>} : vector<6x32xf32>, vector<32x32xf32>, vector<6x32xf32> -> vector<6x32xf32>
    %419 = vector.extract_strided_slice %409 {offsets = [0, 64], sizes = [1, 32], strides = [1, 1]} : vector<1x128xf32> to vector<1x32xf32>
    %420 = vector.broadcast %419 : vector<1x32xf32> to vector<6x32xf32>
    %421 = arith.addf %418, %420 : vector<6x32xf32>
    %422 = vector.extract_strided_slice %415 {offsets = [0, 0], sizes = [6, 8], strides = [1, 1]} : vector<6x32xf32> to vector<6x8xf32>
    %423 = vector.extract_strided_slice %415 {offsets = [0, 8], sizes = [6, 8], strides = [1, 1]} : vector<6x32xf32> to vector<6x8xf32>
    %424 = vector.extract_strided_slice %415 {offsets = [0, 16], sizes = [6, 8], strides = [1, 1]} : vector<6x32xf32> to vector<6x8xf32>
    %425 = vector.extract_strided_slice %415 {offsets = [0, 24], sizes = [6, 8], strides = [1, 1]} : vector<6x32xf32> to vector<6x8xf32>
    %426 = tpu.concatenate %422, %423, %424, %425 in 0 : vector<6x8xf32>, vector<6x8xf32>, vector<6x8xf32>, vector<6x8xf32> -> vector<24x8xf32>
    %cst_164 = arith.constant 0.353553385 : f32
    %427 = vector.broadcast %cst_164 : f32 to vector<24x8xf32>
    %428 = arith.mulf %426, %427 : vector<24x8xf32>
    %429 = vector.extract_strided_slice %416 {offsets = [0, 0], sizes = [6, 8], strides = [1, 1]} : vector<6x32xf32> to vector<6x8xf32>
    %430 = vector.extract_strided_slice %416 {offsets = [0, 8], sizes = [6, 8], strides = [1, 1]} : vector<6x32xf32> to vector<6x8xf32>
    %431 = vector.extract_strided_slice %416 {offsets = [0, 16], sizes = [6, 8], strides = [1, 1]} : vector<6x32xf32> to vector<6x8xf32>
    %432 = vector.extract_strided_slice %416 {offsets = [0, 24], sizes = [6, 8], strides = [1, 1]} : vector<6x32xf32> to vector<6x8xf32>
    %433 = tpu.concatenate %429, %430, %431, %432 in 0 : vector<6x8xf32>, vector<6x8xf32>, vector<6x8xf32>, vector<6x8xf32> -> vector<24x8xf32>
    %434 = vector.extract_strided_slice %421 {offsets = [0, 0], sizes = [6, 8], strides = [1, 1]} : vector<6x32xf32> to vector<6x8xf32>
    %435 = vector.extract_strided_slice %421 {offsets = [0, 8], sizes = [6, 8], strides = [1, 1]} : vector<6x32xf32> to vector<6x8xf32>
    %436 = vector.extract_strided_slice %421 {offsets = [0, 16], sizes = [6, 8], strides = [1, 1]} : vector<6x32xf32> to vector<6x8xf32>
    %437 = vector.extract_strided_slice %421 {offsets = [0, 24], sizes = [6, 8], strides = [1, 1]} : vector<6x32xf32> to vector<6x8xf32>
    %438 = tpu.concatenate %434, %435, %436, %437 in 0 : vector<6x8xf32>, vector<6x8xf32>, vector<6x8xf32>, vector<6x8xf32> -> vector<24x8xf32>
    %cst_165 = arith.constant dense<0.000000e+00> : vector<24x24xf32>
    %439 = tpu.matmul %428, %433, %cst_165 {dimension_numbers = #tpu.dot_dimension_numbers<[1], [1], [0], [0], [0, 0, 1, 0], [], []>} : vector<24x8xf32>, vector<24x8xf32>, vector<24x24xf32> -> vector<24x24xf32>
    %440 = arith.addf %439, %105 : vector<24x24xf32>
    %cst_166 = arith.constant dense<0xFF800000> : vector<24xf32>
    %441 = vector.multi_reduction <maximumf>, %440, %cst_166 [1] : vector<24x24xf32> to vector<24xf32>
    %442 = vector.shape_cast %441 : vector<24xf32> to vector<24x1xf32>
    %443 = vector.broadcast %442 : vector<24x1xf32> to vector<24x24xf32>
    %444 = arith.subf %440, %443 : vector<24x24xf32>
    %445 = math.exp %444 : vector<24x24xf32>
    %cst_167 = arith.constant dense<0.000000e+00> : vector<24xf32>
    %446 = vector.multi_reduction <add>, %445, %cst_167 [1] : vector<24x24xf32> to vector<24xf32>
    %447 = vector.shape_cast %446 : vector<24xf32> to vector<24x1xf32>
    %448 = vector.broadcast %447 : vector<24x1xf32> to vector<24x24xf32>
    %449 = arith.divf %445, %448 : vector<24x24xf32>
    %cst_168 = arith.constant dense<0.000000e+00> : vector<24x8xf32>
    %450 = tpu.matmul %449, %438, %cst_168 {dimension_numbers = #tpu.dot_dimension_numbers<[1], [0], [0], [1], [0, 0, 1, 1], [], []>} : vector<24x24xf32>, vector<24x8xf32>, vector<24x8xf32> -> vector<24x8xf32>
    %451 = vector.extract_strided_slice %450 {offsets = [0, 0], sizes = [6, 8], strides = [1, 1]} : vector<24x8xf32> to vector<6x8xf32>
    %452 = vector.extract_strided_slice %450 {offsets = [6, 0], sizes = [6, 8], strides = [1, 1]} : vector<24x8xf32> to vector<6x8xf32>
    %453 = vector.extract_strided_slice %450 {offsets = [12, 0], sizes = [6, 8], strides = [1, 1]} : vector<24x8xf32> to vector<6x8xf32>
    %454 = vector.extract_strided_slice %450 {offsets = [18, 0], sizes = [6, 8], strides = [1, 1]} : vector<24x8xf32> to vector<6x8xf32>
    %455 = tpu.concatenate %451, %452, %453, %454 in 1 : vector<6x8xf32>, vector<6x8xf32>, vector<6x8xf32>, vector<6x8xf32> -> vector<6x32xf32>
    %456 = vector.extract_strided_slice %408 {offsets = [0, 96], sizes = [32, 32], strides = [1, 1]} : vector<32x128xf32> to vector<32x32xf32>
    %cst_169 = arith.constant dense<0.000000e+00> : vector<6x32xf32>
    %457 = tpu.matmul %455, %456, %cst_169 {dimension_numbers = #tpu.dot_dimension_numbers<[1], [0], [0], [1], [0, 0, 1, 1], [], []>} : vector<6x32xf32>, vector<32x32xf32>, vector<6x32xf32> -> vector<6x32xf32>
    %458 = vector.extract_strided_slice %409 {offsets = [0, 96], sizes = [1, 32], strides = [1, 1]} : vector<1x128xf32> to vector<1x32xf32>
    %459 = vector.broadcast %458 : vector<1x32xf32> to vector<6x32xf32>
    %460 = arith.addf %457, %459 : vector<6x32xf32>
    %461 = arith.addf %406, %460 : vector<6x32xf32>
    %c327 = arith.constant 327 : index
    %c0_170 = arith.constant 0 : index
    %462 = vector.load %arg6[%c327, %c0_170] : memref<337x128xf32, #tpu.memory_space<vmem>>, vector<1x128xf32>
    %463 = vector.extract_strided_slice %462 {offsets = [0, 0], sizes = [1, 32], strides = [1, 1]} : vector<1x128xf32> to vector<1x32xf32>
    %464 = vector.extract_strided_slice %462 {offsets = [0, 32], sizes = [1, 32], strides = [1, 1]} : vector<1x128xf32> to vector<1x32xf32>
    %cst_171 = arith.constant dense<0.000000e+00> : vector<6xf32>
    %465 = vector.multi_reduction <add>, %461, %cst_171 [1] : vector<6x32xf32> to vector<6xf32>
    %466 = vector.shape_cast %465 : vector<6xf32> to vector<6x1xf32>
    %cst_172 = arith.constant 3.200000e+01 : f32
    %467 = vector.broadcast %cst_172 : f32 to vector<6x1xf32>
    %468 = arith.divf %466, %467 : vector<6x1xf32>
    %469 = vector.broadcast %468 : vector<6x1xf32> to vector<6x32xf32>
    %470 = arith.subf %461, %469 : vector<6x32xf32>
    %471 = arith.mulf %470, %470 : vector<6x32xf32>
    %cst_173 = arith.constant dense<0.000000e+00> : vector<6xf32>
    %472 = vector.multi_reduction <add>, %471, %cst_173 [1] : vector<6x32xf32> to vector<6xf32>
    %473 = vector.shape_cast %472 : vector<6xf32> to vector<6x1xf32>
    %cst_174 = arith.constant 3.200000e+01 : f32
    %474 = vector.broadcast %cst_174 : f32 to vector<6x1xf32>
    %475 = arith.divf %473, %474 : vector<6x1xf32>
    %cst_175 = arith.constant 9.99999974E-6 : f32
    %476 = vector.broadcast %cst_175 : f32 to vector<6x1xf32>
    %477 = arith.addf %475, %476 : vector<6x1xf32>
    %478 = math.rsqrt %477 : vector<6x1xf32>
    %479 = vector.broadcast %478 : vector<6x1xf32> to vector<6x32xf32>
    %480 = arith.mulf %470, %479 : vector<6x32xf32>
    %481 = vector.broadcast %463 : vector<1x32xf32> to vector<6x32xf32>
    %482 = arith.mulf %480, %481 : vector<6x32xf32>
    %483 = vector.broadcast %464 : vector<1x32xf32> to vector<6x32xf32>
    %484 = arith.addf %482, %483 : vector<6x32xf32>
    %c192_176 = arith.constant 192 : index
    %c0_177 = arith.constant 0 : index
    %485 = vector.load %arg6[%c192_176, %c0_177] : memref<337x128xf32, #tpu.memory_space<vmem>>, vector<32x128xf32>
    %486 = vector.extract_strided_slice %485 {offsets = [0, 64], sizes = [32, 64], strides = [1, 1]} : vector<32x128xf32> to vector<32x64xf32>
    %c256_178 = arith.constant 256 : index
    %c0_179 = arith.constant 0 : index
    %487 = vector.load %arg6[%c256_178, %c0_179] : memref<337x128xf32, #tpu.memory_space<vmem>>, vector<64x128xf32>
    %488 = vector.extract_strided_slice %487 {offsets = [0, 32], sizes = [64, 32], strides = [1, 1]} : vector<64x128xf32> to vector<64x32xf32>
    %c333 = arith.constant 333 : index
    %c0_180 = arith.constant 0 : index
    %489 = vector.load %arg6[%c333, %c0_180] : memref<337x128xf32, #tpu.memory_space<vmem>>, vector<1x128xf32>
    %cst_181 = arith.constant dense<0.000000e+00> : vector<6x64xf32>
    %490 = tpu.matmul %484, %486, %cst_181 {dimension_numbers = #tpu.dot_dimension_numbers<[1], [0], [0], [1], [0, 0, 1, 1], [], []>} : vector<6x32xf32>, vector<32x64xf32>, vector<6x64xf32> -> vector<6x64xf32>
    %491 = vector.extract_strided_slice %489 {offsets = [0, 0], sizes = [1, 64], strides = [1, 1]} : vector<1x128xf32> to vector<1x64xf32>
    %492 = vector.broadcast %491 : vector<1x64xf32> to vector<6x64xf32>
    %493 = arith.addf %490, %492 : vector<6x64xf32>
    %cst_182 = arith.constant 0.000000e+00 : f32
    %494 = vector.broadcast %cst_182 : f32 to vector<6x64xf32>
    %495 = arith.maximumf %493, %494 : vector<6x64xf32>
    %cst_183 = arith.constant dense<0.000000e+00> : vector<6x32xf32>
    %496 = tpu.matmul %495, %488, %cst_183 {dimension_numbers = #tpu.dot_dimension_numbers<[1], [0], [0], [1], [0, 0, 1, 1], [], []>} : vector<6x64xf32>, vector<64x32xf32>, vector<6x32xf32> -> vector<6x32xf32>
    %497 = vector.extract_strided_slice %489 {offsets = [0, 64], sizes = [1, 32], strides = [1, 1]} : vector<1x128xf32> to vector<1x32xf32>
    %498 = vector.broadcast %497 : vector<1x32xf32> to vector<6x32xf32>
    %499 = arith.addf %496, %498 : vector<6x32xf32>
    %500 = arith.addf %484, %499 : vector<6x32xf32>
    %c327_184 = arith.constant 327 : index
    %c0_185 = arith.constant 0 : index
    %501 = vector.load %arg6[%c327_184, %c0_185] : memref<337x128xf32, #tpu.memory_space<vmem>>, vector<1x128xf32>
    %502 = vector.extract_strided_slice %501 {offsets = [0, 64], sizes = [1, 32], strides = [1, 1]} : vector<1x128xf32> to vector<1x32xf32>
    %503 = vector.extract_strided_slice %501 {offsets = [0, 96], sizes = [1, 32], strides = [1, 1]} : vector<1x128xf32> to vector<1x32xf32>
    %cst_186 = arith.constant dense<0.000000e+00> : vector<6xf32>
    %504 = vector.multi_reduction <add>, %500, %cst_186 [1] : vector<6x32xf32> to vector<6xf32>
    %505 = vector.shape_cast %504 : vector<6xf32> to vector<6x1xf32>
    %cst_187 = arith.constant 3.200000e+01 : f32
    %506 = vector.broadcast %cst_187 : f32 to vector<6x1xf32>
    %507 = arith.divf %505, %506 : vector<6x1xf32>
    %508 = vector.broadcast %507 : vector<6x1xf32> to vector<6x32xf32>
    %509 = arith.subf %500, %508 : vector<6x32xf32>
    %510 = arith.mulf %509, %509 : vector<6x32xf32>
    %cst_188 = arith.constant dense<0.000000e+00> : vector<6xf32>
    %511 = vector.multi_reduction <add>, %510, %cst_188 [1] : vector<6x32xf32> to vector<6xf32>
    %512 = vector.shape_cast %511 : vector<6xf32> to vector<6x1xf32>
    %cst_189 = arith.constant 3.200000e+01 : f32
    %513 = vector.broadcast %cst_189 : f32 to vector<6x1xf32>
    %514 = arith.divf %512, %513 : vector<6x1xf32>
    %cst_190 = arith.constant 9.99999974E-6 : f32
    %515 = vector.broadcast %cst_190 : f32 to vector<6x1xf32>
    %516 = arith.addf %514, %515 : vector<6x1xf32>
    %517 = math.rsqrt %516 : vector<6x1xf32>
    %518 = vector.broadcast %517 : vector<6x1xf32> to vector<6x32xf32>
    %519 = arith.mulf %509, %518 : vector<6x32xf32>
    %520 = vector.broadcast %502 : vector<1x32xf32> to vector<6x32xf32>
    %521 = arith.mulf %519, %520 : vector<6x32xf32>
    %522 = vector.broadcast %503 : vector<1x32xf32> to vector<6x32xf32>
    %523 = arith.addf %521, %522 : vector<6x32xf32>
    %c336 = arith.constant 336 : index
    %c0_191 = arith.constant 0 : index
    %524 = vector.load %arg6[%c336, %c0_191] : memref<337x128xf32, #tpu.memory_space<vmem>>, vector<1x128xf32>
    %525 = vector.extract_strided_slice %524 {offsets = [0, 0], sizes = [1, 32], strides = [1, 1]} : vector<1x128xf32> to vector<1x32xf32>
    %526 = vector.extract_strided_slice %524 {offsets = [0, 32], sizes = [1, 32], strides = [1, 1]} : vector<1x128xf32> to vector<1x32xf32>
    %cst_192 = arith.constant dense<0.000000e+00> : vector<6xf32>
    %527 = vector.multi_reduction <add>, %523, %cst_192 [1] : vector<6x32xf32> to vector<6xf32>
    %528 = vector.shape_cast %527 : vector<6xf32> to vector<6x1xf32>
    %cst_193 = arith.constant 3.200000e+01 : f32
    %529 = vector.broadcast %cst_193 : f32 to vector<6x1xf32>
    %530 = arith.divf %528, %529 : vector<6x1xf32>
    %531 = vector.broadcast %530 : vector<6x1xf32> to vector<6x32xf32>
    %532 = arith.subf %523, %531 : vector<6x32xf32>
    %533 = arith.mulf %532, %532 : vector<6x32xf32>
    %cst_194 = arith.constant dense<0.000000e+00> : vector<6xf32>
    %534 = vector.multi_reduction <add>, %533, %cst_194 [1] : vector<6x32xf32> to vector<6xf32>
    %535 = vector.shape_cast %534 : vector<6xf32> to vector<6x1xf32>
    %cst_195 = arith.constant 3.200000e+01 : f32
    %536 = vector.broadcast %cst_195 : f32 to vector<6x1xf32>
    %537 = arith.divf %535, %536 : vector<6x1xf32>
    %cst_196 = arith.constant 9.99999974E-6 : f32
    %538 = vector.broadcast %cst_196 : f32 to vector<6x1xf32>
    %539 = arith.addf %537, %538 : vector<6x1xf32>
    %540 = math.rsqrt %539 : vector<6x1xf32>
    %541 = vector.broadcast %540 : vector<6x1xf32> to vector<6x32xf32>
    %542 = arith.mulf %532, %541 : vector<6x32xf32>
    %543 = vector.broadcast %525 : vector<1x32xf32> to vector<6x32xf32>
    %544 = arith.mulf %542, %543 : vector<6x32xf32>
    %545 = vector.broadcast %526 : vector<1x32xf32> to vector<6x32xf32>
    %546 = arith.addf %544, %545 : vector<6x32xf32>
    %547 = arith.addf %546, %12 : vector<6x32xf32>
    %cst_197 = arith.constant 0.000000e+00 : f32
    %548 = vector.broadcast %cst_197 : f32 to vector<16x32xf32>
    %549 = arith.addf %548, %13 : vector<16x32xf32>
    %c64 = arith.constant 64 : index
    %c0_198 = arith.constant 0 : index
    %550 = vector.load %arg6[%c64, %c0_198] : memref<337x128xf32, #tpu.memory_space<vmem>>, vector<32x128xf32>
    %c322 = arith.constant 322 : index
    %c0_199 = arith.constant 0 : index
    %551 = vector.load %arg6[%c322, %c0_199] : memref<337x128xf32, #tpu.memory_space<vmem>>, vector<1x128xf32>
    %552 = vector.extract_strided_slice %550 {offsets = [0, 0], sizes = [32, 64], strides = [1, 1]} : vector<32x128xf32> to vector<32x64xf32>
    %cst_200 = arith.constant dense<0.000000e+00> : vector<16x64xf32>
    %553 = tpu.matmul %549, %552, %cst_200 {dimension_numbers = #tpu.dot_dimension_numbers<[1], [0], [0], [1], [0, 0, 1, 1], [], []>} : vector<16x32xf32>, vector<32x64xf32>, vector<16x64xf32> -> vector<16x64xf32>
    %554 = vector.extract_strided_slice %551 {offsets = [0, 0], sizes = [1, 64], strides = [1, 1]} : vector<1x128xf32> to vector<1x64xf32>
    %555 = vector.broadcast %554 : vector<1x64xf32> to vector<16x64xf32>
    %556 = arith.addf %553, %555 : vector<16x64xf32>
    %557 = vector.extract_strided_slice %556 {offsets = [0, 0], sizes = [16, 32], strides = [1, 1]} : vector<16x64xf32> to vector<16x32xf32>
    %558 = vector.extract_strided_slice %556 {offsets = [0, 32], sizes = [16, 32], strides = [1, 1]} : vector<16x64xf32> to vector<16x32xf32>
    %559 = vector.extract_strided_slice %550 {offsets = [0, 64], sizes = [32, 32], strides = [1, 1]} : vector<32x128xf32> to vector<32x32xf32>
    %cst_201 = arith.constant dense<0.000000e+00> : vector<16x32xf32>
    %560 = tpu.matmul %548, %559, %cst_201 {dimension_numbers = #tpu.dot_dimension_numbers<[1], [0], [0], [1], [0, 0, 1, 1], [], []>} : vector<16x32xf32>, vector<32x32xf32>, vector<16x32xf32> -> vector<16x32xf32>
    %561 = vector.extract_strided_slice %551 {offsets = [0, 64], sizes = [1, 32], strides = [1, 1]} : vector<1x128xf32> to vector<1x32xf32>
    %562 = vector.broadcast %561 : vector<1x32xf32> to vector<16x32xf32>
    %563 = arith.addf %560, %562 : vector<16x32xf32>
    %564 = vector.extract_strided_slice %557 {offsets = [0, 0], sizes = [16, 8], strides = [1, 1]} : vector<16x32xf32> to vector<16x8xf32>
    %565 = vector.extract_strided_slice %557 {offsets = [0, 8], sizes = [16, 8], strides = [1, 1]} : vector<16x32xf32> to vector<16x8xf32>
    %566 = vector.extract_strided_slice %557 {offsets = [0, 16], sizes = [16, 8], strides = [1, 1]} : vector<16x32xf32> to vector<16x8xf32>
    %567 = vector.extract_strided_slice %557 {offsets = [0, 24], sizes = [16, 8], strides = [1, 1]} : vector<16x32xf32> to vector<16x8xf32>
    %568 = tpu.concatenate %564, %565, %566, %567 in 0 : vector<16x8xf32>, vector<16x8xf32>, vector<16x8xf32>, vector<16x8xf32> -> vector<64x8xf32>
    %cst_202 = arith.constant 0.353553385 : f32
    %569 = vector.broadcast %cst_202 : f32 to vector<64x8xf32>
    %570 = arith.mulf %568, %569 : vector<64x8xf32>
    %571 = vector.extract_strided_slice %558 {offsets = [0, 0], sizes = [16, 8], strides = [1, 1]} : vector<16x32xf32> to vector<16x8xf32>
    %572 = vector.extract_strided_slice %558 {offsets = [0, 8], sizes = [16, 8], strides = [1, 1]} : vector<16x32xf32> to vector<16x8xf32>
    %573 = vector.extract_strided_slice %558 {offsets = [0, 16], sizes = [16, 8], strides = [1, 1]} : vector<16x32xf32> to vector<16x8xf32>
    %574 = vector.extract_strided_slice %558 {offsets = [0, 24], sizes = [16, 8], strides = [1, 1]} : vector<16x32xf32> to vector<16x8xf32>
    %575 = tpu.concatenate %571, %572, %573, %574 in 0 : vector<16x8xf32>, vector<16x8xf32>, vector<16x8xf32>, vector<16x8xf32> -> vector<64x8xf32>
    %576 = vector.extract_strided_slice %563 {offsets = [0, 0], sizes = [16, 8], strides = [1, 1]} : vector<16x32xf32> to vector<16x8xf32>
    %577 = vector.extract_strided_slice %563 {offsets = [0, 8], sizes = [16, 8], strides = [1, 1]} : vector<16x32xf32> to vector<16x8xf32>
    %578 = vector.extract_strided_slice %563 {offsets = [0, 16], sizes = [16, 8], strides = [1, 1]} : vector<16x32xf32> to vector<16x8xf32>
    %579 = vector.extract_strided_slice %563 {offsets = [0, 24], sizes = [16, 8], strides = [1, 1]} : vector<16x32xf32> to vector<16x8xf32>
    %580 = tpu.concatenate %576, %577, %578, %579 in 0 : vector<16x8xf32>, vector<16x8xf32>, vector<16x8xf32>, vector<16x8xf32> -> vector<64x8xf32>
    %cst_203 = arith.constant dense<0.000000e+00> : vector<64x64xf32>
    %581 = tpu.matmul %570, %575, %cst_203 {dimension_numbers = #tpu.dot_dimension_numbers<[1], [1], [0], [0], [0, 0, 1, 0], [], []>} : vector<64x8xf32>, vector<64x8xf32>, vector<64x64xf32> -> vector<64x64xf32>
    %582 = arith.addf %581, %197 : vector<64x64xf32>
    %cst_204 = arith.constant dense<0xFF800000> : vector<64xf32>
    %583 = vector.multi_reduction <maximumf>, %582, %cst_204 [1] : vector<64x64xf32> to vector<64xf32>
    %584 = vector.shape_cast %583 : vector<64xf32> to vector<64x1xf32>
    %585 = vector.broadcast %584 : vector<64x1xf32> to vector<64x64xf32>
    %586 = arith.subf %582, %585 : vector<64x64xf32>
    %587 = math.exp %586 : vector<64x64xf32>
    %cst_205 = arith.constant dense<0.000000e+00> : vector<64xf32>
    %588 = vector.multi_reduction <add>, %587, %cst_205 [1] : vector<64x64xf32> to vector<64xf32>
    %589 = vector.shape_cast %588 : vector<64xf32> to vector<64x1xf32>
    %590 = vector.broadcast %589 : vector<64x1xf32> to vector<64x64xf32>
    %591 = arith.divf %587, %590 : vector<64x64xf32>
    %cst_206 = arith.constant dense<0.000000e+00> : vector<64x8xf32>
    %592 = tpu.matmul %591, %580, %cst_206 {dimension_numbers = #tpu.dot_dimension_numbers<[1], [0], [0], [1], [0, 0, 1, 1], [], []>} : vector<64x64xf32>, vector<64x8xf32>, vector<64x8xf32> -> vector<64x8xf32>
    %593 = vector.extract_strided_slice %592 {offsets = [0, 0], sizes = [16, 8], strides = [1, 1]} : vector<64x8xf32> to vector<16x8xf32>
    %594 = vector.extract_strided_slice %592 {offsets = [16, 0], sizes = [16, 8], strides = [1, 1]} : vector<64x8xf32> to vector<16x8xf32>
    %595 = vector.extract_strided_slice %592 {offsets = [32, 0], sizes = [16, 8], strides = [1, 1]} : vector<64x8xf32> to vector<16x8xf32>
    %596 = vector.extract_strided_slice %592 {offsets = [48, 0], sizes = [16, 8], strides = [1, 1]} : vector<64x8xf32> to vector<16x8xf32>
    %597 = tpu.concatenate %593, %594, %595, %596 in 1 : vector<16x8xf32>, vector<16x8xf32>, vector<16x8xf32>, vector<16x8xf32> -> vector<16x32xf32>
    %598 = vector.extract_strided_slice %550 {offsets = [0, 96], sizes = [32, 32], strides = [1, 1]} : vector<32x128xf32> to vector<32x32xf32>
    %cst_207 = arith.constant dense<0.000000e+00> : vector<16x32xf32>
    %599 = tpu.matmul %597, %598, %cst_207 {dimension_numbers = #tpu.dot_dimension_numbers<[1], [0], [0], [1], [0, 0, 1, 1], [], []>} : vector<16x32xf32>, vector<32x32xf32>, vector<16x32xf32> -> vector<16x32xf32>
    %600 = vector.extract_strided_slice %551 {offsets = [0, 96], sizes = [1, 32], strides = [1, 1]} : vector<1x128xf32> to vector<1x32xf32>
    %601 = vector.broadcast %600 : vector<1x32xf32> to vector<16x32xf32>
    %602 = arith.addf %599, %601 : vector<16x32xf32>
    %603 = arith.addf %548, %602 : vector<16x32xf32>
    %c328 = arith.constant 328 : index
    %c0_208 = arith.constant 0 : index
    %604 = vector.load %arg6[%c328, %c0_208] : memref<337x128xf32, #tpu.memory_space<vmem>>, vector<1x128xf32>
    %605 = vector.extract_strided_slice %604 {offsets = [0, 0], sizes = [1, 32], strides = [1, 1]} : vector<1x128xf32> to vector<1x32xf32>
    %606 = vector.extract_strided_slice %604 {offsets = [0, 32], sizes = [1, 32], strides = [1, 1]} : vector<1x128xf32> to vector<1x32xf32>
    %cst_209 = arith.constant dense<0.000000e+00> : vector<16xf32>
    %607 = vector.multi_reduction <add>, %603, %cst_209 [1] : vector<16x32xf32> to vector<16xf32>
    %608 = vector.shape_cast %607 : vector<16xf32> to vector<16x1xf32>
    %cst_210 = arith.constant 3.200000e+01 : f32
    %609 = vector.broadcast %cst_210 : f32 to vector<16x1xf32>
    %610 = arith.divf %608, %609 : vector<16x1xf32>
    %611 = vector.broadcast %610 : vector<16x1xf32> to vector<16x32xf32>
    %612 = arith.subf %603, %611 : vector<16x32xf32>
    %613 = arith.mulf %612, %612 : vector<16x32xf32>
    %cst_211 = arith.constant dense<0.000000e+00> : vector<16xf32>
    %614 = vector.multi_reduction <add>, %613, %cst_211 [1] : vector<16x32xf32> to vector<16xf32>
    %615 = vector.shape_cast %614 : vector<16xf32> to vector<16x1xf32>
    %cst_212 = arith.constant 3.200000e+01 : f32
    %616 = vector.broadcast %cst_212 : f32 to vector<16x1xf32>
    %617 = arith.divf %615, %616 : vector<16x1xf32>
    %cst_213 = arith.constant 9.99999974E-6 : f32
    %618 = vector.broadcast %cst_213 : f32 to vector<16x1xf32>
    %619 = arith.addf %617, %618 : vector<16x1xf32>
    %620 = math.rsqrt %619 : vector<16x1xf32>
    %621 = vector.broadcast %620 : vector<16x1xf32> to vector<16x32xf32>
    %622 = arith.mulf %612, %621 : vector<16x32xf32>
    %623 = vector.broadcast %605 : vector<1x32xf32> to vector<16x32xf32>
    %624 = arith.mulf %622, %623 : vector<16x32xf32>
    %625 = vector.broadcast %606 : vector<1x32xf32> to vector<16x32xf32>
    %626 = arith.addf %624, %625 : vector<16x32xf32>
    %627 = arith.addf %626, %13 : vector<16x32xf32>
    %c96 = arith.constant 96 : index
    %c0_214 = arith.constant 0 : index
    %628 = vector.load %arg6[%c96, %c0_214] : memref<337x128xf32, #tpu.memory_space<vmem>>, vector<32x128xf32>
    %c323 = arith.constant 323 : index
    %c0_215 = arith.constant 0 : index
    %629 = vector.load %arg6[%c323, %c0_215] : memref<337x128xf32, #tpu.memory_space<vmem>>, vector<1x128xf32>
    %630 = vector.extract_strided_slice %628 {offsets = [0, 0], sizes = [32, 32], strides = [1, 1]} : vector<32x128xf32> to vector<32x32xf32>
    %cst_216 = arith.constant dense<0.000000e+00> : vector<16x32xf32>
    %631 = tpu.matmul %627, %630, %cst_216 {dimension_numbers = #tpu.dot_dimension_numbers<[1], [0], [0], [1], [0, 0, 1, 1], [], []>} : vector<16x32xf32>, vector<32x32xf32>, vector<16x32xf32> -> vector<16x32xf32>
    %632 = vector.extract_strided_slice %629 {offsets = [0, 0], sizes = [1, 32], strides = [1, 1]} : vector<1x128xf32> to vector<1x32xf32>
    %633 = vector.broadcast %632 : vector<1x32xf32> to vector<16x32xf32>
    %634 = arith.addf %631, %633 : vector<16x32xf32>
    %635 = vector.extract_strided_slice %628 {offsets = [0, 32], sizes = [32, 32], strides = [1, 1]} : vector<32x128xf32> to vector<32x32xf32>
    %cst_217 = arith.constant dense<0.000000e+00> : vector<6x32xf32>
    %636 = tpu.matmul %547, %635, %cst_217 {dimension_numbers = #tpu.dot_dimension_numbers<[1], [0], [0], [1], [0, 0, 1, 1], [], []>} : vector<6x32xf32>, vector<32x32xf32>, vector<6x32xf32> -> vector<6x32xf32>
    %637 = vector.extract_strided_slice %629 {offsets = [0, 32], sizes = [1, 32], strides = [1, 1]} : vector<1x128xf32> to vector<1x32xf32>
    %638 = vector.broadcast %637 : vector<1x32xf32> to vector<6x32xf32>
    %639 = arith.addf %636, %638 : vector<6x32xf32>
    %640 = vector.extract_strided_slice %628 {offsets = [0, 64], sizes = [32, 32], strides = [1, 1]} : vector<32x128xf32> to vector<32x32xf32>
    %cst_218 = arith.constant dense<0.000000e+00> : vector<6x32xf32>
    %641 = tpu.matmul %546, %640, %cst_218 {dimension_numbers = #tpu.dot_dimension_numbers<[1], [0], [0], [1], [0, 0, 1, 1], [], []>} : vector<6x32xf32>, vector<32x32xf32>, vector<6x32xf32> -> vector<6x32xf32>
    %642 = vector.extract_strided_slice %629 {offsets = [0, 64], sizes = [1, 32], strides = [1, 1]} : vector<1x128xf32> to vector<1x32xf32>
    %643 = vector.broadcast %642 : vector<1x32xf32> to vector<6x32xf32>
    %644 = arith.addf %641, %643 : vector<6x32xf32>
    %645 = vector.extract_strided_slice %634 {offsets = [0, 0], sizes = [16, 8], strides = [1, 1]} : vector<16x32xf32> to vector<16x8xf32>
    %646 = vector.extract_strided_slice %634 {offsets = [0, 8], sizes = [16, 8], strides = [1, 1]} : vector<16x32xf32> to vector<16x8xf32>
    %647 = vector.extract_strided_slice %634 {offsets = [0, 16], sizes = [16, 8], strides = [1, 1]} : vector<16x32xf32> to vector<16x8xf32>
    %648 = vector.extract_strided_slice %634 {offsets = [0, 24], sizes = [16, 8], strides = [1, 1]} : vector<16x32xf32> to vector<16x8xf32>
    %649 = tpu.concatenate %645, %646, %647, %648 in 0 : vector<16x8xf32>, vector<16x8xf32>, vector<16x8xf32>, vector<16x8xf32> -> vector<64x8xf32>
    %cst_219 = arith.constant 0.353553385 : f32
    %650 = vector.broadcast %cst_219 : f32 to vector<64x8xf32>
    %651 = arith.mulf %649, %650 : vector<64x8xf32>
    %652 = vector.extract_strided_slice %639 {offsets = [0, 0], sizes = [6, 8], strides = [1, 1]} : vector<6x32xf32> to vector<6x8xf32>
    %653 = vector.extract_strided_slice %639 {offsets = [0, 8], sizes = [6, 8], strides = [1, 1]} : vector<6x32xf32> to vector<6x8xf32>
    %654 = vector.extract_strided_slice %639 {offsets = [0, 16], sizes = [6, 8], strides = [1, 1]} : vector<6x32xf32> to vector<6x8xf32>
    %655 = vector.extract_strided_slice %639 {offsets = [0, 24], sizes = [6, 8], strides = [1, 1]} : vector<6x32xf32> to vector<6x8xf32>
    %656 = tpu.concatenate %652, %653, %654, %655 in 0 : vector<6x8xf32>, vector<6x8xf32>, vector<6x8xf32>, vector<6x8xf32> -> vector<24x8xf32>
    %657 = vector.extract_strided_slice %644 {offsets = [0, 0], sizes = [6, 8], strides = [1, 1]} : vector<6x32xf32> to vector<6x8xf32>
    %658 = vector.extract_strided_slice %644 {offsets = [0, 8], sizes = [6, 8], strides = [1, 1]} : vector<6x32xf32> to vector<6x8xf32>
    %659 = vector.extract_strided_slice %644 {offsets = [0, 16], sizes = [6, 8], strides = [1, 1]} : vector<6x32xf32> to vector<6x8xf32>
    %660 = vector.extract_strided_slice %644 {offsets = [0, 24], sizes = [6, 8], strides = [1, 1]} : vector<6x32xf32> to vector<6x8xf32>
    %661 = tpu.concatenate %657, %658, %659, %660 in 0 : vector<6x8xf32>, vector<6x8xf32>, vector<6x8xf32>, vector<6x8xf32> -> vector<24x8xf32>
    %cst_220 = arith.constant dense<0.000000e+00> : vector<64x24xf32>
    %662 = tpu.matmul %651, %656, %cst_220 {dimension_numbers = #tpu.dot_dimension_numbers<[1], [1], [0], [0], [0, 0, 1, 0], [], []>} : vector<64x8xf32>, vector<24x8xf32>, vector<64x24xf32> -> vector<64x24xf32>
    %663 = arith.addf %662, %289 : vector<64x24xf32>
    %cst_221 = arith.constant dense<0xFF800000> : vector<64xf32>
    %664 = vector.multi_reduction <maximumf>, %663, %cst_221 [1] : vector<64x24xf32> to vector<64xf32>
    %665 = vector.shape_cast %664 : vector<64xf32> to vector<64x1xf32>
    %666 = vector.broadcast %665 : vector<64x1xf32> to vector<64x24xf32>
    %667 = arith.subf %663, %666 : vector<64x24xf32>
    %668 = math.exp %667 : vector<64x24xf32>
    %cst_222 = arith.constant dense<0.000000e+00> : vector<64xf32>
    %669 = vector.multi_reduction <add>, %668, %cst_222 [1] : vector<64x24xf32> to vector<64xf32>
    %670 = vector.shape_cast %669 : vector<64xf32> to vector<64x1xf32>
    %671 = vector.broadcast %670 : vector<64x1xf32> to vector<64x24xf32>
    %672 = arith.divf %668, %671 : vector<64x24xf32>
    %cst_223 = arith.constant dense<0.000000e+00> : vector<64x8xf32>
    %673 = tpu.matmul %672, %661, %cst_223 {dimension_numbers = #tpu.dot_dimension_numbers<[1], [0], [0], [1], [0, 0, 1, 1], [], []>} : vector<64x24xf32>, vector<24x8xf32>, vector<64x8xf32> -> vector<64x8xf32>
    %674 = vector.extract_strided_slice %673 {offsets = [0, 0], sizes = [16, 8], strides = [1, 1]} : vector<64x8xf32> to vector<16x8xf32>
    %675 = vector.extract_strided_slice %673 {offsets = [16, 0], sizes = [16, 8], strides = [1, 1]} : vector<64x8xf32> to vector<16x8xf32>
    %676 = vector.extract_strided_slice %673 {offsets = [32, 0], sizes = [16, 8], strides = [1, 1]} : vector<64x8xf32> to vector<16x8xf32>
    %677 = vector.extract_strided_slice %673 {offsets = [48, 0], sizes = [16, 8], strides = [1, 1]} : vector<64x8xf32> to vector<16x8xf32>
    %678 = tpu.concatenate %674, %675, %676, %677 in 1 : vector<16x8xf32>, vector<16x8xf32>, vector<16x8xf32>, vector<16x8xf32> -> vector<16x32xf32>
    %679 = vector.extract_strided_slice %628 {offsets = [0, 96], sizes = [32, 32], strides = [1, 1]} : vector<32x128xf32> to vector<32x32xf32>
    %cst_224 = arith.constant dense<0.000000e+00> : vector<16x32xf32>
    %680 = tpu.matmul %678, %679, %cst_224 {dimension_numbers = #tpu.dot_dimension_numbers<[1], [0], [0], [1], [0, 0, 1, 1], [], []>} : vector<16x32xf32>, vector<32x32xf32>, vector<16x32xf32> -> vector<16x32xf32>
    %681 = vector.extract_strided_slice %629 {offsets = [0, 96], sizes = [1, 32], strides = [1, 1]} : vector<1x128xf32> to vector<1x32xf32>
    %682 = vector.broadcast %681 : vector<1x32xf32> to vector<16x32xf32>
    %683 = arith.addf %680, %682 : vector<16x32xf32>
    %684 = arith.addf %626, %683 : vector<16x32xf32>
    %c328_225 = arith.constant 328 : index
    %c0_226 = arith.constant 0 : index
    %685 = vector.load %arg6[%c328_225, %c0_226] : memref<337x128xf32, #tpu.memory_space<vmem>>, vector<1x128xf32>
    %686 = vector.extract_strided_slice %685 {offsets = [0, 64], sizes = [1, 32], strides = [1, 1]} : vector<1x128xf32> to vector<1x32xf32>
    %687 = vector.extract_strided_slice %685 {offsets = [0, 96], sizes = [1, 32], strides = [1, 1]} : vector<1x128xf32> to vector<1x32xf32>
    %cst_227 = arith.constant dense<0.000000e+00> : vector<16xf32>
    %688 = vector.multi_reduction <add>, %684, %cst_227 [1] : vector<16x32xf32> to vector<16xf32>
    %689 = vector.shape_cast %688 : vector<16xf32> to vector<16x1xf32>
    %cst_228 = arith.constant 3.200000e+01 : f32
    %690 = vector.broadcast %cst_228 : f32 to vector<16x1xf32>
    %691 = arith.divf %689, %690 : vector<16x1xf32>
    %692 = vector.broadcast %691 : vector<16x1xf32> to vector<16x32xf32>
    %693 = arith.subf %684, %692 : vector<16x32xf32>
    %694 = arith.mulf %693, %693 : vector<16x32xf32>
    %cst_229 = arith.constant dense<0.000000e+00> : vector<16xf32>
    %695 = vector.multi_reduction <add>, %694, %cst_229 [1] : vector<16x32xf32> to vector<16xf32>
    %696 = vector.shape_cast %695 : vector<16xf32> to vector<16x1xf32>
    %cst_230 = arith.constant 3.200000e+01 : f32
    %697 = vector.broadcast %cst_230 : f32 to vector<16x1xf32>
    %698 = arith.divf %696, %697 : vector<16x1xf32>
    %cst_231 = arith.constant 9.99999974E-6 : f32
    %699 = vector.broadcast %cst_231 : f32 to vector<16x1xf32>
    %700 = arith.addf %698, %699 : vector<16x1xf32>
    %701 = math.rsqrt %700 : vector<16x1xf32>
    %702 = vector.broadcast %701 : vector<16x1xf32> to vector<16x32xf32>
    %703 = arith.mulf %693, %702 : vector<16x32xf32>
    %704 = vector.broadcast %686 : vector<1x32xf32> to vector<16x32xf32>
    %705 = arith.mulf %703, %704 : vector<16x32xf32>
    %706 = vector.broadcast %687 : vector<1x32xf32> to vector<16x32xf32>
    %707 = arith.addf %705, %706 : vector<16x32xf32>
    %c224 = arith.constant 224 : index
    %c0_232 = arith.constant 0 : index
    %708 = vector.load %arg6[%c224, %c0_232] : memref<337x128xf32, #tpu.memory_space<vmem>>, vector<32x128xf32>
    %709 = vector.extract_strided_slice %708 {offsets = [0, 0], sizes = [32, 64], strides = [1, 1]} : vector<32x128xf32> to vector<32x64xf32>
    %c256_233 = arith.constant 256 : index
    %c0_234 = arith.constant 0 : index
    %710 = vector.load %arg6[%c256_233, %c0_234] : memref<337x128xf32, #tpu.memory_space<vmem>>, vector<64x128xf32>
    %711 = vector.extract_strided_slice %710 {offsets = [0, 64], sizes = [64, 32], strides = [1, 1]} : vector<64x128xf32> to vector<64x32xf32>
    %c334 = arith.constant 334 : index
    %c0_235 = arith.constant 0 : index
    %712 = vector.load %arg6[%c334, %c0_235] : memref<337x128xf32, #tpu.memory_space<vmem>>, vector<1x128xf32>
    %cst_236 = arith.constant dense<0.000000e+00> : vector<16x64xf32>
    %713 = tpu.matmul %707, %709, %cst_236 {dimension_numbers = #tpu.dot_dimension_numbers<[1], [0], [0], [1], [0, 0, 1, 1], [], []>} : vector<16x32xf32>, vector<32x64xf32>, vector<16x64xf32> -> vector<16x64xf32>
    %714 = vector.extract_strided_slice %712 {offsets = [0, 0], sizes = [1, 64], strides = [1, 1]} : vector<1x128xf32> to vector<1x64xf32>
    %715 = vector.broadcast %714 : vector<1x64xf32> to vector<16x64xf32>
    %716 = arith.addf %713, %715 : vector<16x64xf32>
    %cst_237 = arith.constant 0.000000e+00 : f32
    %717 = vector.broadcast %cst_237 : f32 to vector<16x64xf32>
    %718 = arith.maximumf %716, %717 : vector<16x64xf32>
    %cst_238 = arith.constant dense<0.000000e+00> : vector<16x32xf32>
    %719 = tpu.matmul %718, %711, %cst_238 {dimension_numbers = #tpu.dot_dimension_numbers<[1], [0], [0], [1], [0, 0, 1, 1], [], []>} : vector<16x64xf32>, vector<64x32xf32>, vector<16x32xf32> -> vector<16x32xf32>
    %720 = vector.extract_strided_slice %712 {offsets = [0, 64], sizes = [1, 32], strides = [1, 1]} : vector<1x128xf32> to vector<1x32xf32>
    %721 = vector.broadcast %720 : vector<1x32xf32> to vector<16x32xf32>
    %722 = arith.addf %719, %721 : vector<16x32xf32>
    %723 = arith.addf %707, %722 : vector<16x32xf32>
    %c329 = arith.constant 329 : index
    %c0_239 = arith.constant 0 : index
    %724 = vector.load %arg6[%c329, %c0_239] : memref<337x128xf32, #tpu.memory_space<vmem>>, vector<1x128xf32>
    %725 = vector.extract_strided_slice %724 {offsets = [0, 0], sizes = [1, 32], strides = [1, 1]} : vector<1x128xf32> to vector<1x32xf32>
    %726 = vector.extract_strided_slice %724 {offsets = [0, 32], sizes = [1, 32], strides = [1, 1]} : vector<1x128xf32> to vector<1x32xf32>
    %cst_240 = arith.constant dense<0.000000e+00> : vector<16xf32>
    %727 = vector.multi_reduction <add>, %723, %cst_240 [1] : vector<16x32xf32> to vector<16xf32>
    %728 = vector.shape_cast %727 : vector<16xf32> to vector<16x1xf32>
    %cst_241 = arith.constant 3.200000e+01 : f32
    %729 = vector.broadcast %cst_241 : f32 to vector<16x1xf32>
    %730 = arith.divf %728, %729 : vector<16x1xf32>
    %731 = vector.broadcast %730 : vector<16x1xf32> to vector<16x32xf32>
    %732 = arith.subf %723, %731 : vector<16x32xf32>
    %733 = arith.mulf %732, %732 : vector<16x32xf32>
    %cst_242 = arith.constant dense<0.000000e+00> : vector<16xf32>
    %734 = vector.multi_reduction <add>, %733, %cst_242 [1] : vector<16x32xf32> to vector<16xf32>
    %735 = vector.shape_cast %734 : vector<16xf32> to vector<16x1xf32>
    %cst_243 = arith.constant 3.200000e+01 : f32
    %736 = vector.broadcast %cst_243 : f32 to vector<16x1xf32>
    %737 = arith.divf %735, %736 : vector<16x1xf32>
    %cst_244 = arith.constant 9.99999974E-6 : f32
    %738 = vector.broadcast %cst_244 : f32 to vector<16x1xf32>
    %739 = arith.addf %737, %738 : vector<16x1xf32>
    %740 = math.rsqrt %739 : vector<16x1xf32>
    %741 = vector.broadcast %740 : vector<16x1xf32> to vector<16x32xf32>
    %742 = arith.mulf %732, %741 : vector<16x32xf32>
    %743 = vector.broadcast %725 : vector<1x32xf32> to vector<16x32xf32>
    %744 = arith.mulf %742, %743 : vector<16x32xf32>
    %745 = vector.broadcast %726 : vector<1x32xf32> to vector<16x32xf32>
    %746 = arith.addf %744, %745 : vector<16x32xf32>
    %747 = arith.addf %746, %13 : vector<16x32xf32>
    %c128 = arith.constant 128 : index
    %c0_245 = arith.constant 0 : index
    %748 = vector.load %arg6[%c128, %c0_245] : memref<337x128xf32, #tpu.memory_space<vmem>>, vector<32x128xf32>
    %c324 = arith.constant 324 : index
    %c0_246 = arith.constant 0 : index
    %749 = vector.load %arg6[%c324, %c0_246] : memref<337x128xf32, #tpu.memory_space<vmem>>, vector<1x128xf32>
    %750 = vector.extract_strided_slice %748 {offsets = [0, 0], sizes = [32, 64], strides = [1, 1]} : vector<32x128xf32> to vector<32x64xf32>
    %cst_247 = arith.constant dense<0.000000e+00> : vector<16x64xf32>
    %751 = tpu.matmul %747, %750, %cst_247 {dimension_numbers = #tpu.dot_dimension_numbers<[1], [0], [0], [1], [0, 0, 1, 1], [], []>} : vector<16x32xf32>, vector<32x64xf32>, vector<16x64xf32> -> vector<16x64xf32>
    %752 = vector.extract_strided_slice %749 {offsets = [0, 0], sizes = [1, 64], strides = [1, 1]} : vector<1x128xf32> to vector<1x64xf32>
    %753 = vector.broadcast %752 : vector<1x64xf32> to vector<16x64xf32>
    %754 = arith.addf %751, %753 : vector<16x64xf32>
    %755 = vector.extract_strided_slice %754 {offsets = [0, 0], sizes = [16, 32], strides = [1, 1]} : vector<16x64xf32> to vector<16x32xf32>
    %756 = vector.extract_strided_slice %754 {offsets = [0, 32], sizes = [16, 32], strides = [1, 1]} : vector<16x64xf32> to vector<16x32xf32>
    %757 = vector.extract_strided_slice %748 {offsets = [0, 64], sizes = [32, 32], strides = [1, 1]} : vector<32x128xf32> to vector<32x32xf32>
    %cst_248 = arith.constant dense<0.000000e+00> : vector<16x32xf32>
    %758 = tpu.matmul %746, %757, %cst_248 {dimension_numbers = #tpu.dot_dimension_numbers<[1], [0], [0], [1], [0, 0, 1, 1], [], []>} : vector<16x32xf32>, vector<32x32xf32>, vector<16x32xf32> -> vector<16x32xf32>
    %759 = vector.extract_strided_slice %749 {offsets = [0, 64], sizes = [1, 32], strides = [1, 1]} : vector<1x128xf32> to vector<1x32xf32>
    %760 = vector.broadcast %759 : vector<1x32xf32> to vector<16x32xf32>
    %761 = arith.addf %758, %760 : vector<16x32xf32>
    %762 = vector.extract_strided_slice %755 {offsets = [0, 0], sizes = [16, 8], strides = [1, 1]} : vector<16x32xf32> to vector<16x8xf32>
    %763 = vector.extract_strided_slice %755 {offsets = [0, 8], sizes = [16, 8], strides = [1, 1]} : vector<16x32xf32> to vector<16x8xf32>
    %764 = vector.extract_strided_slice %755 {offsets = [0, 16], sizes = [16, 8], strides = [1, 1]} : vector<16x32xf32> to vector<16x8xf32>
    %765 = vector.extract_strided_slice %755 {offsets = [0, 24], sizes = [16, 8], strides = [1, 1]} : vector<16x32xf32> to vector<16x8xf32>
    %766 = tpu.concatenate %762, %763, %764, %765 in 0 : vector<16x8xf32>, vector<16x8xf32>, vector<16x8xf32>, vector<16x8xf32> -> vector<64x8xf32>
    %cst_249 = arith.constant 0.353553385 : f32
    %767 = vector.broadcast %cst_249 : f32 to vector<64x8xf32>
    %768 = arith.mulf %766, %767 : vector<64x8xf32>
    %769 = vector.extract_strided_slice %756 {offsets = [0, 0], sizes = [16, 8], strides = [1, 1]} : vector<16x32xf32> to vector<16x8xf32>
    %770 = vector.extract_strided_slice %756 {offsets = [0, 8], sizes = [16, 8], strides = [1, 1]} : vector<16x32xf32> to vector<16x8xf32>
    %771 = vector.extract_strided_slice %756 {offsets = [0, 16], sizes = [16, 8], strides = [1, 1]} : vector<16x32xf32> to vector<16x8xf32>
    %772 = vector.extract_strided_slice %756 {offsets = [0, 24], sizes = [16, 8], strides = [1, 1]} : vector<16x32xf32> to vector<16x8xf32>
    %773 = tpu.concatenate %769, %770, %771, %772 in 0 : vector<16x8xf32>, vector<16x8xf32>, vector<16x8xf32>, vector<16x8xf32> -> vector<64x8xf32>
    %774 = vector.extract_strided_slice %761 {offsets = [0, 0], sizes = [16, 8], strides = [1, 1]} : vector<16x32xf32> to vector<16x8xf32>
    %775 = vector.extract_strided_slice %761 {offsets = [0, 8], sizes = [16, 8], strides = [1, 1]} : vector<16x32xf32> to vector<16x8xf32>
    %776 = vector.extract_strided_slice %761 {offsets = [0, 16], sizes = [16, 8], strides = [1, 1]} : vector<16x32xf32> to vector<16x8xf32>
    %777 = vector.extract_strided_slice %761 {offsets = [0, 24], sizes = [16, 8], strides = [1, 1]} : vector<16x32xf32> to vector<16x8xf32>
    %778 = tpu.concatenate %774, %775, %776, %777 in 0 : vector<16x8xf32>, vector<16x8xf32>, vector<16x8xf32>, vector<16x8xf32> -> vector<64x8xf32>
    %cst_250 = arith.constant dense<0.000000e+00> : vector<64x64xf32>
    %779 = tpu.matmul %768, %773, %cst_250 {dimension_numbers = #tpu.dot_dimension_numbers<[1], [1], [0], [0], [0, 0, 1, 0], [], []>} : vector<64x8xf32>, vector<64x8xf32>, vector<64x64xf32> -> vector<64x64xf32>
    %780 = arith.addf %779, %197 : vector<64x64xf32>
    %cst_251 = arith.constant dense<0xFF800000> : vector<64xf32>
    %781 = vector.multi_reduction <maximumf>, %780, %cst_251 [1] : vector<64x64xf32> to vector<64xf32>
    %782 = vector.shape_cast %781 : vector<64xf32> to vector<64x1xf32>
    %783 = vector.broadcast %782 : vector<64x1xf32> to vector<64x64xf32>
    %784 = arith.subf %780, %783 : vector<64x64xf32>
    %785 = math.exp %784 : vector<64x64xf32>
    %cst_252 = arith.constant dense<0.000000e+00> : vector<64xf32>
    %786 = vector.multi_reduction <add>, %785, %cst_252 [1] : vector<64x64xf32> to vector<64xf32>
    %787 = vector.shape_cast %786 : vector<64xf32> to vector<64x1xf32>
    %788 = vector.broadcast %787 : vector<64x1xf32> to vector<64x64xf32>
    %789 = arith.divf %785, %788 : vector<64x64xf32>
    %cst_253 = arith.constant dense<0.000000e+00> : vector<64x8xf32>
    %790 = tpu.matmul %789, %778, %cst_253 {dimension_numbers = #tpu.dot_dimension_numbers<[1], [0], [0], [1], [0, 0, 1, 1], [], []>} : vector<64x64xf32>, vector<64x8xf32>, vector<64x8xf32> -> vector<64x8xf32>
    %791 = vector.extract_strided_slice %790 {offsets = [0, 0], sizes = [16, 8], strides = [1, 1]} : vector<64x8xf32> to vector<16x8xf32>
    %792 = vector.extract_strided_slice %790 {offsets = [16, 0], sizes = [16, 8], strides = [1, 1]} : vector<64x8xf32> to vector<16x8xf32>
    %793 = vector.extract_strided_slice %790 {offsets = [32, 0], sizes = [16, 8], strides = [1, 1]} : vector<64x8xf32> to vector<16x8xf32>
    %794 = vector.extract_strided_slice %790 {offsets = [48, 0], sizes = [16, 8], strides = [1, 1]} : vector<64x8xf32> to vector<16x8xf32>
    %795 = tpu.concatenate %791, %792, %793, %794 in 1 : vector<16x8xf32>, vector<16x8xf32>, vector<16x8xf32>, vector<16x8xf32> -> vector<16x32xf32>
    %796 = vector.extract_strided_slice %748 {offsets = [0, 96], sizes = [32, 32], strides = [1, 1]} : vector<32x128xf32> to vector<32x32xf32>
    %cst_254 = arith.constant dense<0.000000e+00> : vector<16x32xf32>
    %797 = tpu.matmul %795, %796, %cst_254 {dimension_numbers = #tpu.dot_dimension_numbers<[1], [0], [0], [1], [0, 0, 1, 1], [], []>} : vector<16x32xf32>, vector<32x32xf32>, vector<16x32xf32> -> vector<16x32xf32>
    %798 = vector.extract_strided_slice %749 {offsets = [0, 96], sizes = [1, 32], strides = [1, 1]} : vector<1x128xf32> to vector<1x32xf32>
    %799 = vector.broadcast %798 : vector<1x32xf32> to vector<16x32xf32>
    %800 = arith.addf %797, %799 : vector<16x32xf32>
    %801 = arith.addf %746, %800 : vector<16x32xf32>
    %c330 = arith.constant 330 : index
    %c0_255 = arith.constant 0 : index
    %802 = vector.load %arg6[%c330, %c0_255] : memref<337x128xf32, #tpu.memory_space<vmem>>, vector<1x128xf32>
    %803 = vector.extract_strided_slice %802 {offsets = [0, 0], sizes = [1, 32], strides = [1, 1]} : vector<1x128xf32> to vector<1x32xf32>
    %804 = vector.extract_strided_slice %802 {offsets = [0, 32], sizes = [1, 32], strides = [1, 1]} : vector<1x128xf32> to vector<1x32xf32>
    %cst_256 = arith.constant dense<0.000000e+00> : vector<16xf32>
    %805 = vector.multi_reduction <add>, %801, %cst_256 [1] : vector<16x32xf32> to vector<16xf32>
    %806 = vector.shape_cast %805 : vector<16xf32> to vector<16x1xf32>
    %cst_257 = arith.constant 3.200000e+01 : f32
    %807 = vector.broadcast %cst_257 : f32 to vector<16x1xf32>
    %808 = arith.divf %806, %807 : vector<16x1xf32>
    %809 = vector.broadcast %808 : vector<16x1xf32> to vector<16x32xf32>
    %810 = arith.subf %801, %809 : vector<16x32xf32>
    %811 = arith.mulf %810, %810 : vector<16x32xf32>
    %cst_258 = arith.constant dense<0.000000e+00> : vector<16xf32>
    %812 = vector.multi_reduction <add>, %811, %cst_258 [1] : vector<16x32xf32> to vector<16xf32>
    %813 = vector.shape_cast %812 : vector<16xf32> to vector<16x1xf32>
    %cst_259 = arith.constant 3.200000e+01 : f32
    %814 = vector.broadcast %cst_259 : f32 to vector<16x1xf32>
    %815 = arith.divf %813, %814 : vector<16x1xf32>
    %cst_260 = arith.constant 9.99999974E-6 : f32
    %816 = vector.broadcast %cst_260 : f32 to vector<16x1xf32>
    %817 = arith.addf %815, %816 : vector<16x1xf32>
    %818 = math.rsqrt %817 : vector<16x1xf32>
    %819 = vector.broadcast %818 : vector<16x1xf32> to vector<16x32xf32>
    %820 = arith.mulf %810, %819 : vector<16x32xf32>
    %821 = vector.broadcast %803 : vector<1x32xf32> to vector<16x32xf32>
    %822 = arith.mulf %820, %821 : vector<16x32xf32>
    %823 = vector.broadcast %804 : vector<1x32xf32> to vector<16x32xf32>
    %824 = arith.addf %822, %823 : vector<16x32xf32>
    %825 = arith.addf %824, %13 : vector<16x32xf32>
    %c160 = arith.constant 160 : index
    %c0_261 = arith.constant 0 : index
    %826 = vector.load %arg6[%c160, %c0_261] : memref<337x128xf32, #tpu.memory_space<vmem>>, vector<32x128xf32>
    %c325 = arith.constant 325 : index
    %c0_262 = arith.constant 0 : index
    %827 = vector.load %arg6[%c325, %c0_262] : memref<337x128xf32, #tpu.memory_space<vmem>>, vector<1x128xf32>
    %828 = vector.extract_strided_slice %826 {offsets = [0, 0], sizes = [32, 32], strides = [1, 1]} : vector<32x128xf32> to vector<32x32xf32>
    %cst_263 = arith.constant dense<0.000000e+00> : vector<16x32xf32>
    %829 = tpu.matmul %825, %828, %cst_263 {dimension_numbers = #tpu.dot_dimension_numbers<[1], [0], [0], [1], [0, 0, 1, 1], [], []>} : vector<16x32xf32>, vector<32x32xf32>, vector<16x32xf32> -> vector<16x32xf32>
    %830 = vector.extract_strided_slice %827 {offsets = [0, 0], sizes = [1, 32], strides = [1, 1]} : vector<1x128xf32> to vector<1x32xf32>
    %831 = vector.broadcast %830 : vector<1x32xf32> to vector<16x32xf32>
    %832 = arith.addf %829, %831 : vector<16x32xf32>
    %833 = vector.extract_strided_slice %826 {offsets = [0, 32], sizes = [32, 32], strides = [1, 1]} : vector<32x128xf32> to vector<32x32xf32>
    %cst_264 = arith.constant dense<0.000000e+00> : vector<6x32xf32>
    %834 = tpu.matmul %547, %833, %cst_264 {dimension_numbers = #tpu.dot_dimension_numbers<[1], [0], [0], [1], [0, 0, 1, 1], [], []>} : vector<6x32xf32>, vector<32x32xf32>, vector<6x32xf32> -> vector<6x32xf32>
    %835 = vector.extract_strided_slice %827 {offsets = [0, 32], sizes = [1, 32], strides = [1, 1]} : vector<1x128xf32> to vector<1x32xf32>
    %836 = vector.broadcast %835 : vector<1x32xf32> to vector<6x32xf32>
    %837 = arith.addf %834, %836 : vector<6x32xf32>
    %838 = vector.extract_strided_slice %826 {offsets = [0, 64], sizes = [32, 32], strides = [1, 1]} : vector<32x128xf32> to vector<32x32xf32>
    %cst_265 = arith.constant dense<0.000000e+00> : vector<6x32xf32>
    %839 = tpu.matmul %546, %838, %cst_265 {dimension_numbers = #tpu.dot_dimension_numbers<[1], [0], [0], [1], [0, 0, 1, 1], [], []>} : vector<6x32xf32>, vector<32x32xf32>, vector<6x32xf32> -> vector<6x32xf32>
    %840 = vector.extract_strided_slice %827 {offsets = [0, 64], sizes = [1, 32], strides = [1, 1]} : vector<1x128xf32> to vector<1x32xf32>
    %841 = vector.broadcast %840 : vector<1x32xf32> to vector<6x32xf32>
    %842 = arith.addf %839, %841 : vector<6x32xf32>
    %843 = vector.extract_strided_slice %832 {offsets = [0, 0], sizes = [16, 8], strides = [1, 1]} : vector<16x32xf32> to vector<16x8xf32>
    %844 = vector.extract_strided_slice %832 {offsets = [0, 8], sizes = [16, 8], strides = [1, 1]} : vector<16x32xf32> to vector<16x8xf32>
    %845 = vector.extract_strided_slice %832 {offsets = [0, 16], sizes = [16, 8], strides = [1, 1]} : vector<16x32xf32> to vector<16x8xf32>
    %846 = vector.extract_strided_slice %832 {offsets = [0, 24], sizes = [16, 8], strides = [1, 1]} : vector<16x32xf32> to vector<16x8xf32>
    %847 = tpu.concatenate %843, %844, %845, %846 in 0 : vector<16x8xf32>, vector<16x8xf32>, vector<16x8xf32>, vector<16x8xf32> -> vector<64x8xf32>
    %cst_266 = arith.constant 0.353553385 : f32
    %848 = vector.broadcast %cst_266 : f32 to vector<64x8xf32>
    %849 = arith.mulf %847, %848 : vector<64x8xf32>
    %850 = vector.extract_strided_slice %837 {offsets = [0, 0], sizes = [6, 8], strides = [1, 1]} : vector<6x32xf32> to vector<6x8xf32>
    %851 = vector.extract_strided_slice %837 {offsets = [0, 8], sizes = [6, 8], strides = [1, 1]} : vector<6x32xf32> to vector<6x8xf32>
    %852 = vector.extract_strided_slice %837 {offsets = [0, 16], sizes = [6, 8], strides = [1, 1]} : vector<6x32xf32> to vector<6x8xf32>
    %853 = vector.extract_strided_slice %837 {offsets = [0, 24], sizes = [6, 8], strides = [1, 1]} : vector<6x32xf32> to vector<6x8xf32>
    %854 = tpu.concatenate %850, %851, %852, %853 in 0 : vector<6x8xf32>, vector<6x8xf32>, vector<6x8xf32>, vector<6x8xf32> -> vector<24x8xf32>
    %855 = vector.extract_strided_slice %842 {offsets = [0, 0], sizes = [6, 8], strides = [1, 1]} : vector<6x32xf32> to vector<6x8xf32>
    %856 = vector.extract_strided_slice %842 {offsets = [0, 8], sizes = [6, 8], strides = [1, 1]} : vector<6x32xf32> to vector<6x8xf32>
    %857 = vector.extract_strided_slice %842 {offsets = [0, 16], sizes = [6, 8], strides = [1, 1]} : vector<6x32xf32> to vector<6x8xf32>
    %858 = vector.extract_strided_slice %842 {offsets = [0, 24], sizes = [6, 8], strides = [1, 1]} : vector<6x32xf32> to vector<6x8xf32>
    %859 = tpu.concatenate %855, %856, %857, %858 in 0 : vector<6x8xf32>, vector<6x8xf32>, vector<6x8xf32>, vector<6x8xf32> -> vector<24x8xf32>
    %cst_267 = arith.constant dense<0.000000e+00> : vector<64x24xf32>
    %860 = tpu.matmul %849, %854, %cst_267 {dimension_numbers = #tpu.dot_dimension_numbers<[1], [1], [0], [0], [0, 0, 1, 0], [], []>} : vector<64x8xf32>, vector<24x8xf32>, vector<64x24xf32> -> vector<64x24xf32>
    %861 = arith.addf %860, %289 : vector<64x24xf32>
    %cst_268 = arith.constant dense<0xFF800000> : vector<64xf32>
    %862 = vector.multi_reduction <maximumf>, %861, %cst_268 [1] : vector<64x24xf32> to vector<64xf32>
    %863 = vector.shape_cast %862 : vector<64xf32> to vector<64x1xf32>
    %864 = vector.broadcast %863 : vector<64x1xf32> to vector<64x24xf32>
    %865 = arith.subf %861, %864 : vector<64x24xf32>
    %866 = math.exp %865 : vector<64x24xf32>
    %cst_269 = arith.constant dense<0.000000e+00> : vector<64xf32>
    %867 = vector.multi_reduction <add>, %866, %cst_269 [1] : vector<64x24xf32> to vector<64xf32>
    %868 = vector.shape_cast %867 : vector<64xf32> to vector<64x1xf32>
    %869 = vector.broadcast %868 : vector<64x1xf32> to vector<64x24xf32>
    %870 = arith.divf %866, %869 : vector<64x24xf32>
    %cst_270 = arith.constant dense<0.000000e+00> : vector<64x8xf32>
    %871 = tpu.matmul %870, %859, %cst_270 {dimension_numbers = #tpu.dot_dimension_numbers<[1], [0], [0], [1], [0, 0, 1, 1], [], []>} : vector<64x24xf32>, vector<24x8xf32>, vector<64x8xf32> -> vector<64x8xf32>
    %872 = vector.extract_strided_slice %871 {offsets = [0, 0], sizes = [16, 8], strides = [1, 1]} : vector<64x8xf32> to vector<16x8xf32>
    %873 = vector.extract_strided_slice %871 {offsets = [16, 0], sizes = [16, 8], strides = [1, 1]} : vector<64x8xf32> to vector<16x8xf32>
    %874 = vector.extract_strided_slice %871 {offsets = [32, 0], sizes = [16, 8], strides = [1, 1]} : vector<64x8xf32> to vector<16x8xf32>
    %875 = vector.extract_strided_slice %871 {offsets = [48, 0], sizes = [16, 8], strides = [1, 1]} : vector<64x8xf32> to vector<16x8xf32>
    %876 = tpu.concatenate %872, %873, %874, %875 in 1 : vector<16x8xf32>, vector<16x8xf32>, vector<16x8xf32>, vector<16x8xf32> -> vector<16x32xf32>
    %877 = vector.extract_strided_slice %826 {offsets = [0, 96], sizes = [32, 32], strides = [1, 1]} : vector<32x128xf32> to vector<32x32xf32>
    %cst_271 = arith.constant dense<0.000000e+00> : vector<16x32xf32>
    %878 = tpu.matmul %876, %877, %cst_271 {dimension_numbers = #tpu.dot_dimension_numbers<[1], [0], [0], [1], [0, 0, 1, 1], [], []>} : vector<16x32xf32>, vector<32x32xf32>, vector<16x32xf32> -> vector<16x32xf32>
    %879 = vector.extract_strided_slice %827 {offsets = [0, 96], sizes = [1, 32], strides = [1, 1]} : vector<1x128xf32> to vector<1x32xf32>
    %880 = vector.broadcast %879 : vector<1x32xf32> to vector<16x32xf32>
    %881 = arith.addf %878, %880 : vector<16x32xf32>
    %882 = arith.addf %824, %881 : vector<16x32xf32>
    %c330_272 = arith.constant 330 : index
    %c0_273 = arith.constant 0 : index
    %883 = vector.load %arg6[%c330_272, %c0_273] : memref<337x128xf32, #tpu.memory_space<vmem>>, vector<1x128xf32>
    %884 = vector.extract_strided_slice %883 {offsets = [0, 64], sizes = [1, 32], strides = [1, 1]} : vector<1x128xf32> to vector<1x32xf32>
    %885 = vector.extract_strided_slice %883 {offsets = [0, 96], sizes = [1, 32], strides = [1, 1]} : vector<1x128xf32> to vector<1x32xf32>
    %cst_274 = arith.constant dense<0.000000e+00> : vector<16xf32>
    %886 = vector.multi_reduction <add>, %882, %cst_274 [1] : vector<16x32xf32> to vector<16xf32>
    %887 = vector.shape_cast %886 : vector<16xf32> to vector<16x1xf32>
    %cst_275 = arith.constant 3.200000e+01 : f32
    %888 = vector.broadcast %cst_275 : f32 to vector<16x1xf32>
    %889 = arith.divf %887, %888 : vector<16x1xf32>
    %890 = vector.broadcast %889 : vector<16x1xf32> to vector<16x32xf32>
    %891 = arith.subf %882, %890 : vector<16x32xf32>
    %892 = arith.mulf %891, %891 : vector<16x32xf32>
    %cst_276 = arith.constant dense<0.000000e+00> : vector<16xf32>
    %893 = vector.multi_reduction <add>, %892, %cst_276 [1] : vector<16x32xf32> to vector<16xf32>
    %894 = vector.shape_cast %893 : vector<16xf32> to vector<16x1xf32>
    %cst_277 = arith.constant 3.200000e+01 : f32
    %895 = vector.broadcast %cst_277 : f32 to vector<16x1xf32>
    %896 = arith.divf %894, %895 : vector<16x1xf32>
    %cst_278 = arith.constant 9.99999974E-6 : f32
    %897 = vector.broadcast %cst_278 : f32 to vector<16x1xf32>
    %898 = arith.addf %896, %897 : vector<16x1xf32>
    %899 = math.rsqrt %898 : vector<16x1xf32>
    %900 = vector.broadcast %899 : vector<16x1xf32> to vector<16x32xf32>
    %901 = arith.mulf %891, %900 : vector<16x32xf32>
    %902 = vector.broadcast %884 : vector<1x32xf32> to vector<16x32xf32>
    %903 = arith.mulf %901, %902 : vector<16x32xf32>
    %904 = vector.broadcast %885 : vector<1x32xf32> to vector<16x32xf32>
    %905 = arith.addf %903, %904 : vector<16x32xf32>
    %c224_279 = arith.constant 224 : index
    %c0_280 = arith.constant 0 : index
    %906 = vector.load %arg6[%c224_279, %c0_280] : memref<337x128xf32, #tpu.memory_space<vmem>>, vector<32x128xf32>
    %907 = vector.extract_strided_slice %906 {offsets = [0, 64], sizes = [32, 64], strides = [1, 1]} : vector<32x128xf32> to vector<32x64xf32>
    %c256_281 = arith.constant 256 : index
    %c0_282 = arith.constant 0 : index
    %908 = vector.load %arg6[%c256_281, %c0_282] : memref<337x128xf32, #tpu.memory_space<vmem>>, vector<64x128xf32>
    %909 = vector.extract_strided_slice %908 {offsets = [0, 96], sizes = [64, 32], strides = [1, 1]} : vector<64x128xf32> to vector<64x32xf32>
    %c335 = arith.constant 335 : index
    %c0_283 = arith.constant 0 : index
    %910 = vector.load %arg6[%c335, %c0_283] : memref<337x128xf32, #tpu.memory_space<vmem>>, vector<1x128xf32>
    %cst_284 = arith.constant dense<0.000000e+00> : vector<16x64xf32>
    %911 = tpu.matmul %905, %907, %cst_284 {dimension_numbers = #tpu.dot_dimension_numbers<[1], [0], [0], [1], [0, 0, 1, 1], [], []>} : vector<16x32xf32>, vector<32x64xf32>, vector<16x64xf32> -> vector<16x64xf32>
    %912 = vector.extract_strided_slice %910 {offsets = [0, 0], sizes = [1, 64], strides = [1, 1]} : vector<1x128xf32> to vector<1x64xf32>
    %913 = vector.broadcast %912 : vector<1x64xf32> to vector<16x64xf32>
    %914 = arith.addf %911, %913 : vector<16x64xf32>
    %cst_285 = arith.constant 0.000000e+00 : f32
    %915 = vector.broadcast %cst_285 : f32 to vector<16x64xf32>
    %916 = arith.maximumf %914, %915 : vector<16x64xf32>
    %cst_286 = arith.constant dense<0.000000e+00> : vector<16x32xf32>
    %917 = tpu.matmul %916, %909, %cst_286 {dimension_numbers = #tpu.dot_dimension_numbers<[1], [0], [0], [1], [0, 0, 1, 1], [], []>} : vector<16x64xf32>, vector<64x32xf32>, vector<16x32xf32> -> vector<16x32xf32>
    %918 = vector.extract_strided_slice %910 {offsets = [0, 64], sizes = [1, 32], strides = [1, 1]} : vector<1x128xf32> to vector<1x32xf32>
    %919 = vector.broadcast %918 : vector<1x32xf32> to vector<16x32xf32>
    %920 = arith.addf %917, %919 : vector<16x32xf32>
    %921 = arith.addf %905, %920 : vector<16x32xf32>
    %c331 = arith.constant 331 : index
    %c0_287 = arith.constant 0 : index
    %922 = vector.load %arg6[%c331, %c0_287] : memref<337x128xf32, #tpu.memory_space<vmem>>, vector<1x128xf32>
    %923 = vector.extract_strided_slice %922 {offsets = [0, 0], sizes = [1, 32], strides = [1, 1]} : vector<1x128xf32> to vector<1x32xf32>
    %924 = vector.extract_strided_slice %922 {offsets = [0, 32], sizes = [1, 32], strides = [1, 1]} : vector<1x128xf32> to vector<1x32xf32>
    %cst_288 = arith.constant dense<0.000000e+00> : vector<16xf32>
    %925 = vector.multi_reduction <add>, %921, %cst_288 [1] : vector<16x32xf32> to vector<16xf32>
    %926 = vector.shape_cast %925 : vector<16xf32> to vector<16x1xf32>
    %cst_289 = arith.constant 3.200000e+01 : f32
    %927 = vector.broadcast %cst_289 : f32 to vector<16x1xf32>
    %928 = arith.divf %926, %927 : vector<16x1xf32>
    %929 = vector.broadcast %928 : vector<16x1xf32> to vector<16x32xf32>
    %930 = arith.subf %921, %929 : vector<16x32xf32>
    %931 = arith.mulf %930, %930 : vector<16x32xf32>
    %cst_290 = arith.constant dense<0.000000e+00> : vector<16xf32>
    %932 = vector.multi_reduction <add>, %931, %cst_290 [1] : vector<16x32xf32> to vector<16xf32>
    %933 = vector.shape_cast %932 : vector<16xf32> to vector<16x1xf32>
    %cst_291 = arith.constant 3.200000e+01 : f32
    %934 = vector.broadcast %cst_291 : f32 to vector<16x1xf32>
    %935 = arith.divf %933, %934 : vector<16x1xf32>
    %cst_292 = arith.constant 9.99999974E-6 : f32
    %936 = vector.broadcast %cst_292 : f32 to vector<16x1xf32>
    %937 = arith.addf %935, %936 : vector<16x1xf32>
    %938 = math.rsqrt %937 : vector<16x1xf32>
    %939 = vector.broadcast %938 : vector<16x1xf32> to vector<16x32xf32>
    %940 = arith.mulf %930, %939 : vector<16x32xf32>
    %941 = vector.broadcast %923 : vector<1x32xf32> to vector<16x32xf32>
    %942 = arith.mulf %940, %941 : vector<16x32xf32>
    %943 = vector.broadcast %924 : vector<1x32xf32> to vector<16x32xf32>
    %944 = arith.addf %942, %943 : vector<16x32xf32>
    %c336_293 = arith.constant 336 : index
    %c0_294 = arith.constant 0 : index
    %945 = vector.load %arg6[%c336_293, %c0_294] : memref<337x128xf32, #tpu.memory_space<vmem>>, vector<1x128xf32>
    %946 = vector.extract_strided_slice %945 {offsets = [0, 64], sizes = [1, 32], strides = [1, 1]} : vector<1x128xf32> to vector<1x32xf32>
    %947 = vector.extract_strided_slice %945 {offsets = [0, 96], sizes = [1, 32], strides = [1, 1]} : vector<1x128xf32> to vector<1x32xf32>
    %cst_295 = arith.constant dense<0.000000e+00> : vector<16xf32>
    %948 = vector.multi_reduction <add>, %944, %cst_295 [1] : vector<16x32xf32> to vector<16xf32>
    %949 = vector.shape_cast %948 : vector<16xf32> to vector<16x1xf32>
    %cst_296 = arith.constant 3.200000e+01 : f32
    %950 = vector.broadcast %cst_296 : f32 to vector<16x1xf32>
    %951 = arith.divf %949, %950 : vector<16x1xf32>
    %952 = vector.broadcast %951 : vector<16x1xf32> to vector<16x32xf32>
    %953 = arith.subf %944, %952 : vector<16x32xf32>
    %954 = arith.mulf %953, %953 : vector<16x32xf32>
    %cst_297 = arith.constant dense<0.000000e+00> : vector<16xf32>
    %955 = vector.multi_reduction <add>, %954, %cst_297 [1] : vector<16x32xf32> to vector<16xf32>
    %956 = vector.shape_cast %955 : vector<16xf32> to vector<16x1xf32>
    %cst_298 = arith.constant 3.200000e+01 : f32
    %957 = vector.broadcast %cst_298 : f32 to vector<16x1xf32>
    %958 = arith.divf %956, %957 : vector<16x1xf32>
    %cst_299 = arith.constant 9.99999974E-6 : f32
    %959 = vector.broadcast %cst_299 : f32 to vector<16x1xf32>
    %960 = arith.addf %958, %959 : vector<16x1xf32>
    %961 = math.rsqrt %960 : vector<16x1xf32>
    %962 = vector.broadcast %961 : vector<16x1xf32> to vector<16x32xf32>
    %963 = arith.mulf %953, %962 : vector<16x32xf32>
    %964 = vector.broadcast %946 : vector<1x32xf32> to vector<16x32xf32>
    %965 = arith.mulf %963, %964 : vector<16x32xf32>
    %966 = vector.broadcast %947 : vector<1x32xf32> to vector<16x32xf32>
    %967 = arith.addf %965, %966 : vector<16x32xf32>
    %c0_300 = arith.constant 0 : index
    %c0_301 = arith.constant 0 : index
    %968 = vector.load %arg7[%c0_300, %c0_301] : memref<16x32xf32, #tpu.memory_space<vmem>>, vector<16x32xf32>
    tpu.vector_store %arg7[%c0_300, %c0_301], %967 {strides = array<i32>} : memref<16x32xf32, #tpu.memory_space<vmem>>, vector<16x32xf32>,
    return
  }
  func.func @transform_0(%arg0: i32) -> (i32, i32) {
    %c0_i32 = arith.constant 0 : i32
    %c0_i32_0 = arith.constant 0 : i32
    %c0_i32_1 = arith.constant 0 : i32
    return %c0_i32, %c0_i32_0 : i32, i32
  }
  func.func @transform_1(%arg0: i32) -> (i32, i32) {
    %c0_i32 = arith.constant 0 : i32
    %c0_i32_0 = arith.constant 0 : i32
    %c0_i32_1 = arith.constant 0 : i32
    return %c0_i32, %c0_i32_0 : i32, i32
  }
  func.func @transform_2(%arg0: i32) -> (i32, i32) {
    %c0_i32 = arith.constant 0 : i32
    %c0_i32_0 = arith.constant 0 : i32
    %c0_i32_1 = arith.constant 0 : i32
    return %c0_i32, %c0_i32_0 : i32, i32
  }
  func.func @transform_3(%arg0: i32) -> (i32, i32) {
    %c0_i32 = arith.constant 0 : i32
    %c0_i32_0 = arith.constant 0 : i32
    %c0_i32_1 = arith.constant 0 : i32
    return %c0_i32, %c0_i32_0 : i32, i32
  }
  func.func @transform_4(%arg0: i32) -> (i32, i32) {
    %c0_i32 = arith.constant 0 : i32
    %c0_i32_0 = arith.constant 0 : i32
    %c0_i32_1 = arith.constant 0 : i32
    return %c0_i32, %c0_i32_0 : i32, i32
  }
  func.func @transform_5(%arg0: i32) -> (i32, i32) {
    %c0_i32 = arith.constant 0 : i32
    %c0_i32_0 = arith.constant 0 : i32
    %c0_i32_1 = arith.constant 0 : i32
    return %c0_i32, %c0_i32_0 : i32, i32
  }
  func.func @transform_6(%arg0: i32) -> (i32, i32) {
    %c0_i32 = arith.constant 0 : i32
    %c0_i32_0 = arith.constant 0 : i32
    %c0_i32_1 = arith.constant 0 : i32
    return %c0_i32, %c0_i32_0 : i32, i32
  }
}

</mosaic_0001>

<bundles_post_ra>
// kernel: action_transformer_forward.1
= control target key start
LH: loop header
LB: loop body
LE: loop exit
PB: predicated region body
PF: predicated region fallthrough
CT: control target
= control target key end

     0   :  { %11 = vsyncpa [#allocation3], 0  ;;  %s8660_s0 = inlined_call_operand.vmem [shape: f32[2,32], index: 0, kind: input, shape index: {}]   ;;  %s8661_s1 = inlined_call_operand.hbm [shape: f32[2,32], index: 1, kind: input, shape index: {}]   ;;  %s8662_s2 = inlined_call_operand.hbm [shape: f32[2,32], index: 2, kind: input, shape index: {}]   ;;  %s8663_s3 = inlined_call_operand.vmem [shape: f32[3,32], index: 3, kind: input, shape index: {}]   ;;  %s8664_s4 = inlined_call_operand.hbm [shape: f32[8,32], index: 4, kind: input, shape index: {}]   ;;  %s8665_s5 = inlined_call_operand.hbm [shape: f32[337,128], index: 5, kind: input, shape index: {}]   ;;  %s8666_s6 = inlined_call_operand.hbm [shape: f32[16,32], index: 6, kind: output, shape index: {}]  }
   0x1   :  { %12 = vsyncpa [#allocation6], 0 }
   0x2   :  { %13 = vsyncpa [#allocation9], 0 }
   0x3   :  { %14 = vsyncpa [#allocation4], 0  ;;  %s7225_s21 = smov [#allocation5]   ;;  %s7226_s23 = smov [#allocation2]  }
   0x4   :  { %s33_s22 = sshll.u32 %s7225_s21, 4  ;;  %s23_s24 = sshll.u32 %s7226_s23, 4  ;;  %s34_s22 = int_to_ptr.vmem [resolvable:$true] %s33_s22  ;;  %s24_s24 = int_to_ptr.vmem [resolvable:$true] %s23_s24 }
   0x5   :  { %s7125_s25 = scalar_lea.vmem %s34_s22, 32  ;;  %p7130_p1 = scmp.lt.s32.totalorder %s34_s22, %s34_s22 }
   0x6   :  { %p7126_p0 = scmp.ne.s32.totalorder %s34_s22, %s7125_s25  ;;  %p7131_p2 = scmp.lt.s32.totalorder %s7125_s25, %s7125_s25 }
   0x8   :  { %p7132_p3 = por %p7131_p2, %p7130_p1 }
   0xa   :  { %p7133_p4 = pnand %p7132_p3, %p7126_p0 }
   0xc   :  { %7136 = shalt.err (!%p7133_p4)
}
   0xd   :  { %36 = dma.hbm_to_vmem [thread:$0]  %s8662_s2, 32, %s34_s22, [#allocation6]  }
   0xe   :  { %s7145_s28 = scalar_lea.vmem %s24_s24, 32  ;;  %p7150_p6 = scmp.lt.s32.totalorder %s24_s24, %s24_s24 }
   0xf   :  { %p7146_p5 = scmp.ne.s32.totalorder %s24_s24, %s7145_s28  ;;  %p7151_p7 = scmp.lt.s32.totalorder %s7145_s28, %s7145_s28 }
  0x11   :  { %p7152_p8 = por %p7151_p7, %p7150_p6 }
  0x13   :  { %p7153_p9 = pnand %p7152_p8, %p7146_p5 }
  0x15   :  { %7156 = shalt.err (!%p7153_p9)
}
  0x16   :  { %26 = dma.hbm_to_vmem [thread:$0]  %s8661_s1, 32, %s24_s24, [#allocation3]  }
  0x17   :  { %s7227_s7 = smov [#allocation7]   ;;  %s7228_s9 = smov [#allocation8]  }
  0x18   :  { %s45_s8 = sshll.u32 %s7227_s7, 4  ;;  %s54_s10 = sshll.u32 %s7228_s9, 4  ;;  %s46_s8 = int_to_ptr.vmem [resolvable:$true] %s45_s8  ;;  %s55_s10 = int_to_ptr.vmem [resolvable:$true] %s54_s10 }
  0x19   :  { %s7165_s11 = scalar_lea.vmem %s46_s8, 128  ;;  %p7170_p11 = scmp.lt.s32.totalorder %s46_s8, %s46_s8 }
  0x1a   :  { %p7166_p10 = scmp.ne.s32.totalorder %s46_s8, %s7165_s11  ;;  %p7171_p12 = scmp.lt.s32.totalorder %s7165_s11, %s7165_s11 }
  0x1c   :  { %p7172_p13 = por %p7171_p12, %p7170_p11 }
  0x1e   :  { %p7173_p0 = pnand %p7172_p13, %p7166_p10 }
  0x20   :  { %7176 = shalt.err (!%p7173_p0)
}
  0x21   :  { %48 = dma.hbm_to_vmem [thread:$0]  %s8664_s4, 128, %s46_s8, [#allocation6]  }
  0x22   :  { %s7185_s13 = scalar_lea.vmem %s55_s10, 5504  ;;  %p7190_p2 = scmp.lt.s32.totalorder %s55_s10, %s55_s10 }
  0x23   :  { %p7186_p1 = scmp.ne.s32.totalorder %s55_s10, %s7185_s13  ;;  %p7191_p3 = scmp.lt.s32.totalorder %s7185_s13, %s7185_s13 }
  0x25   :  { %p7192_p4 = por %p7191_p3, %p7190_p2 }
  0x27   :  { %p7193_p5 = pnand %p7192_p4, %p7186_p1 }
  0x29   :  { %7196 = shalt.err (!%p7193_p5)
}
  0x2a   :  { %s7229_s1 = smov 128   ;;  %s7230_s14 = smov 8  }
  0x2b   :  { %60 = dma.hbm_to_vmem [thread:$0]  %s8665_s5, 5504, %s55_s10, [#allocation9], %s7229_s1, %s7229_s1, %s7230_s14  }
  0x2c   :  { %7217 = dma.done.wait [#allocation3], 32  }
  0x2d   :  { %7218 = vsyncadd [#allocation3], 4294967264 }
  0x2e   :  { %7219 = dma.done.wait [#allocation6], 160  }
  0x2f   :  { %7220 = vsyncadd [#allocation6], 4294967136 }
  0x30   :  { %7221 = dma.done.wait [#allocation9], 5504  }
  0x31   :  { %7222 = vsyncadd [#allocation9], 4294961792  ;;  %v7231_v0 = vmov 0.0   ;;  %vm7232_vm0 = vmmov 0   ;;  %v7300_v1 = vld [vmem:[#allocation8 + $0x18] sm:$0xff]  ;;  %v7302_v2 = vld [vmem:[#allocation8 + $0x10] sm:$0xff]  ;;  %v105_v45 = vlaneseq }
  0x32   :  { %6302 = vmatprep.subr.mxu1 %v7231_v0  ;;  %6310 = vmatprep.mubr.msk.f32.mxu1 %vm7232_vm0, %v7231_v0  ;;  %vm91_vm1 = vcmask 1040384   ;;  %v7305_v3 = vld [vmem:[#allocation8 + $0x8] sm:$0xff]  ;;  %v73_v4 = vld [vmem:[%s8660_s0] sm:$0x3]  ;;  %vm93_vm2 = vcmask 1041408   ;;  %vm95_vm3 = vcmask 1042432  }
  0x33   :  { %6324 = vmatprep.subr.mxu0 %v7231_v0  ;;  %6330 = vmatprep.mubr.msk.f32.mxu0 %vm7232_vm0, %v7231_v0  ;;  %v74_v5 = vld [vmem:[#allocation2] sm:$0x3]  ;;  %v75_v6 = vld [vmem:[#allocation5] sm:$0x3]  ;;  %v85_v9 = vrot.slane %v73_v4, 6  ;;  %v7316_v13 = vld [vmem:[#allocation8] sm:$0xff] }
  0x34   :  { %6303 = vmatpush3.msra.mxu1 %v7300_v1  ;;  %v76_v7 = vld [vmem:[%s8663_s3] sm:$0x7]  ;;  %v79_v8 = vrot.slane %v74_v5, 7  ;;  %v82_v10 = vrot.slane %v75_v6, 6  ;;  %v87_v11 = vrot.slane %v74_v5, 5  ;;  %v89_v14 = vrot.slane %v75_v6, 4 }
  0x35   :  { %6304 = vmatprep.subr.mxu1 %v7231_v0  ;;  %v102_v12 = vrot.slane %v76_v7, 5  ;;  %vm97_vm4 = vcmask 1043456   ;;  %vm99_vm5 = vcmask 1044480   ;;  %vm424_vm6 = vcmask 261120   ;;  %v7334_v22 = vld [vmem:[#allocation8 + $0x140] ss:$0 sm:$0xff] }
  0x36   :  { %6305 = vmatpush3.msra.mxu1 %v7302_v2  ;;  %v92_v15 = vsel %vm91_vm1, %v73_v4, %v79_v8  ;;  %s7233_s0 = smov 112   ;;  %s7234_s3 = smov 120   ;;  %vm604_vm7 = vcmask 1045504   ;;  %vm636_vm8 = vcmask 64512   ;;  %v7377_v46 = vand.u32 127, %v105_v45 }
  0x37   :  { %6306 = vmatprep.subr.mxu1 %v7231_v0  ;;  %v94_v16 = vsel %vm93_vm2, %v92_v15, %v82_v10  ;;  %v7322_v18 = vsel %vm95_vm3, %v76_v7, %v102_v12  ;;  %s7235_s19 = smov 104   ;;  %s7236_s20 = smov 96   ;;  %v7238_v47 = vmov 0   ;;  %v106_v52 = vshrl.u32 %v105_v45, 7 }
  0x38   :  { %6307 = vmatpush3.msra.mxu1 %v7305_v3  ;;  %v96_v17 = vsel %vm95_vm3, %v94_v16, %v85_v9  ;;  %s7237_s21 = smov 64   ;;  %vm171_vm9 = vcmp.ge.s32.totalorder %v7377_v46, 3  ;;  %vm173_vm10 = vcmp.ge.s32.totalorder %v7377_v46, 6  ;;  %vm176_vm11 = vcmp.ge.s32.totalorder %v7377_v46, 9  ;;  %s7240_s22 = smov 32  }
  0x39   :  { %6308 = vmatprep.subr.mxu1 %v7231_v0  ;;  %v98_v19 = vsel %vm97_vm4, %v96_v17, %v87_v11  ;;  %v172_v48 = vsel %vm171_vm9, 1, %v7238_v47  ;;  %v174_v49 = vsel %vm173_vm10, 1, %v7238_v47  ;;  %v177_v51 = vsel %vm176_vm11, 1, %v7238_v47  ;;  %s7241_s23 = smov 24   ;;  %s7242_s24 = smov 16  }
  0x3a   :  { %6309 = vmatpush3.msra.mxu1 %v7316_v13  ;;  %v7326_v20 = vsel %vm99_vm5, %v98_v19, %v89_v14  ;;  %v175_v50 = vadd.s32 %v174_v49, %v172_v48  ;;  %vm179_vm12 = vcmp.ge.s32.totalorder %v7377_v46, 12  ;;  %vm182_vm13 = vcmp.ge.s32.totalorder %v7377_v46, 15  ;;  %s7243_s25 = smov [#allocation10]  }
  0x3b   :  { %6313 = vmatprep.subr.mxu1 %v7231_v0  ;;  %v414_v21 = vadd.f32 %v7322_v18, %v7326_v20  ;;  %v180_v54 = vsel %vm179_vm12, 1, %v7238_v47  ;;  %v107_v55 = vadd.s32 8, %v106_v52  ;;  %v183_v57 = vsel %vm182_vm13, 1, %v7238_v47  ;;  %s5809_s26 = sshll.u32 %s7243_s25, 4  ;;  %s5810_s26 = int_to_ptr.vmem [resolvable:$true] %s5809_s26 }
  0x3c   :  { %v178_v53 = vadd.s32 %v177_v51, %v175_v50  ;;  %vm185_vm14 = vcmp.ge.s32.totalorder %v7377_v46, 18  ;;  %vm111_vm1 = vcmp.ge.s32.totalorder %v106_v52, 3  ;;  %vm117_vm3 = vcmp.ge.s32.totalorder %v106_v52, 6  ;;  %s7197_s27 = scalar_lea.vmem %s5810_s26, 256  ;;  %p7202_p7 = scmp.lt.s32.totalorder %s5810_s26, %s5810_s26 }
  0x3d   :  { %6311 = vmatmul.mubr.msk.f32.vlgmr.msra.gmra.mxu1 %vm424_vm6, %v414_v21  ;;  %vm127_vm15 = vcmp.ge.s32.totalorder %v107_v55, 9  ;;  %v186_v59 = vsel %vm185_vm14, 1, %v7238_v47  ;;  %vm188_vm5 = vcmp.ge.s32.totalorder %v7377_v46, 21  ;;  %vm136_vm9 = vcmp.ge.s32.totalorder %v107_v55, 12  ;;  %p7198_p6 = scmp.ne.s32.totalorder %s5810_s26, %s7197_s27  ;;  %p7203_p8 = scmp.lt.s32.totalorder %s7197_s27, %s7197_s27 }
  0x3e   :  { %6321 = vmatprep.mubr.msk.f32.mxu1 %vm7232_vm0, %v7231_v0  ;;  %v181_v56 = vadd.s32 %v180_v54, %v178_v53  ;;  %v130_v60 = vsel %vm127_vm15, 1, %v7238_v47  ;;  %v108_v61 = vadd.s32 16, %v106_v52  ;;  %v114_v4 = vsel %vm111_vm1, 1, %v7238_v47 }
  0x3f   :  { %v133_v63 = vadd.s32 2, %v130_v60  ;;  %v120_v5 = vsel %vm117_vm3, 1, %v7238_v47  ;;  %v189_v6 = vsel %vm188_vm5, 1, %v7238_v47  ;;  %v139_v7 = vsel %vm136_vm9, 1, %v7238_v47  ;;  %p7204_p9 = por %p7203_p8, %p7202_p7 }
  0x40   :  { %v184_v58 = vadd.s32 %v183_v57, %v181_v56  ;;  %vm145_vm10 = vcmp.ge.s32.totalorder %v107_v55, 15  ;;  %vm155_vm11 = vcmp.ge.s32.totalorder %v108_v61, 18  ;;  %v123_v8 = vadd.s32 %v120_v5, %v114_v4 }
  0x41   :  { %v142_v10 = vadd.s32 %v139_v7, %v133_v63  ;;  %v148_v11 = vsel %vm145_vm10, 1, %v7238_v47  ;;  %v158_v12 = vsel %vm155_vm11, 1, %v7238_v47  ;;  %vm164_vm12 = vcmp.ge.s32.totalorder %v108_v61, 21  ;;  %p7205_p10 = pnand %p7204_p9, %p7198_p6 }
  0x42   :  { %v187_v62 = vadd.s32 %v186_v59, %v184_v58  ;;  %v161_v15 = vadd.s32 5, %v158_v12  ;;  %v167_v16 = vsel %vm164_vm12, 1, %v7238_v47  ;;  %v7239_v17 = vmov -1e+09  }
  0x43   :  { %v151_v14 = vadd.s32 %v148_v11, %v142_v10  ;;  %vm732_vm15 = vcmask 195584   ;;  %vm875_vm3 = vcmask 130048   ;;  %vm968_vm5 = vcmask 259072  }
  0x44   :  { %v7397_v9 = vadd.s32 %v189_v6, %v187_v62  ;;  %v170_v21 = vadd.s32 %v167_v16, %v161_v15  ;;  %vm1088_vm9 = vcmask 523264   ;;  %vm362_vm10 = vcmp.ge.s32.totalorder %v7377_v46, 8 }
  0x45   :  { %vm364_vm11 = vcmp.ge.s32.totalorder %v7377_v46, 16  ;;  %vm367_vm12 = vcmp.ge.s32.totalorder %v7377_v46, 24 }
  0x46   :  { %vm191_vm13 = vcmp.eq.s32.totalorder %v123_v8, %v7397_v9  ;;  %vm192_vm14 = vcmp.eq.s32.totalorder %v151_v14, %v7397_v9  ;;  %vm193_vm1 = vcmp.eq.s32.totalorder %v170_v21, %v7397_v9 }
  0x47   :  { %v7404_v19 = vsel %vm191_vm13, 0.0, %v7239_v17  ;;  %vm370_vm13 = vcmp.ge.s32.totalorder %v7377_v46, 32 }
  0xfd   :  { %v494_v23 = vpop.f32.mrf.mxu1 }
  0xfe   :  { %v495_v24 = vadd.f32 %v7334_v22, %v494_v23 }
  0xff   :  { %v6312_v25 = vpop.f32.mrf.mxu1 }
 0x100   :  { %v596_v26 = vrot.slane %v495_v24, 4  ;;  %v592_v27 = vrot.slane %v495_v24, 2  ;;  %v600_v28 = vrot.slane %v495_v24, 6 }
 0x102   :  { %597 = vrot.lane.b32.xlu0 %v596_v26, %s7233_s0  ;;  %593 = vrot.lane.b32.xlu1 %v592_v27, %s7234_s3  ;;  %v7409_v26 = vsel %vm192_vm14, 0.0, %v7239_v17  ;;  %vm373_vm14 = vcmp.ge.s32.totalorder %v7377_v46, 40 }
 0x106   :  { %601 = vrot.lane.b32.xlu0 %v600_v28, %s7235_s19 }
 0x174   :  { %v598_v29 = vpop.permute.xlu0 %597  ;;  %v594_v30 = vpop.permute.xlu1 %593 }
 0x175   :  { %v606_v31 = vsel %vm97_vm4, %v594_v30, %v598_v29  ;;  %v605_v34 = vsel %vm604_vm7, %v495_v24, %v594_v30 }
 0x176   :  { %632 = vrot.lane.b32.xlu0 %v606_v31, %s7236_s20  ;;  %v608_v40 = vmul.f32 0.35355338, %v605_v34  ;;  %v609_v43 = vmul.f32 0.35355338, %v606_v31  ;;  %v7415_v31 = vsel %vm193_vm1, 0.0, %v7239_v17  ;;  %vm376_vm1 = vcmp.ge.s32.totalorder %v7377_v46, 48 }
 0x178   :  { %v602_v32 = vpop.permute.xlu0 %601 }
 0x179   :  { %v607_v33 = vsel %vm93_vm2, %v598_v29, %v602_v32 }
 0x17a   :  { %634 = vrot.lane.b32.xlu1 %v607_v33, %s7236_s20  ;;  %508 = vrot.lane.b32.xlu0 %v7300_v1, %s7237_s21  ;;  %v610_v44 = vmul.f32 0.35355338, %v607_v33 }
 0x17e   :  { %630 = vrot.lane.b32.xlu1 %v605_v34, %s7236_s20  ;;  %504 = vrot.lane.b32.xlu0 %v7305_v3, %s7237_s21 }
 0x182   :  { %506 = vrot.lane.b32.xlu1 %v7302_v2, %s7237_s21 }
 0x186   :  { %502 = vrot.lane.b32.xlu1 %v7316_v13, %s7237_s21 }
 0x1e8   :  { %v633_v36 = vpop.permute.xlu0 %632 }
 0x1ec   :  { %v635_v35 = vpop.permute.xlu1 %634  ;;  %v509_v38 = vpop.permute.xlu0 %508 }
 0x1ed   :  { %6325 = vmatpush3.xpose.msk.msra.mxu0 %vm636_vm8, %v635_v35  ;;  %6314 = vmatpush3.msra.mxu1 %v509_v38 }
 0x1ee   :  { %6326 = vmatprep.subr.mxu0 %v7231_v0  ;;  %6315 = vmatprep.subr.mxu1 %v7231_v0 }
 0x1f0   :  { %v631_v37 = vpop.permute.xlu1 %630  ;;  %v505_v41 = vpop.permute.xlu0 %504 }
 0x1f1   :  { %6327 = vmatpush3.xpose.msk.msra.mxu0 %vm636_vm8, %v633_v36 }
 0x1f2   :  { %6328 = vmatprep.subr.mxu0 %v7231_v0 }
 0x1f4   :  { %v507_v39 = vpop.permute.xlu1 %506 }
 0x1f5   :  { %6329 = vmatpush3.xpose.msk.msra.mxu0 %vm636_vm8, %v631_v37  ;;  %6316 = vmatpush3.msra.mxu1 %v507_v39 }
 0x1f6   :  { %6365 = vmatprep.subr.mxu0 %v7231_v0  ;;  %6317 = vmatprep.subr.mxu1 %v7231_v0 }
 0x1f7   :  { %6318 = vmatpush3.msra.mxu1 %v505_v41 }
 0x1f8   :  { %6331 = vmatmul.mubr.msk.f32.vlgmr.msra.gmra.mxu0 %vm636_vm8, %v608_v40  ;;  %v503_v42 = vpop.permute.xlu1 %502  ;;  %6319 = vmatprep.subr.mxu1 %v7231_v0 }
 0x1f9   :  { %6333 = vmatprep.mubr.msk.f32.mxu0 %vm7232_vm0, %v7231_v0  ;;  %6320 = vmatpush3.msra.mxu1 %v503_v42 }
 0x1fa   :  { %6322 = vmatmul.mubr.msk.f32.vlgmr.msra.gmra.mxu1 %vm424_vm6, %v7326_v20  ;;  %6339 = vmatprep.subr.mxu1 %v7231_v0 }
 0x1fb   :  { %6345 = vmatprep.mubr.msk.f32.mxu1 %vm7232_vm0, %v7231_v0 }
 0x1fc   :  { %6334 = vmatmul.mubr.msk.f32.gmra.mxu0 %vm636_vm8, %v609_v43 }
 0x1fd   :  { %6336 = vmatprep.mubr.msk.f32.mxu0 %vm7232_vm0, %v7231_v0 }
 0x200   :  { %6337 = vmatmul.mubr.msk.f32.gmra.mxu0 %vm636_vm8, %v610_v44 }
 0x201   :  { %6373 = vmatprep.mubr.msk.f32.mxu0 %vm7232_vm0, %v7231_v0 }
 0x2b8   :  { %v718_v23 = vpop.f32.mrf.mxu0 }
 0x2b9   :  { %v719_v24 = vadd.f32 %v718_v23, %v7404_v19 }
 0x2ba   :  { %v6332_v25 = vpop.f32.mrf.mxu0  ;;  %v587_v37 = vpop.f32.mrf.mxu1 }
 0x2bb   :  { %v733_v27 = vsel %vm732_vm15, %v719_v24, -inf }
 0x2bc   :  { %734 = vmax.xlane.f32.xlu0 %v733_v27  ;;  %v723_v28 = vpop.f32.mrf.mxu0  ;;  %v6323_v38 = vpop.f32.mrf.mxu1 }
 0x2bd   :  { %v724_v29 = vadd.f32 %v723_v28, %v7409_v26 }
 0x2be   :  { %v6335_v30 = vpop.f32.mrf.mxu0 }
 0x2bf   :  { %v736_v32 = vsel %vm732_vm15, %v724_v29, -inf }
 0x2c0   :  { %737 = vmax.xlane.f32.xlu1 %v736_v32  ;;  %v728_v33 = vpop.f32.mrf.mxu0 }
 0x2c1   :  { %v729_v34 = vadd.f32 %v728_v33, %v7415_v31 }
 0x2c2   :  { %v6338_v35 = vpop.f32.mrf.mxu0 }
 0x2c3   :  { %v739_v36 = vsel %vm732_vm15, %v729_v34, -inf }
 0x2c4   :  { %740 = vmax.xlane.f32.xlu0 %v739_v36 }
 0x2da   :  { %515 = vrot.lane.b32.xlu0 %v7334_v22, %s7237_s21 }
 0x345   :  { %v735_v39 = vpop.xlane.xlu0 %734 }
 0x346   :  { %v742_v40 = vsub.f32 %v719_v24, %v735_v39 }
 0x348   :  { %v745_v41 = vmul.f32 1.442695, %v742_v40 }
 0x349   :  { %v738_v42 = vpop.xlane.xlu1 %737 }
 0x34a   :  { %6905 = vpow2.f32 %v745_v41  ;;  %v743_v43 = vsub.f32 %v724_v29, %v738_v42 }
 0x34c   :  { %v747_v44 = vmul.f32 1.442695, %v743_v43 }
 0x34d   :  { %v741_v45 = vpop.xlane.xlu0 %740 }
 0x34e   :  { %6907 = vpow2.f32 %v747_v44  ;;  %v744_v48 = vsub.f32 %v729_v34, %v741_v45 }
 0x350   :  { %v749_v49 = vmul.f32 1.442695, %v744_v48 }
 0x351   :  { %v516_v50 = vpop.permute.xlu0 %515 }
 0x352   :  { %6909 = vpow2.f32 %v749_v49  ;;  %v588_v51 = vadd.f32 %v587_v37, %v516_v50 }
 0x354   :  { %v620_v52 = vrot.slane %v588_v51, 6  ;;  %v612_v53 = vrot.slane %v588_v51, 2  ;;  %v616_v60 = vrot.slane %v588_v51, 4 }
 0x356   :  { %621 = vrot.lane.b32.xlu0 %v620_v52, %s7235_s19 }
 0x357   :  { %v6906_v54 = vpop.eup %6905 }
 0x358   :  { %v751_v55 = vsel %vm732_vm15, %v6906_v54, 0.0 }
 0x359   :  { %752 = vadd.xlane.f32.xlu1 %v751_v55 }
 0x35a   :  { %613 = vrot.lane.b32.xlu0 %v612_v53, %s7234_s3 }
 0x35b   :  { %v6908_v56 = vpop.eup %6907 }
 0x35c   :  { %v754_v57 = vsel %vm732_vm15, %v6908_v56, 0.0 }
 0x35d   :  { %755 = vadd.xlane.f32.xlu1 %v754_v57  ;;  %v7475_v57 = vld [vmem:[#allocation8 + $0xd8] sm:$0xff] }
 0x35e   :  { %884 = vrot.lane.b32.xlu0 %v7300_v1, %s7240_s22  ;;  %6366 = vmatpush3.msra.mxu0 %v7475_v57 }
 0x35f   :  { %v6910_v58 = vpop.eup %6909  ;;  %6367 = vmatprep.subr.mxu0 %v7231_v0 }
 0x360   :  { %v757_v59 = vsel %vm732_vm15, %v6910_v58, 0.0 }
 0x361   :  { %758 = vadd.xlane.f32.xlu1 %v757_v59  ;;  %v7487_v59 = vld [vmem:[#allocation8 + $0xc0] sm:$0xff] }
 0x372   :  { %617 = vrot.lane.b32.xlu1 %v616_v60, %s7233_s0  ;;  %v7490_v60 = vld [vmem:[#allocation8 + $0x138] sm:$0xff] }
 0x376   :  { %882 = vrot.lane.b32.xlu1 %v7302_v2, %s7240_s22 }
 0x37a   :  { %880 = vrot.lane.b32.xlu1 %v7305_v3, %s7240_s22 }
 0x3c8   :  { %v622_v63 = vpop.permute.xlu0 %621 }
 0x3cc   :  { %v614_v8 = vpop.permute.xlu0 %613 }
 0x3cd   :  { %v624_v11 = vsel %vm604_vm7, %v588_v51, %v614_v8  ;;  %v7470_v51 = vld [vmem:[#allocation8 + $0x146] ss:$0 sm:$0xff] }
 0x3d0   :  { %v885_v24 = vpop.permute.xlu0 %884 }
 0x3e2   :  { %v753_v61 = vpop.xlane.xlu1 %752 }
 0x3e3   :  { %6911 = vrcp.f32 %v753_v61  ;;  %v7492_v61 = vld [vmem:[#allocation8 + $0x130] sm:$0xff] }
 0x3e6   :  { %v756_v62 = vpop.xlane.xlu1 %755 }
 0x3e7   :  { %6913 = vrcp.f32 %v756_v62  ;;  %v5853_v62 = vld [vmem:[#allocation8 + $0x14c] ss:$0 sm:$0xff] }
 0x3ea   :  { %v759_v4 = vpop.xlane.xlu1 %758 }
 0x3eb   :  { %6915 = vrcp.f32 %v759_v4  ;;  %v7502_v4 = vld [vmem:[#allocation8 + $0x120] sm:$0xff] }
 0x3ee   :  { %v618_v5 = vpop.permute.xlu1 %617 }
 0x3ef   :  { %v626_v6 = vsel %vm93_vm2, %v618_v5, %v622_v63  ;;  %v625_v10 = vsel %vm97_vm4, %v614_v8, %v618_v5  ;;  %v7497_v63 = vld [vmem:[#allocation8 + $0x128] sm:$0xff]  ;;  %v7506_v5 = vld [vmem:[#allocation8 + $0x118] sm:$0xff] }
 0x3f0   :  { %v6912_v7 = vpop.eup %6911  ;;  %6340 = vmatpush3.msra.mxu1 %v626_v6 }
 0x3f1   :  { %6341 = vmatprep.subr.mxu1 %v7231_v0  ;;  %v761_v12 = vmul.f32 %v6912_v7, %v6906_v54 }
 0x3f2   :  { %6342 = vmatpush3.msra.mxu1 %v625_v10  ;;  %v883_v23 = vpop.permute.xlu1 %882 }
 0x3f3   :  { %6343 = vmatprep.subr.mxu1 %v7231_v0 }
 0x3f4   :  { %v6914_v14 = vpop.eup %6913  ;;  %6344 = vmatpush3.msra.mxu1 %v624_v11 }
 0x3f5   :  { %6346 = vmatmul.mubr.msk.f32.vlgmr.msra.gmra.mxu1 %vm732_vm15, %v761_v12  ;;  %6354 = vmatprep.subr.mxu1 %v7231_v0  ;;  %v763_v15 = vmul.f32 %v6914_v14, %v6908_v56 }
 0x3f6   :  { %6348 = vmatprep.mubr.msk.f32.mxu1 %vm7232_vm0, %v7231_v0  ;;  %6355 = vmatpush3.msra.mxu1 %v885_v24  ;;  %v881_v25 = vpop.permute.xlu1 %880 }
 0x3f7   :  { %6356 = vmatprep.subr.mxu1 %v7231_v0 }
 0x3f8   :  { %v6916_v16 = vpop.eup %6915  ;;  %6357 = vmatpush3.msra.mxu1 %v883_v23  ;;  %v7524_v23 = vld [vmem:[#allocation8 + $0x100] sm:$0xff] }
 0x3f9   :  { %6349 = vmatmul.mubr.msk.f32.gmra.mxu1 %vm732_vm15, %v763_v15  ;;  %v765_v21 = vmul.f32 %v6916_v16, %v6910_v58  ;;  %6358 = vmatprep.subr.mxu1 %v7231_v0  ;;  %v7477_v58 = vld [vmem:[#allocation8 + $0xd0] sm:$0xff] }
 0x3fa   :  { %6351 = vmatprep.mubr.msk.f32.mxu1 %vm7232_vm0, %v7231_v0  ;;  %6359 = vmatpush3.msra.mxu1 %v881_v25  ;;  %v7516_v16 = vld [vmem:[#allocation8 + $0x110] sm:$0xff] }
 0x3fb   :  { %6360 = vmatprep.subr.mxu1 %v7231_v0  ;;  %6368 = vmatpush3.msra.mxu0 %v7477_v58 }
 0x3fc   :  { %6369 = vmatprep.subr.mxu0 %v7231_v0 }
 0x3fd   :  { %6352 = vmatmul.mubr.msk.f32.gmra.mxu1 %vm732_vm15, %v765_v21  ;;  %v7520_v21 = vld [vmem:[#allocation8 + $0x108] sm:$0xff] }
 0x3fe   :  { %6362 = vmatprep.mubr.msk.f32.mxu1 %vm7232_vm0, %v7231_v0 }
 0x4b5   :  { %v841_v27 = vpop.f32.mrf.mxu1 }
 0x4b6   :  { %v857_v29 = vrot.slane %v841_v27, 6 }
 0x4b7   :  { %v6347_v2 = vpop.f32.mrf.mxu1 }
 0x4b9   :  { %v846_v28 = vpop.f32.mrf.mxu1 }
 0x4ba   :  { %v858_v1 = vrot.slane %v846_v28, 6  ;;  %v864_v33 = vrot.slane %v846_v28, 4 }
 0x4bb   :  { %v6350_v30 = vpop.f32.mrf.mxu1 }
 0x4bc   :  { %v859_v3 = vsel %vm93_vm2, %v857_v29, %v858_v1 }
 0x4bd   :  { %860 = vrot.lane.b32.xlu0 %v859_v3, %s7230_s14  ;;  %v851_v32 = vpop.f32.mrf.mxu1 }
 0x4be   :  { %v865_v34 = vrot.slane %v851_v32, 4  ;;  %v870_v35 = vrot.slane %v851_v32, 2 }
 0x4bf   :  { %v6353_v36 = vpop.f32.mrf.mxu1 }
 0x4c0   :  { %871 = vrot.lane.b32.xlu1 %v870_v35, %s7241_s23  ;;  %v866_v37 = vsel %vm97_vm4, %v864_v33, %v865_v34 }
 0x4c1   :  { %867 = vrot.lane.b32.xlu0 %v866_v37, %s7242_s24 }
 0x4c4   :  { %890 = vrot.lane.b32.xlu1 %v7334_v22, %s7240_s22 }
 0x4c5   :  { %878 = vrot.lane.b32.xlu0 %v7316_v13, %s7240_s22 }
 0x52f   :  { %v861_v38 = vpop.permute.xlu0 %860 }
 0x530   :  { %v874_v40 = vsel %vm636_vm8, %v841_v27, %v861_v38  ;;  %v7535_v38 = vld [vmem:[#allocation8 + $0x38] sm:$0xff] }
 0x532   :  { %v872_v42 = vpop.permute.xlu1 %871 }
 0x533   :  { %v868_v39 = vpop.permute.xlu0 %867 }
 0x534   :  { %v876_v41 = vsel %vm875_vm3, %v874_v40, %v868_v39  ;;  %v7541_v39 = vld [vmem:[#allocation8 + $0x30] sm:$0xff]  ;;  %v7545_v40 = vld [vmem:[#allocation8 + $0x28] sm:$0xff] }
 0x535   :  { %v877_v44 = vsel %vm732_vm15, %v876_v41, %v872_v42  ;;  %v7549_v41 = vld [vmem:[#allocation8 + $0x20] sm:$0xff] }
 0x536   :  { %v891_v13 = vpop.permute.xlu1 %890 }
 0x537   :  { %v879_v43 = vpop.permute.xlu0 %878 }
 0x538   :  { %6361 = vmatpush3.msra.mxu1 %v879_v43 }
 0x539   :  { %6363 = vmatmul.mubr.msk.f32.vlgmr.msra.gmra.mxu1 %vm424_vm6, %v877_v44  ;;  %6376 = vmatprep.subr.mxu1 %v7231_v0 }
 0x53a   :  { %6392 = vmatprep.mubr.msk.f32.mxu1 %vm7232_vm0, %v7231_v0  ;;  %6377 = vmatpush3.msra.mxu1 %v7490_v60 }
 0x53b   :  { %6378 = vmatprep.subr.mxu1 %v7231_v0 }
 0x53c   :  { %6379 = vmatpush3.msra.mxu1 %v7492_v61 }
 0x53d   :  { %6380 = vmatprep.subr.mxu1 %v7231_v0 }
 0x53e   :  { %6381 = vmatpush3.msra.mxu1 %v7497_v63 }
 0x53f   :  { %6382 = vmatprep.subr.mxu1 %v7231_v0 }
 0x540   :  { %6383 = vmatpush3.msra.mxu1 %v7502_v4 }
 0x541   :  { %6384 = vmatprep.subr.mxu1 %v7231_v0 }
 0x542   :  { %6385 = vmatpush3.msra.mxu1 %v7506_v5 }
 0x543   :  { %6386 = vmatprep.subr.mxu1 %v7231_v0 }
 0x544   :  { %6387 = vmatpush3.msra.mxu1 %v7516_v16 }
 0x545   :  { %6388 = vmatprep.subr.mxu1 %v7231_v0 }
 0x546   :  { %6389 = vmatpush3.msra.mxu1 %v7520_v21 }
 0x547   :  { %6390 = vmatprep.subr.mxu1 %v7231_v0 }
 0x548   :  { %6391 = vmatpush3.msra.mxu1 %v7524_v23 }
 0x549   :  { %6417 = vmatprep.subr.mxu1 %v7231_v0 }
 0x5f9   :  { %v962_v22 = vpop.f32.mrf.mxu1 }
 0x5fa   :  { %v963_v45 = vadd.f32 %v962_v22, %v891_v13 }
 0x5fb   :  { %v6364_v48 = vpop.f32.mrf.mxu1 }
 0x5fc   :  { %v966_v49 = vadd.f32 %v963_v45, %v7326_v20  ;;  %v7481_v20 = vld [vmem:[#allocation8 + $0xc8] sm:$0xff] }
 0x5fd   :  { %6370 = vmatpush3.msra.mxu0 %v7481_v20 }
 0x5fe   :  { %v969_v50 = vsel %vm968_vm5, %v966_v49, 0.0  ;;  %6371 = vmatprep.subr.mxu0 %v7231_v0 }
 0x5ff   :  { %970 = vadd.xlane.f32.xlu0 %v969_v50  ;;  %6372 = vmatpush3.msra.mxu0 %v7487_v59 }
 0x600   :  { %6395 = vmatprep.subr.mxu0 %v7231_v0 }
 0x615   :  { %989 = vrot.lane.b32.xlu0 %v7470_v51, %s7236_s20 }
 0x688   :  { %v971_v52 = vpop.xlane.xlu0 %970 }
 0x689   :  { %v973_v53 = vmul.f32 0.03125, %v971_v52  ;;  %v7560_v52 = vld [vmem:[#allocation8 + $0x141] ss:$0 sm:$0xff] }
 0x68b   :  { %v974_v54 = vsub.f32 %v966_v49, %v973_v53 }
 0x68c   :  { %v990_v12 = vpop.permute.xlu0 %989 }
 0x68d   :  { %v975_v55 = vmul.f32 %v974_v54, %v974_v54 }
 0x68f   :  { %v976_v56 = vsel %vm968_vm5, %v975_v55, 0.0 }
 0x690   :  { %977 = vadd.xlane.f32.xlu1 %v976_v56 }
 0x6a1   :  { %1085 = vrot.lane.b32.xlu1 %v5853_v62, %s7237_s21 }
 0x719   :  { %v978_v6 = vpop.xlane.xlu1 %977 }
 0x71a   :  { %v979_v7 = vmul.f32 0.03125, %v978_v6 }
 0x71c   :  { %v980_v8 = vadd.f32 1e-05, %v979_v7 }
 0x71d   :  { %v1086_v28 = vpop.permute.xlu1 %1085 }
 0x71e   :  { %6917 = vrsqrt.f32 %v980_v8 }
 0x72b   :  { %v6918_v10 = vpop.eup %6917 }
 0x72c   :  { %v982_v11 = vmul.f32 %v6918_v10, %v974_v54 }
 0x72e   :  { %v987_v14 = vmul.f32 %v7470_v51, %v982_v11 }
 0x730   :  { %v992_v15 = vadd.f32 %v990_v12, %v987_v14 }
 0x732   :  { %6374 = vmatmul.mubr.msk.f32.vlgmr.msra.gmra.mxu0 %vm424_vm6, %v992_v15 }
 0x733   :  { %6403 = vmatprep.mubr.msk.f32.mxu0 %vm7232_vm0, %v7231_v0  ;;  %6396 = vmatpush3.msra.mxu0 %v7535_v38 }
 0x734   :  { %6397 = vmatprep.subr.mxu0 %v7231_v0 }
 0x735   :  { %6398 = vmatpush3.msra.mxu0 %v7541_v39 }
 0x736   :  { %6399 = vmatprep.subr.mxu0 %v7231_v0 }
 0x737   :  { %6400 = vmatpush3.msra.mxu0 %v7545_v40 }
 0x738   :  { %6401 = vmatprep.subr.mxu0 %v7231_v0 }
 0x739   :  { %6402 = vmatpush3.msra.mxu0 %v7549_v41 }
 0x73a   :  { %6406 = vmatprep.subr.mxu0 %v7231_v0 }
 0x7f2   :  { %v1079_v24 = vpop.f32.mrf.mxu0 }
 0x7f3   :  { %v1080_v25 = vadd.f32 %v5853_v62, %v1079_v24 }
 0x7f4   :  { %v6375_v27 = vpop.f32.mrf.mxu0 }
 0x7f5   :  { %v1083_v2 = vmax.f32 %v1080_v25, 0.0 }
 0x7f7   :  { %6393 = vmatmul.mubr.msk.f32.vlgmr.msra.gmra.mxu1 %vm1088_vm9, %v1083_v2 }
 0x7f8   :  { %6423 = vmatprep.mubr.msk.f32.mxu1 %vm7232_vm0, %v7231_v0 }
 0x8b7   :  { %v1158_v29 = vpop.f32.mrf.mxu1 }
 0x8b8   :  { %v1159_v1 = vadd.f32 %v1158_v29, %v1086_v28 }
 0x8b9   :  { %v6394_v30 = vpop.f32.mrf.mxu1 }
 0x8ba   :  { %v1162_v3 = vadd.f32 %v1159_v1, %v992_v15 }
 0x8bc   :  { %v1163_v32 = vsel %vm968_vm5, %v1162_v3, 0.0 }
 0x8bd   :  { %1164 = vadd.xlane.f32.xlu0 %v1163_v32 }
 0x8d3   :  { %1176 = vrot.lane.b32.xlu0 %v7470_v51, %s7237_s21 }
 0x946   :  { %v1165_v33 = vpop.xlane.xlu0 %1164 }
 0x947   :  { %v1166_v34 = vmul.f32 0.03125, %v1165_v33 }
 0x949   :  { %v1167_v35 = vsub.f32 %v1162_v3, %v1166_v34 }
 0x94a   :  { %v1177_v22 = vpop.permute.xlu0 %1176 }
 0x94b   :  { %v1168_v36 = vmul.f32 %v1167_v35, %v1167_v35 }
 0x94d   :  { %v1169_v37 = vsel %vm968_vm5, %v1168_v36, 0.0 }
 0x94e   :  { %1170 = vadd.xlane.f32.xlu1 %v1169_v37 }
 0x95f   :  { %1180 = vrot.lane.b32.xlu1 %v7470_v51, %s7240_s22 }
 0x9d7   :  { %v1171_v42 = vpop.xlane.xlu1 %1170 }
 0x9d8   :  { %v1172_v43 = vmul.f32 0.03125, %v1171_v42 }
 0x9da   :  { %v1173_v44 = vadd.f32 1e-05, %v1172_v43 }
 0x9db   :  { %v1181_v48 = vpop.permute.xlu1 %1180 }
 0x9dc   :  { %6919 = vrsqrt.f32 %v1173_v44 }
 0x9e9   :  { %v6920_v13 = vpop.eup %6919 }
 0x9ea   :  { %v1175_v45 = vmul.f32 %v6920_v13, %v1167_v35 }
 0x9ec   :  { %v1179_v49 = vmul.f32 %v1177_v22, %v1175_v45 }
 0x9ee   :  { %v7553_v50 = vadd.f32 %v1181_v48, %v1179_v49 }
 0x9f0   :  { %v1184_v51 = vadd.f32 %v7553_v50, %v7322_v18 }
 0x9f2   :  { %6404 = vmatmul.mubr.msk.f32.vlgmr.msra.gmra.mxu0 %vm424_vm6, %v1184_v51 }
 0x9f3   :  { %6414 = vmatprep.mubr.msk.f32.mxu0 %vm7232_vm0, %v7231_v0 }
 0xab2   :  { %v1263_v53 = vpop.f32.mrf.mxu0 }
 0xab3   :  { %v1264_v54 = vadd.f32 %v7560_v52, %v1263_v53 }
 0xab4   :  { %v6405_v55 = vpop.f32.mrf.mxu0 }
 0xab5   :  { %v1369_v56 = vrot.slane %v1264_v54, 6  ;;  %v1365_v62 = vrot.slane %v1264_v54, 4  ;;  %v1361_v6 = vrot.slane %v1264_v54, 2 }
 0xab7   :  { %1370 = vrot.lane.b32.xlu1 %v1369_v56, %s7235_s19  ;;  %1366 = vrot.lane.b32.xlu0 %v1365_v62, %s7233_s0 }
 0xabb   :  { %1362 = vrot.lane.b32.xlu0 %v1361_v6, %s7234_s3 }
 0xb29   :  { %v1371_v7 = vpop.permute.xlu1 %1370  ;;  %v1367_v8 = vpop.permute.xlu0 %1366 }
 0xb2a   :  { %v1375_v10 = vsel %vm93_vm2, %v1367_v8, %v1371_v7 }
 0xb2b   :  { %1402 = vrot.lane.b32.xlu1 %v1375_v10, %s7236_s20  ;;  %v1378_v3 = vmul.f32 0.35355338, %v1375_v10 }
 0xb2d   :  { %v1363_v11 = vpop.permute.xlu0 %1362 }
 0xb2e   :  { %v1374_v12 = vsel %vm97_vm4, %v1363_v11, %v1367_v8  ;;  %v1373_v14 = vsel %vm604_vm7, %v1264_v54, %v1363_v11 }
 0xb2f   :  { %1400 = vrot.lane.b32.xlu0 %v1374_v12, %s7236_s20  ;;  %1398 = vrot.lane.b32.xlu1 %v1373_v14, %s7236_s20  ;;  %v1376_v28 = vmul.f32 0.35355338, %v1373_v14  ;;  %v1377_v30 = vmul.f32 0.35355338, %v1374_v12 }
 0xb33   :  { %1277 = vrot.lane.b32.xlu0 %v7535_v38, %s7237_s21  ;;  %1275 = vrot.lane.b32.xlu1 %v7541_v39, %s7237_s21 }
 0xb37   :  { %1273 = vrot.lane.b32.xlu0 %v7545_v40, %s7237_s21  ;;  %1271 = vrot.lane.b32.xlu1 %v7549_v41, %s7237_s21 }
 0xb9d   :  { %v1403_v15 = vpop.permute.xlu1 %1402 }
 0xb9e   :  { %6418 = vmatpush3.xpose.msk.msra.mxu1 %vm636_vm8, %v1403_v15 }
 0xb9f   :  { %6419 = vmatprep.subr.mxu1 %v7231_v0 }
 0xba1   :  { %v1401_v24 = vpop.permute.xlu0 %1400  ;;  %v1399_v25 = vpop.permute.xlu1 %1398 }
 0xba2   :  { %6420 = vmatpush3.xpose.msk.msra.mxu1 %vm636_vm8, %v1401_v24 }
 0xba3   :  { %6421 = vmatprep.subr.mxu1 %v7231_v0 }
 0xba5   :  { %v1278_v27 = vpop.permute.xlu0 %1277  ;;  %v1276_v2 = vpop.permute.xlu1 %1275 }
 0xba6   :  { %6407 = vmatpush3.msra.mxu0 %v1278_v27  ;;  %6422 = vmatpush3.xpose.msk.msra.mxu1 %vm636_vm8, %v1399_v25 }
 0xba7   :  { %6408 = vmatprep.subr.mxu0 %v7231_v0  ;;  %6458 = vmatprep.subr.mxu1 %v7231_v0 }
 0xba8   :  { %6409 = vmatpush3.msra.mxu0 %v1276_v2 }
 0xba9   :  { %v1274_v29 = vpop.permute.xlu0 %1273  ;;  %6410 = vmatprep.subr.mxu0 %v7231_v0  ;;  %6424 = vmatmul.mubr.msk.f32.vlgmr.msra.gmra.mxu1 %vm636_vm8, %v1376_v28  ;;  %v1272_v1 = vpop.permute.xlu1 %1271 }
 0xbaa   :  { %6411 = vmatpush3.msra.mxu0 %v1274_v29  ;;  %6426 = vmatprep.mubr.msk.f32.mxu1 %vm7232_vm0, %v7231_v0 }
 0xbab   :  { %6412 = vmatprep.subr.mxu0 %v7231_v0 }
 0xbac   :  { %6413 = vmatpush3.msra.mxu0 %v1272_v1 }
 0xbad   :  { %6415 = vmatmul.mubr.msk.f32.vlgmr.msra.gmra.mxu0 %vm424_vm6, %v7553_v50  ;;  %6427 = vmatmul.mubr.msk.f32.gmra.mxu1 %vm636_vm8, %v1377_v30 }
 0xbae   :  { %6429 = vmatprep.mubr.msk.f32.mxu1 %vm7232_vm0, %v7231_v0  ;;  %6432 = vmatprep.subr.mxu0 %v7231_v0 }
 0xbaf   :  { %6438 = vmatprep.mubr.msk.f32.mxu0 %vm7232_vm0, %v7231_v0 }
 0xbb1   :  { %6430 = vmatmul.mubr.msk.f32.gmra.mxu1 %vm636_vm8, %v1378_v3 }
 0xbb2   :  { %6466 = vmatprep.mubr.msk.f32.mxu1 %vm7232_vm0, %v7231_v0 }
 0xc69   :  { %v1485_v32 = vpop.f32.mrf.mxu1 }
 0xc6a   :  { %v1486_v33 = vadd.f32 %v1485_v32, %v7404_v19 }
 0xc6b   :  { %v6425_v34 = vpop.f32.mrf.mxu1 }
 0xc6c   :  { %v1499_v35 = vsel %vm732_vm15, %v1486_v33, -inf }
 0xc6d   :  { %v1356_v36 = vpop.f32.mrf.mxu0  ;;  %1500 = vmax.xlane.f32.xlu0 %v1499_v35  ;;  %v1490_v37 = vpop.f32.mrf.mxu1 }
 0xc6e   :  { %v1491_v42 = vadd.f32 %v1490_v37, %v7409_v26 }
 0xc6f   :  { %v6416_v43 = vpop.f32.mrf.mxu0  ;;  %v6428_v44 = vpop.f32.mrf.mxu1 }
 0xc70   :  { %v1502_v13 = vsel %vm732_vm15, %v1491_v42, -inf }
 0xc71   :  { %1503 = vmax.xlane.f32.xlu1 %v1502_v13  ;;  %v1495_v22 = vpop.f32.mrf.mxu1 }
 0xc72   :  { %v1496_v45 = vadd.f32 %v1495_v22, %v7415_v31 }
 0xc73   :  { %v6431_v48 = vpop.f32.mrf.mxu1 }
 0xc74   :  { %v1505_v49 = vsel %vm732_vm15, %v1496_v45, -inf }
 0xc75   :  { %1506 = vmax.xlane.f32.xlu0 %v1505_v49 }
 0xc8b   :  { %1284 = vrot.lane.b32.xlu0 %v7560_v52, %s7237_s21 }
 0xcf6   :  { %v1501_v19 = vpop.xlane.xlu0 %1500 }
 0xcf7   :  { %v1508_v51 = vsub.f32 %v1486_v33, %v1501_v19 }
 0xcf9   :  { %v1511_v53 = vmul.f32 1.442695, %v1508_v51 }
 0xcfa   :  { %v1504_v54 = vpop.xlane.xlu1 %1503 }
 0xcfb   :  { %6921 = vpow2.f32 %v1511_v53  ;;  %v1509_v26 = vsub.f32 %v1491_v42, %v1504_v54 }
 0xcfd   :  { %v1513_v55 = vmul.f32 1.442695, %v1509_v26 }
 0xcfe   :  { %v1507_v56 = vpop.xlane.xlu0 %1506 }
 0xcff   :  { %6923 = vpow2.f32 %v1513_v55  ;;  %v1510_v62 = vsub.f32 %v1496_v45, %v1507_v56 }
 0xd01   :  { %v1515_v6 = vmul.f32 1.442695, %v1510_v62 }
 0xd02   :  { %v1285_v7 = vpop.permute.xlu0 %1284 }
 0xd03   :  { %6925 = vpow2.f32 %v1515_v6  ;;  %v1357_v31 = vadd.f32 %v1356_v36, %v1285_v7 }
 0xd05   :  { %v1388_v8 = vrot.slane %v1357_v31, 6  ;;  %v1380_v12 = vrot.slane %v1357_v31, 2  ;;  %v1384_v27 = vrot.slane %v1357_v31, 4 }
 0xd07   :  { %1389 = vrot.lane.b32.xlu0 %v1388_v8, %s7235_s19 }
 0xd08   :  { %v6922_v10 = vpop.eup %6921 }
 0xd09   :  { %v1517_v11 = vsel %vm732_vm15, %v6922_v10, 0.0 }
 0xd0a   :  { %1518 = vadd.xlane.f32.xlu1 %v1517_v11 }
 0xd0b   :  { %1381 = vrot.lane.b32.xlu0 %v1380_v12, %s7234_s3 }
 0xd0c   :  { %v6924_v14 = vpop.eup %6923 }
 0xd0d   :  { %v1520_v15 = vsel %vm732_vm15, %v6924_v14, 0.0 }
 0xd0e   :  { %1521 = vadd.xlane.f32.xlu1 %v1520_v15 }
 0xd0f   :  { %1649 = vrot.lane.b32.xlu0 %v7535_v38, %s7240_s22 }
 0xd10   :  { %v6926_v24 = vpop.eup %6925 }
 0xd11   :  { %v1523_v25 = vsel %vm732_vm15, %v6926_v24, 0.0 }
 0xd12   :  { %1524 = vadd.xlane.f32.xlu1 %v1523_v25 }
 0xd23   :  { %1385 = vrot.lane.b32.xlu1 %v1384_v27, %s7233_s0 }
 0xd27   :  { %1647 = vrot.lane.b32.xlu1 %v7541_v39, %s7240_s22 }
 0xd2b   :  { %1645 = vrot.lane.b32.xlu1 %v7545_v40, %s7240_s22 }
 0xd79   :  { %v1390_v29 = vpop.permute.xlu0 %1389 }
 0xd7d   :  { %v1382_v32 = vpop.permute.xlu0 %1381 }
 0xd7e   :  { %v1392_v40 = vsel %vm604_vm7, %v1357_v31, %v1382_v32 }
 0xd81   :  { %v1650_v43 = vpop.permute.xlu0 %1649 }
 0xd93   :  { %v1519_v2 = vpop.xlane.xlu1 %1518 }
 0xd94   :  { %6927 = vrcp.f32 %v1519_v2 }
 0xd97   :  { %v1522_v28 = vpop.xlane.xlu1 %1521 }
 0xd98   :  { %6929 = vrcp.f32 %v1522_v28 }
 0xd9b   :  { %v1525_v1 = vpop.xlane.xlu1 %1524 }
 0xd9c   :  { %6931 = vrcp.f32 %v1525_v1 }
 0xd9f   :  { %v1386_v38 = vpop.permute.xlu1 %1385 }
 0xda0   :  { %v1394_v30 = vsel %vm93_vm2, %v1386_v38, %v1390_v29  ;;  %v1393_v39 = vsel %vm97_vm4, %v1382_v32, %v1386_v38  ;;  %v7675_v38 = vld [vmem:[#allocation8 + $0x58] sm:$0xff] }
 0xda1   :  { %v6928_v3 = vpop.eup %6927  ;;  %6433 = vmatpush3.msra.mxu0 %v1394_v30 }
 0xda2   :  { %6434 = vmatprep.subr.mxu0 %v7231_v0  ;;  %v1527_v33 = vmul.f32 %v6928_v3, %v6922_v10 }
 0xda3   :  { %6435 = vmatpush3.msra.mxu0 %v1393_v39  ;;  %v1648_v42 = vpop.permute.xlu1 %1647 }
 0xda4   :  { %6436 = vmatprep.subr.mxu0 %v7231_v0 }
 0xda5   :  { %v6930_v34 = vpop.eup %6929  ;;  %6437 = vmatpush3.msra.mxu0 %v1392_v40 }
 0xda6   :  { %6439 = vmatmul.mubr.msk.f32.vlgmr.msra.gmra.mxu0 %vm732_vm15, %v1527_v33  ;;  %6447 = vmatprep.subr.mxu0 %v7231_v0  ;;  %v1529_v35 = vmul.f32 %v6930_v34, %v6924_v14 }
 0xda7   :  { %6441 = vmatprep.mubr.msk.f32.mxu0 %vm7232_vm0, %v7231_v0  ;;  %6448 = vmatpush3.msra.mxu0 %v1650_v43  ;;  %v1646_v44 = vpop.permute.xlu1 %1645  ;;  %v7694_v43 = vld [vmem:[#allocation8 + $0x40] sm:$0xff] }
 0xda8   :  { %6449 = vmatprep.subr.mxu0 %v7231_v0 }
 0xda9   :  { %v6932_v36 = vpop.eup %6931  ;;  %6450 = vmatpush3.msra.mxu0 %v1648_v42  ;;  %v7688_v42 = vld [vmem:[#allocation8 + $0x48] sm:$0xff] }
 0xdaa   :  { %6442 = vmatmul.mubr.msk.f32.gmra.mxu0 %vm732_vm15, %v1529_v35  ;;  %v1531_v37 = vmul.f32 %v6932_v36, %v6926_v24  ;;  %6451 = vmatprep.subr.mxu0 %v7231_v0  ;;  %v7681_v36 = vld [vmem:[#allocation7] sm:$0xff] }
 0xdab   :  { %6444 = vmatprep.mubr.msk.f32.mxu0 %vm7232_vm0, %v7231_v0  ;;  %6452 = vmatpush3.msra.mxu0 %v1646_v44 }
 0xdac   :  { %6453 = vmatprep.subr.mxu0 %v7231_v0 }
 0xdae   :  { %6445 = vmatmul.mubr.msk.f32.gmra.mxu0 %vm732_vm15, %v1531_v37  ;;  %v7683_v37 = vld [vmem:[#allocation8 + $0x50] sm:$0xff] }
 0xdaf   :  { %6455 = vmatprep.mubr.msk.f32.mxu0 %vm7232_vm0, %v7231_v0 }
 0xe66   :  { %v1607_v13 = vpop.f32.mrf.mxu0 }
 0xe67   :  { %v1623_v48 = vrot.slane %v1607_v13, 6 }
 0xe68   :  { %v6440_v22 = vpop.f32.mrf.mxu0 }
 0xe69   :  { %v7703_v22 = vld [vmem:[#allocation8 + $0x142] ss:$0 sm:$0xff] }
 0xe6a   :  { %v1612_v45 = vpop.f32.mrf.mxu0 }
 0xe6b   :  { %v1624_v49 = vrot.slane %v1612_v45, 6  ;;  %v1630_v54 = vrot.slane %v1612_v45, 4 }
 0xe6c   :  { %v6443_v19 = vpop.f32.mrf.mxu0 }
 0xe6d   :  { %v1625_v51 = vsel %vm93_vm2, %v1623_v48, %v1624_v49 }
 0xe6e   :  { %1626 = vrot.lane.b32.xlu0 %v1625_v51, %s7230_s14  ;;  %v1617_v53 = vpop.f32.mrf.mxu0 }
 0xe6f   :  { %v1631_v26 = vrot.slane %v1617_v53, 4  ;;  %v1636_v55 = vrot.slane %v1617_v53, 2 }
 0xe70   :  { %v6446_v56 = vpop.f32.mrf.mxu0 }
 0xe71   :  { %1637 = vrot.lane.b32.xlu1 %v1636_v55, %s7241_s23  ;;  %v1632_v62 = vsel %vm97_vm4, %v1630_v54, %v1631_v26  ;;  %v7766_v54 = vld [vmem:[#allocation8 + $0x14d] ss:$0 sm:$0xff] }
 0xe72   :  { %1633 = vrot.lane.b32.xlu0 %v1632_v62, %s7242_s24 }
 0xe75   :  { %1655 = vrot.lane.b32.xlu1 %v7560_v52, %s7240_s22 }
 0xe76   :  { %1643 = vrot.lane.b32.xlu0 %v7549_v41, %s7240_s22 }
 0xe79   :  { %1769 = vrot.lane.b32.xlu1 %v7477_v58, %s7237_s21 }
 0xee0   :  { %v1627_v6 = vpop.permute.xlu0 %1626 }
 0xee1   :  { %v1640_v31 = vsel %vm636_vm8, %v1607_v13, %v1627_v6 }
 0xee3   :  { %v1638_v10 = vpop.permute.xlu1 %1637 }
 0xee4   :  { %v1634_v7 = vpop.permute.xlu0 %1633 }
 0xee5   :  { %v1641_v8 = vsel %vm875_vm3, %v1640_v31, %v1634_v7 }
 0xee6   :  { %v1642_v12 = vsel %vm732_vm15, %v1641_v8, %v1638_v10 }
 0xee7   :  { %v1656_v41 = vpop.permute.xlu1 %1655 }
 0xee8   :  { %v1644_v11 = vpop.permute.xlu0 %1643 }
 0xee9   :  { %6454 = vmatpush3.msra.mxu0 %v1644_v11 }
 0xeea   :  { %6456 = vmatmul.mubr.msk.f32.vlgmr.msra.gmra.mxu0 %vm424_vm6, %v1642_v12  ;;  %6469 = vmatprep.subr.mxu0 %v7231_v0 }
 0xeeb   :  { %6485 = vmatprep.mubr.msk.f32.mxu0 %vm7232_vm0, %v7231_v0  ;;  %v1770_v29 = vpop.permute.xlu1 %1769 }
 0xfaa   :  { %v1727_v58 = vpop.f32.mrf.mxu0 }
 0xfab   :  { %v1728_v52 = vadd.f32 %v1727_v58, %v1656_v41 }
 0xfac   :  { %v6457_v14 = vpop.f32.mrf.mxu0 }
 0xfad   :  { %v1731_v15 = vadd.f32 %v1728_v52, %v7553_v50 }
 0xfaf   :  { %v1733_v24 = vsel %vm968_vm5, %v1731_v15, 0.0 }
 0xfb0   :  { %1734 = vadd.xlane.f32.xlu0 %v1733_v24 }
 0xfc6   :  { %1771 = vrot.lane.b32.xlu0 %v7475_v57, %s7237_s21  ;;  %v7670_v57 = vld [vmem:[#allocation8 + $0x147] ss:$0 sm:$0xff] }
 0xfca   :  { %1767 = vrot.lane.b32.xlu0 %v7481_v20, %s7237_s21 }
 0xfce   :  { %1765 = vrot.lane.b32.xlu0 %v7487_v59, %s7237_s21 }
0x1039   :  { %v1735_v25 = vpop.xlane.xlu0 %1734 }
0x103a   :  { %v1736_v27 = vmul.f32 0.03125, %v1735_v25 }
0x103c   :  { %v1737_v2 = vsub.f32 %v1731_v15, %v1736_v27 }
0x103d   :  { %v1772_v28 = vpop.permute.xlu0 %1771 }
0x103e   :  { %v1738_v1 = vmul.f32 %v1737_v2, %v1737_v2  ;;  %6459 = vmatpush3.msra.mxu1 %v1772_v28 }
0x103f   :  { %6460 = vmatprep.subr.mxu1 %v7231_v0 }
0x1040   :  { %v1739_v50 = vsel %vm968_vm5, %v1738_v1, 0.0  ;;  %6461 = vmatpush3.msra.mxu1 %v1770_v29 }
0x1041   :  { %1740 = vadd.xlane.f32.xlu1 %v1739_v50  ;;  %6462 = vmatprep.subr.mxu1 %v7231_v0  ;;  %v1768_v20 = vpop.permute.xlu0 %1767 }
0x1042   :  { %6463 = vmatpush3.msra.mxu1 %v1768_v20 }
0x1043   :  { %6464 = vmatprep.subr.mxu1 %v7231_v0 }
0x1045   :  { %v1766_v59 = vpop.permute.xlu0 %1765 }
0x1046   :  { %6465 = vmatpush3.msra.mxu1 %v1766_v59 }
0x1047   :  { %6488 = vmatprep.subr.mxu1 %v7675_v38 }
0x1052   :  { %1752 = vrot.lane.b32.xlu1 %v7670_v57, %s7236_s20 }
0x10ca   :  { %v1741_v30 = vpop.xlane.xlu1 %1740 }
0x10cb   :  { %v1742_v3 = vmul.f32 0.03125, %v1741_v30 }
0x10cd   :  { %v1743_v32 = vadd.f32 1e-05, %v1742_v3 }
0x10ce   :  { %v1753_v33 = vpop.permute.xlu1 %1752 }
0x10cf   :  { %6933 = vrsqrt.f32 %v1743_v32  ;;  %v363_v32 = vsel %vm362_vm10, 1, %v7238_v47  ;;  %vm379_vm10 = vcmp.ge.s32.totalorder %v7377_v46, 56 }
0x10dc   :  { %v6934_v39 = vpop.eup %6933 }
0x10dd   :  { %v1745_v40 = vmul.f32 %v6934_v39, %v1737_v2  ;;  %v365_v39 = vsel %vm364_vm11, 1, %v7238_v47 }
0x10df   :  { %v1750_v34 = vmul.f32 %v7670_v57, %v1745_v40  ;;  %v366_v40 = vadd.s32 %v365_v39, %v363_v32 }
0x10e1   :  { %v7679_v35 = vadd.f32 %v1753_v33, %v1750_v34  ;;  %v368_v33 = vsel %vm367_vm12, 1, %v7238_v47 }
0x10e2   :  { %v369_v34 = vadd.s32 %v368_v33, %v366_v40 }
0x10e3   :  { %6467 = vmatmul.mubr.msk.f32.vlgmr.msra.gmra.mxu1 %vm424_vm6, %v7679_v35 }
0x10e4   :  { %6489 = vmatpush3.msra.mxu1 %v7675_v38  ;;  %6496 = vmatprep.mubr.msk.f32.mxu1 %vm424_vm6, %v7681_v36 }
0x10e5   :  { %6490 = vmatprep.subr.mxu1 %v7683_v37 }
0x10e6   :  { %6491 = vmatpush3.msra.mxu1 %v7683_v37 }
0x10e7   :  { %6492 = vmatprep.subr.mxu1 %v7688_v42 }
0x10e8   :  { %6493 = vmatpush3.msra.mxu1 %v7688_v42 }
0x10e9   :  { %6494 = vmatprep.subr.mxu1 %v7694_v43 }
0x10ea   :  { %6495 = vmatpush3.msra.mxu1 %v7694_v43 }
0x10eb   :  { %6497 = vmatmul.mubr.msk.f32.vlgmr.msra.gmra.mxu1 %vm424_vm6, %v7681_v36 }
0x10ec   :  { %6507 = vmatprep.mubr.f32.mxu1 %v7231_v0 }
0x11a3   :  { %v1846_v44 = vpop.f32.mrf.mxu1 }
0x11a4   :  { %v1847_v55 = vadd.f32 %v7766_v54, %v1846_v44  ;;  %v371_v44 = vsel %vm370_vm13, 1, %v7238_v47 }
0x11a5   :  { %v6468_v13 = vpop.f32.mrf.mxu1 }
0x11a6   :  { %v1850_v6 = vmax.f32 %v1847_v55, 0.0  ;;  %v372_v13 = vadd.s32 %v371_v44, %v369_v34 }
0x11ab   :  { %v6498_v45 = vpop.f32.mrf.mxu1 }
0x11ac   :  { %v7706_v48 = vadd.f32 %v6498_v45, %v7703_v22  ;;  %v374_v45 = vsel %vm373_vm14, 1, %v7238_v47 }
0x11ad   :  { %v2086_v49 = vpop.f32.mrf.mxu1 }
0x11ae   :  { %v2087_v19 = vadd.f32 %v7703_v22, %v2086_v49  ;;  %2209 = vrot.lane.b32.xlu1 %v7706_v48, %s7235_s19  ;;  %v2214_v2 = vmul.f32 0.35355338, %v7706_v48  ;;  %v377_v49 = vsel %vm376_vm1, 1, %v7238_v47 }
0x11b0   :  { %2207 = vrot.lane.b32.xlu0 %v2087_v19, %s7235_s19  ;;  %v2213_v31 = vmul.f32 0.35355338, %v2087_v19 }
0x11b2   :  { %2203 = vrot.lane.b32.xlu1 %v7706_v48, %s7233_s0 }
0x11b4   :  { %2201 = vrot.lane.b32.xlu0 %v2087_v19, %s7233_s0 }
0x11b6   :  { %2197 = vrot.lane.b32.xlu1 %v7706_v48, %s7234_s3 }
0x11b8   :  { %2195 = vrot.lane.b32.xlu0 %v2087_v19, %s7234_s3 }
0x11ba   :  { %1873 = vrot.lane.b32.xlu1 %v7490_v60, %s7236_s20 }
0x11bc   :  { %1871 = vrot.lane.b32.xlu0 %v7492_v61, %s7236_s20 }
0x11be   :  { %1869 = vrot.lane.b32.xlu1 %v7497_v63, %s7236_s20 }
0x11c0   :  { %1867 = vrot.lane.b32.xlu0 %v7502_v4, %s7236_s20 }
0x11c2   :  { %1865 = vrot.lane.b32.xlu1 %v7506_v5, %s7236_s20 }
0x11c4   :  { %1863 = vrot.lane.b32.xlu0 %v7516_v16, %s7236_s20 }
0x11c6   :  { %1861 = vrot.lane.b32.xlu1 %v7520_v21, %s7236_s20 }
0x11c8   :  { %1859 = vrot.lane.b32.xlu0 %v7524_v23, %s7236_s20 }
0x1220   :  { %v7734_v60 = vpop.permute.xlu1 %2209 }
0x1221   :  { %2255 = vrot.lane.b32.xlu1 %v7734_v60, %s7236_s20  ;;  %v2220_v59 = vmul.f32 0.35355338, %v7734_v60  ;;  %v380_v60 = vsel %vm379_vm10, 1, %v7238_v47 }
0x1222   :  { %v7738_v61 = vpop.permute.xlu0 %2207 }
0x1223   :  { %2253 = vrot.lane.b32.xlu0 %v7738_v61, %s7236_s20  ;;  %v2219_v20 = vmul.f32 0.35355338, %v7738_v61 }
0x1224   :  { %v7742_v63 = vpop.permute.xlu1 %2203 }
0x1225   :  { %2251 = vrot.lane.b32.xlu1 %v7742_v63, %s7236_s20  ;;  %v2218_v50 = vmul.f32 0.35355338, %v7742_v63 }
0x1226   :  { %v7746_v4 = vpop.permute.xlu0 %2201 }
0x1227   :  { %2249 = vrot.lane.b32.xlu0 %v7746_v4, %s7236_s20  ;;  %v2217_v1 = vmul.f32 0.35355338, %v7746_v4 }
0x1228   :  { %v7750_v5 = vpop.permute.xlu1 %2197 }
0x1229   :  { %2247 = vrot.lane.b32.xlu1 %v7750_v5, %s7236_s20  ;;  %v2216_v29 = vmul.f32 0.35355338, %v7750_v5 }
0x122a   :  { %v7754_v16 = vpop.permute.xlu0 %2195 }
0x122b   :  { %2245 = vrot.lane.b32.xlu0 %v7754_v16, %s7236_s20  ;;  %v2215_v28 = vmul.f32 0.35355338, %v7754_v16 }
0x122c   :  { %v1874_v21 = vpop.permute.xlu1 %1873 }
0x122d   :  { %2243 = vrot.lane.b32.xlu1 %v7706_v48, %s7236_s20  ;;  %6470 = vmatpush3.msra.mxu0 %v1874_v21  ;;  %v375_v48 = vadd.s32 %v374_v45, %v372_v13 }
0x122e   :  { %6471 = vmatprep.subr.mxu0 %v7231_v0  ;;  %v1872_v23 = vpop.permute.xlu0 %1871 }
0x122f   :  { %2241 = vrot.lane.b32.xlu0 %v2087_v19, %s7236_s20  ;;  %6472 = vmatpush3.msra.mxu0 %v1872_v23  ;;  %v378_v19 = vadd.s32 %v377_v49, %v375_v48 }
0x1230   :  { %v1870_v51 = vpop.permute.xlu1 %1869  ;;  %6473 = vmatprep.subr.mxu0 %v7231_v0 }
0x1231   :  { %6474 = vmatpush3.msra.mxu0 %v1870_v51  ;;  %2105 = vrot.lane.b32.xlu1 %v7675_v38, %s7237_s21  ;;  %v381_v61 = vadd.s32 %v380_v60, %v378_v19 }
0x1232   :  { %6475 = vmatprep.subr.mxu0 %v7231_v0  ;;  %v1868_v53 = vpop.permute.xlu0 %1867 }
0x1233   :  { %6476 = vmatpush3.msra.mxu0 %v1868_v53  ;;  %2103 = vrot.lane.b32.xlu0 %v7683_v37, %s7237_s21  ;;  %vm5824_vm11 = vcmp.eq.s32.totalorder %v381_v61, 1  ;;  %vm5823_vm12 = vcmp.eq.s32.totalorder %v381_v61, 0  ;;  %vm5826_vm13 = vcmp.eq.s32.totalorder %v381_v61, 3  ;;  %vm5825_vm14 = vcmp.eq.s32.totalorder %v381_v61, 2 }
0x1234   :  { %v1866_v26 = vpop.permute.xlu1 %1865  ;;  %6477 = vmatprep.subr.mxu0 %v7231_v0  ;;  %v7832_v63 = vsel %vm5824_vm11, 0.0, %v7239_v17  ;;  %v7835_v5 = vsel %vm5823_vm12, 0.0, %v7239_v17  ;;  %v7839_v46 = vsel %vm5826_vm13, 0.0, %v7239_v17  ;;  %vm5828_vm1 = vcmp.eq.s32.totalorder %v381_v61, 5 }
0x1235   :  { %6478 = vmatpush3.msra.mxu0 %v1866_v26  ;;  %2101 = vrot.lane.b32.xlu1 %v7688_v42, %s7237_s21  ;;  %v7844_v53 = vsel %vm5825_vm14, 0.0, %v7239_v17  ;;  %vm5827_vm10 = vcmp.eq.s32.totalorder %v381_v61, 4  ;;  %vm5830_vm11 = vcmp.eq.s32.totalorder %v381_v61, 7  ;;  %vm5829_vm12 = vcmp.eq.s32.totalorder %v381_v61, 6 }
0x1236   :  { %6479 = vmatprep.subr.mxu0 %v7231_v0  ;;  %v1864_v56 = vpop.permute.xlu0 %1863  ;;  %vm5831_vm13 = vcmp.eq.s32.totalorder %v7397_v9, 0  ;;  %vm5834_vm14 = vcmp.eq.s32.totalorder %v7397_v9, 3 }
0x1237   :  { %6480 = vmatpush3.msra.mxu0 %v1864_v56  ;;  %2099 = vrot.lane.b32.xlu0 %v7694_v43, %s7237_s21 }
0x1238   :  { %v1862_v62 = vpop.permute.xlu1 %1861  ;;  %6481 = vmatprep.subr.mxu0 %v7231_v0 }
0x1239   :  { %6482 = vmatpush3.msra.mxu0 %v1862_v62  ;;  %v7849_v62 = vsel %vm5828_vm1, 0.0, %v7239_v17  ;;  %vm5833_vm1 = vcmp.eq.s32.totalorder %v7397_v9, 2 }
0x123a   :  { %6483 = vmatprep.subr.mxu0 %v7231_v0  ;;  %v1860_v7 = vpop.permute.xlu0 %1859 }
0x123b   :  { %6484 = vmatpush3.msra.mxu0 %v1860_v7 }
0x123c   :  { %6486 = vmatmul.mubr.msk.f32.vlgmr.msra.gmra.mxu0 %vm1088_vm9, %v1850_v6 }
0x123d   :  { %6526 = vmatprep.mubr.msk.f32.mxu0 %vm636_vm8, %v2213_v31  ;;  %v7853_v31 = vsel %vm5827_vm10, 0.0, %v7239_v17  ;;  %vm5836_vm10 = vcmp.eq.s32.totalorder %v7397_v9, 5 }
0x1293   :  { %v2256_v8 = vpop.permute.xlu1 %2255 }
0x1294   :  { %6510 = vmatprep.subr.msk.mxu0 %vm636_vm8, %v2256_v8 }
0x1295   :  { %6511 = vmatpush3.xpose.msk.msra.mxu0 %vm636_vm8, %v2256_v8  ;;  %v2254_v10 = vpop.permute.xlu0 %2253 }
0x1296   :  { %6512 = vmatprep.subr.msk.mxu0 %vm636_vm8, %v2254_v10 }
0x1297   :  { %v2252_v11 = vpop.permute.xlu1 %2251 }
0x1299   :  { %6513 = vmatpush3.xpose.msk.msra.mxu0 %vm636_vm8, %v2254_v10  ;;  %v2250_v12 = vpop.permute.xlu0 %2249 }
0x129a   :  { %6514 = vmatprep.subr.msk.mxu0 %vm636_vm8, %v2252_v11 }
0x129b   :  { %v2248_v41 = vpop.permute.xlu1 %2247 }
0x129d   :  { %6515 = vmatpush3.xpose.msk.msra.mxu0 %vm636_vm8, %v2252_v11  ;;  %v2246_v58 = vpop.permute.xlu0 %2245 }
0x129e   :  { %6516 = vmatprep.subr.msk.mxu0 %vm636_vm8, %v2250_v12 }
0x129f   :  { %v2244_v52 = vpop.permute.xlu1 %2243 }
0x12a1   :  { %6517 = vmatpush3.xpose.msk.msra.mxu0 %vm636_vm8, %v2250_v12  ;;  %v2242_v14 = vpop.permute.xlu0 %2241 }
0x12a2   :  { %6518 = vmatprep.subr.msk.mxu0 %vm636_vm8, %v2248_v41 }
0x12a3   :  { %v2106_v15 = vpop.permute.xlu1 %2105 }
0x12a4   :  { %6499 = vmatprep.subr.mxu1 %v2106_v15 }
0x12a5   :  { %6519 = vmatpush3.xpose.msk.msra.mxu0 %vm636_vm8, %v2248_v41  ;;  %6500 = vmatpush3.msra.mxu1 %v2106_v15  ;;  %v2104_v24 = vpop.permute.xlu0 %2103  ;;  %v7859_v41 = vsel %vm5830_vm11, 0.0, %v7239_v17  ;;  %vm5835_vm11 = vcmp.eq.s32.totalorder %v7397_v9, 4 }
0x12a6   :  { %6520 = vmatprep.subr.msk.mxu0 %vm636_vm8, %v2246_v58  ;;  %6501 = vmatprep.subr.mxu1 %v2104_v24 }
0x12a7   :  { %v2102_v25 = vpop.permute.xlu1 %2101  ;;  %6502 = vmatpush3.msra.mxu1 %v2104_v24 }
0x12a8   :  { %6503 = vmatprep.subr.mxu1 %v2102_v25 }
0x12a9   :  { %6521 = vmatpush3.xpose.msk.msra.mxu0 %vm636_vm8, %v2246_v58  ;;  %6504 = vmatpush3.msra.mxu1 %v2102_v25  ;;  %v2100_v27 = vpop.permute.xlu0 %2099 }
0x12aa   :  { %6522 = vmatprep.subr.msk.mxu0 %vm636_vm8, %v2244_v52  ;;  %6505 = vmatprep.subr.mxu1 %v2100_v27 }
0x12ab   :  { %6506 = vmatpush3.msra.mxu1 %v2100_v27 }
0x12ac   :  { %6508 = vmatmul.mubr.f32.vlgmr.msra.gmra.mxu1 %v7231_v0 }
0x12ad   :  { %6523 = vmatpush3.xpose.msk.msra.mxu0 %vm636_vm8, %v2244_v52 }
0x12ae   :  { %6524 = vmatprep.subr.msk.mxu0 %vm636_vm8, %v2242_v14 }
0x12b1   :  { %6525 = vmatpush3.xpose.msk.msra.mxu0 %vm636_vm8, %v2242_v14  ;;  %v7863_v14 = vsel %vm5829_vm12, 0.0, %v7239_v17  ;;  %vm5838_vm12 = vcmp.eq.s32.totalorder %v7397_v9, 7 }
0x12b2   :  { %6588 = vmatprep.subr.mxu0 %v7231_v0 }
0x12b4   :  { %6527 = vmatmul.mubr.msk.f32.vlgmr.msra.gmra.mxu0 %vm636_vm8, %v2214_v2 }
0x12b5   :  { %6529 = vmatprep.mubr.msk.f32.mxu0 %vm636_vm8, %v2215_v28 }
0x12b8   :  { %6530 = vmatmul.mubr.msk.f32.gmra.mxu0 %vm636_vm8, %v2216_v29 }
0x12b9   :  { %6532 = vmatprep.mubr.msk.f32.mxu0 %vm636_vm8, %v2217_v1 }
0x12bc   :  { %6533 = vmatmul.mubr.msk.f32.gmra.mxu0 %vm636_vm8, %v2218_v50 }
0x12bd   :  { %6535 = vmatprep.mubr.msk.f32.mxu0 %vm636_vm8, %v2219_v20 }
0x12c0   :  { %6536 = vmatmul.mubr.msk.f32.gmra.mxu0 %vm636_vm8, %v2220_v59 }
0x12c1   :  { %6596 = vmatprep.mubr.msk.f32.mxu0 %vm7232_vm0, %v7231_v0 }
0x12fc   :  { %v7815_v30 = vpop.f32.mrf.mxu0 }
0x12fe   :  { %v6487_v3 = vpop.f32.mrf.mxu0 }
0x136c   :  { %v6509_v59 = vpop.f32.mrf.mxu1 }
0x136e   :  { %v2184_v32 = vpop.f32.mrf.mxu1 }
0x1374   :  { %v6528_v4 = vpop.f32.mrf.mxu0 }
0x1375   :  { %v2369_v16 = vadd.f32 %v6528_v4, %v7832_v63 }
0x1376   :  { %v2363_v21 = vpop.f32.mrf.mxu0 }
0x1377   :  { %v2364_v47 = vadd.f32 %v2363_v21, %v7835_v5  ;;  %v2405_v23 = vsel %vm1088_vm9, %v2369_v16, -inf }
0x1378   :  { %2406 = vmax.xlane.f32.xlu0 %v2405_v23  ;;  %v6531_v51 = vpop.f32.mrf.mxu0 }
0x1379   :  { %v2379_v26 = vadd.f32 %v6531_v51, %v7839_v46  ;;  %v2402_v55 = vsel %vm1088_vm9, %v2364_v47, -inf }
0x137a   :  { %v2373_v56 = vpop.f32.mrf.mxu0  ;;  %2403 = vmax.xlane.f32.xlu1 %v2402_v55 }
0x137b   :  { %v2374_v6 = vadd.f32 %v2373_v56, %v7844_v53  ;;  %v2411_v11 = vsel %vm1088_vm9, %v2379_v26, -inf }
0x137c   :  { %v6534_v7 = vpop.f32.mrf.mxu0 }
0x137d   :  { %v2389_v8 = vadd.f32 %v6534_v7, %v7849_v62  ;;  %v2408_v10 = vsel %vm1088_vm9, %v2374_v6, -inf }
0x137e   :  { %v2383_v12 = vpop.f32.mrf.mxu0  ;;  %2409 = vmax.xlane.f32.xlu0 %v2408_v10  ;;  %2412 = vmax.xlane.f32.xlu1 %v2411_v11 }
0x137f   :  { %v2384_v58 = vadd.f32 %v2383_v12, %v7853_v31  ;;  %v2417_v25 = vsel %vm1088_vm9, %v2389_v8, -inf }
0x1380   :  { %v6537_v52 = vpop.f32.mrf.mxu0 }
0x1381   :  { %v2399_v15 = vadd.f32 %v6537_v52, %v7859_v41  ;;  %v2414_v24 = vsel %vm1088_vm9, %v2384_v58, -inf }
0x1382   :  { %v2393_v27 = vpop.f32.mrf.mxu0  ;;  %2415 = vmax.xlane.f32.xlu0 %v2414_v24  ;;  %2418 = vmax.xlane.f32.xlu1 %v2417_v25 }
0x1383   :  { %v2394_v2 = vadd.f32 %v2393_v27, %v7863_v14  ;;  %v2423_v29 = vsel %vm1088_vm9, %v2399_v15, -inf }
0x1385   :  { %v2420_v28 = vsel %vm1088_vm9, %v2394_v2, -inf }
0x1386   :  { %2421 = vmax.xlane.f32.xlu0 %v2420_v28  ;;  %2424 = vmax.xlane.f32.xlu1 %v2423_v29 }
0x139c   :  { %2112 = vrot.lane.b32.xlu0 %v7703_v22, %s7237_s21 }
0x1401   :  { %v2407_v1 = vpop.xlane.xlu0 %2406 }
0x1402   :  { %v2427_v44 = vsub.f32 %v2369_v16, %v2407_v1 }
0x1403   :  { %v2404_v34 = vpop.xlane.xlu1 %2403 }
0x1404   :  { %v2436_v45 = vmul.f32 1.442695, %v2427_v44  ;;  %v2426_v48 = vsub.f32 %v2364_v47, %v2404_v34 }
0x1406   :  { %6935 = vpow2.f32 %v2436_v45  ;;  %v2434_v60 = vmul.f32 1.442695, %v2426_v48 }
0x1407   :  { %v2410_v50 = vpop.xlane.xlu0 %2409  ;;  %v2413_v49 = vpop.xlane.xlu1 %2412 }
0x1408   :  { %v2429_v61 = vsub.f32 %v2379_v26, %v2413_v49  ;;  %v2428_v4 = vsub.f32 %v2374_v6, %v2410_v50 }
0x140a   :  { %v2440_v21 = vmul.f32 1.442695, %v2429_v61  ;;  %v2438_v51 = vmul.f32 1.442695, %v2428_v4 }
0x140b   :  { %v2416_v20 = vpop.xlane.xlu0 %2415  ;;  %v2419_v23 = vpop.xlane.xlu1 %2418 }
0x140c   :  { %v2431_v55 = vsub.f32 %v2389_v8, %v2419_v23  ;;  %v2430_v56 = vsub.f32 %v2384_v58, %v2416_v20 }
0x140e   :  { %v2444_v7 = vmul.f32 1.442695, %v2431_v55  ;;  %v2442_v11 = vmul.f32 1.442695, %v2430_v56 }
0x140f   :  { %v2422_v3 = vpop.xlane.xlu0 %2421  ;;  %v2425_v10 = vpop.xlane.xlu1 %2424 }
0x1410   :  { %v2432_v13 = vsub.f32 %v2394_v2, %v2422_v3  ;;  %v2433_v12 = vsub.f32 %v2399_v15, %v2425_v10 }
0x1412   :  { %v2446_v19 = vmul.f32 1.442695, %v2432_v13  ;;  %v2448_v8 = vmul.f32 1.442695, %v2433_v12 }
0x1413   :  { %v2113_v39 = vpop.permute.xlu0 %2112  ;;  %v7885_v16 = vpop.eup %6935 }
0x1414   :  { %v7873_v40 = vadd.f32 %v2184_v32, %v2113_v39  ;;  %v7875_v33 = vadd.f32 %v6509_v59, %v2113_v39  ;;  %6937 = vpow2.f32 %v2446_v19  ;;  %v2453_v26 = vsel %vm1088_vm9, %v7885_v16, 0.0 }
0x1415   :  { %6939 = vpow2.f32 %v2434_v60 }
0x1416   :  { %2235 = vrot.lane.b32.xlu0 %v7873_v40, %s7235_s19  ;;  %2237 = vrot.lane.b32.xlu1 %v7875_v33, %s7235_s19  ;;  %6941 = vpow2.f32 %v2440_v21 }
0x1417   :  { %6943 = vpow2.f32 %v2438_v51 }
0x1418   :  { %6945 = vpow2.f32 %v2444_v7 }
0x1419   :  { %6947 = vpow2.f32 %v2442_v11 }
0x141a   :  { %2231 = vrot.lane.b32.xlu0 %v7875_v33, %s7233_s0  ;;  %6949 = vpow2.f32 %v2448_v8 }
0x141e   :  { %2225 = vrot.lane.b32.xlu0 %v7875_v33, %s7234_s3 }
0x1421   :  { %v7887_v47 = vpop.eup %6937 }
0x1422   :  { %v6940_v6 = vpop.eup %6939  ;;  %v2468_v52 = vsel %vm1088_vm9, %v7887_v47, 0.0 }
0x1423   :  { %v2450_v58 = vsel %vm1088_vm9, %v6940_v6, 0.0  ;;  %v7894_v24 = vpop.eup %6941 }
0x1424   :  { %v2459_v15 = vsel %vm1088_vm9, %v7894_v24, 0.0  ;;  %v7898_v25 = vpop.eup %6943 }
0x1425   :  { %v2456_v27 = vsel %vm1088_vm9, %v7898_v25, 0.0  ;;  %v7902_v2 = vpop.eup %6945 }
0x1426   :  { %v2465_v28 = vsel %vm1088_vm9, %v7902_v2, 0.0  ;;  %v7906_v29 = vpop.eup %6947 }
0x1427   :  { %v2462_v1 = vsel %vm1088_vm9, %v7906_v29, 0.0  ;;  %v7910_v50 = vpop.eup %6949 }
0x1428   :  { %v2471_v20 = vsel %vm1088_vm9, %v7910_v50, 0.0 }
0x143a   :  { %2454 = vadd.xlane.f32.xlu1 %v2453_v26 }
0x143d   :  { %2469 = vadd.xlane.f32.xlu0 %v2468_v52 }
0x143e   :  { %2451 = vadd.xlane.f32.xlu1 %v2450_v58 }
0x1442   :  { %2460 = vadd.xlane.f32.xlu1 %v2459_v15 }
0x1446   :  { %2457 = vadd.xlane.f32.xlu1 %v2456_v27 }
0x144a   :  { %2466 = vadd.xlane.f32.xlu1 %v2465_v28 }
0x144e   :  { %2463 = vadd.xlane.f32.xlu1 %v2462_v1 }
0x1452   :  { %2472 = vadd.xlane.f32.xlu1 %v2471_v20 }
0x1453   :  { %2223 = vrot.lane.b32.xlu0 %v7873_v40, %s7234_s3 }
0x1457   :  { %2655 = vrot.lane.b32.xlu0 %v7675_v38, %s7240_s22 }
0x145b   :  { %2653 = vrot.lane.b32.xlu0 %v7683_v37, %s7240_s22 }
0x1463   :  { %2229 = vrot.lane.b32.xlu1 %v7873_v40, %s7233_s0 }
0x1467   :  { %2651 = vrot.lane.b32.xlu1 %v7688_v42, %s7240_s22 }
0x1488   :  { %v2236_v59 = vpop.permute.xlu0 %2235  ;;  %v2238_v3 = vpop.permute.xlu1 %2237 }
0x1489   :  { %6538 = vmatprep.subr.mxu1 %v2238_v3 }
0x148a   :  { %6539 = vmatpush3.msra.mxu1 %v2238_v3 }
0x148b   :  { %6540 = vmatprep.subr.mxu1 %v2236_v59 }
0x148c   :  { %v2232_v32 = vpop.permute.xlu0 %2231  ;;  %6541 = vmatpush3.msra.mxu1 %v2236_v59 }
0x148d   :  { %6542 = vmatprep.subr.mxu1 %v2232_v32 }
0x148e   :  { %6543 = vmatpush3.msra.mxu1 %v2232_v32 }
0x1490   :  { %v2226_v42 = vpop.permute.xlu0 %2225 }
0x14c3   :  { %v2455_v39 = vpop.xlane.xlu1 %2454 }
0x14c6   :  { %v2470_v19 = vpop.xlane.xlu0 %2469 }
0x14c7   :  { %v2452_v38 = vpop.xlane.xlu1 %2451 }
0x14c8   :  { %6951 = vrcp.f32 %v2452_v38 }
0x14c9   :  { %6953 = vrcp.f32 %v2455_v39 }
0x14ca   :  { %v2224_v61 = vpop.permute.xlu0 %2223 }
0x14cb   :  { %v2461_v34 = vpop.xlane.xlu1 %2460 }
0x14cf   :  { %v2458_v37 = vpop.xlane.xlu1 %2457 }
0x14d0   :  { %6955 = vrcp.f32 %v2458_v37 }
0x14d1   :  { %6957 = vrcp.f32 %v2461_v34 }
0x14d3   :  { %v2467_v44 = vpop.xlane.xlu1 %2466 }
0x14d5   :  { %v6952_v13 = vpop.eup %6951 }
0x14d6   :  { %v2475_v45 = vmul.f32 %v6952_v13, %v6940_v6  ;;  %v6954_v4 = vpop.eup %6953  ;;  %v2656_v6 = vpop.permute.xlu0 %2655 }
0x14d7   :  { %v2464_v48 = vpop.xlane.xlu1 %2463  ;;  %v2477_v23 = vmul.f32 %v6954_v4, %v7885_v16  ;;  %v7969_v4 = vld [vmem:[#allocation8 + $0x78] sm:$0xff] }
0x14d8   :  { %6554 = vmatprep.mubr.msk.f32.mxu1 %vm1088_vm9, %v2475_v45  ;;  %6959 = vrcp.f32 %v2464_v48 }
0x14d9   :  { %6961 = vrcp.f32 %v2467_v44 }
0x14da   :  { %6963 = vrcp.f32 %v2470_v19  ;;  %v2654_v52 = vpop.permute.xlu0 %2653 }
0x14db   :  { %v2473_v49 = vpop.xlane.xlu1 %2472 }
0x14dc   :  { %6965 = vrcp.f32 %v2473_v49 }
0x14dd   :  { %v6956_v21 = vpop.eup %6955 }
0x14de   :  { %v6958_v51 = vpop.eup %6957  ;;  %v2479_v55 = vmul.f32 %v6956_v21, %v7898_v25 }
0x14df   :  { %v2230_v60 = vpop.permute.xlu1 %2229  ;;  %v2481_v7 = vmul.f32 %v6958_v51, %v7894_v24 }
0x14e0   :  { %6544 = vmatprep.subr.mxu1 %v2230_v60 }
0x14e1   :  { %6545 = vmatpush3.msra.mxu1 %v2230_v60 }
0x14e2   :  { %6546 = vmatprep.subr.mxu1 %v2226_v42 }
0x14e3   :  { %6547 = vmatpush3.msra.mxu1 %v2226_v42  ;;  %v2652_v8 = vpop.permute.xlu1 %2651 }
0x14e4   :  { %6548 = vmatprep.subr.mxu1 %v2224_v61 }
0x14e5   :  { %6549 = vmatpush3.msra.mxu1 %v2224_v61  ;;  %v6960_v56 = vpop.eup %6959 }
0x14e6   :  { %6550 = vmatprep.subr.mxu1 %v7875_v33  ;;  %v6962_v10 = vpop.eup %6961  ;;  %v2483_v11 = vmul.f32 %v6960_v56, %v7906_v29  ;;  %v7982_v56 = vld [vmem:[#allocation8 + $0x68] sm:$0xff] }
0x14e7   :  { %6551 = vmatpush3.msra.mxu1 %v7875_v33  ;;  %v6964_v33 = vpop.eup %6963  ;;  %v2485_v16 = vmul.f32 %v6962_v10, %v7902_v2 }
0x14e8   :  { %6552 = vmatprep.subr.mxu1 %v7873_v40  ;;  %v2487_v12 = vmul.f32 %v6964_v33, %v7887_v47 }
0x14e9   :  { %6553 = vmatpush3.msra.mxu1 %v7873_v40  ;;  %v6966_v40 = vpop.eup %6965 }
0x14ea   :  { %6555 = vmatmul.mubr.msk.f32.vlgmr.msra.gmra.mxu1 %vm1088_vm9, %v2477_v23  ;;  %v2489_v26 = vmul.f32 %v6966_v40, %v7910_v50  ;;  %6566 = vmatprep.subr.mxu1 %v2656_v6 }
0x14eb   :  { %6557 = vmatprep.mubr.msk.f32.mxu1 %vm1088_vm9, %v2479_v55  ;;  %6567 = vmatpush3.msra.mxu1 %v2656_v6  ;;  %v7978_v55 = vld [vmem:[#allocation8 + $0x150] ss:$0 sm:$0xff] }
0x14ec   :  { %6568 = vmatprep.subr.mxu1 %v2654_v52 }
0x14ed   :  { %6569 = vmatpush3.msra.mxu1 %v2654_v52 }
0x14ee   :  { %6558 = vmatmul.mubr.msk.f32.gmra.mxu1 %vm1088_vm9, %v2481_v7  ;;  %6570 = vmatprep.subr.mxu1 %v2652_v8 }
0x14ef   :  { %6560 = vmatprep.mubr.msk.f32.mxu1 %vm1088_vm9, %v2483_v11  ;;  %6571 = vmatpush3.msra.mxu1 %v2652_v8 }
0x14f2   :  { %6561 = vmatmul.mubr.msk.f32.gmra.mxu1 %vm1088_vm9, %v2485_v16 }
0x14f3   :  { %6563 = vmatprep.mubr.msk.f32.mxu1 %vm1088_vm9, %v2487_v12 }
0x14f6   :  { %6564 = vmatmul.mubr.msk.f32.gmra.mxu1 %vm1088_vm9, %v2489_v26 }
0x15aa   :  { %v6556_v58 = vpop.f32.mrf.mxu1 }
0x15ac   :  { %v2580_v24 = vpop.f32.mrf.mxu1 }
0x15ae   :  { %v6559_v47 = vpop.f32.mrf.mxu1 }
0x15af   :  { %2623 = vrot.lane.b32.xlu0 %v6559_v47, %s7230_s14 }
0x15b0   :  { %v2590_v15 = vpop.f32.mrf.mxu1 }
0x15b2   :  { %v6562_v25 = vpop.f32.mrf.mxu1 }
0x15b3   :  { %2621 = vrot.lane.b32.xlu0 %v2590_v15, %s7230_s14 }
0x15b4   :  { %v2600_v27 = vpop.f32.mrf.mxu1 }
0x15b5   :  { %2629 = vrot.lane.b32.xlu1 %v2600_v27, %s7242_s24  ;;  %v7990_v27 = vld [vmem:[#allocation8 + $0x70] sm:$0xff] }
0x15b6   :  { %v6565_v2 = vpop.f32.mrf.mxu1 }
0x15b7   :  { %2631 = vrot.lane.b32.xlu0 %v6562_v25, %s7242_s24 }
0x15b8   :  { %v2610_v28 = vpop.f32.mrf.mxu1 }
0x15b9   :  { %2637 = vrot.lane.b32.xlu1 %v2610_v28, %s7241_s23  ;;  %v8000_v28 = vld [vmem:[#allocation8 + $0x60] sm:$0xff] }
0x15bb   :  { %2649 = vrot.lane.b32.xlu0 %v7694_v43, %s7240_s22 }
0x15bd   :  { %2639 = vrot.lane.b32.xlu1 %v6565_v2, %s7241_s23  ;;  %v7995_v2 = vld [vmem:[#allocation8 + $0x148] ss:$0 sm:$0xff] }
0x15bf   :  { %1884 = vrot.lane.b32.xlu0 %v7766_v54, %s7237_s21 }
0x1621   :  { %v2624_v29 = vpop.permute.xlu0 %2623 }
0x1622   :  { %v2644_v43 = vsel %vm636_vm8, %v6556_v58, %v2624_v29 }
0x1625   :  { %v2622_v1 = vpop.permute.xlu0 %2621 }
0x1626   :  { %v2643_v20 = vsel %vm636_vm8, %v2580_v24, %v2622_v1 }
0x1627   :  { %v2630_v50 = vpop.permute.xlu1 %2629 }
0x1628   :  { %v2645_v3 = vsel %vm875_vm3, %v2643_v20, %v2630_v50 }
0x1629   :  { %v2632_v59 = vpop.permute.xlu0 %2631 }
0x162a   :  { %v2646_v34 = vsel %vm875_vm3, %v2644_v43, %v2632_v59 }
0x162b   :  { %v2638_v32 = vpop.permute.xlu1 %2637 }
0x162c   :  { %v2647_v39 = vsel %vm732_vm15, %v2645_v3, %v2638_v32 }
0x162d   :  { %v2650_v38 = vpop.permute.xlu0 %2649  ;;  %6574 = vmatprep.mubr.msk.f32.mxu1 %vm424_vm6, %v2647_v39 }
0x162e   :  { %6572 = vmatprep.subr.mxu1 %v2650_v38 }
0x162f   :  { %6573 = vmatpush3.msra.mxu1 %v2650_v38  ;;  %v2640_v54 = vpop.permute.xlu1 %2639 }
0x1630   :  { %v2648_v37 = vsel %vm732_vm15, %v2646_v34, %v2640_v54  ;;  %6577 = vmatprep.subr.mxu1 %v7969_v4 }
0x1631   :  { %v1885_v44 = vpop.permute.xlu0 %1884  ;;  %6575 = vmatmul.mubr.msk.f32.vlgmr.msra.gmra.mxu1 %vm424_vm6, %v2648_v37 }
0x1632   :  { %v1957_v13 = vadd.f32 %v7815_v30, %v1885_v44  ;;  %6578 = vmatpush3.msra.mxu1 %v7969_v4 }
0x1633   :  { %6579 = vmatprep.subr.mxu1 %v7990_v27 }
0x1634   :  { %v1960_v45 = vadd.f32 %v1957_v13, %v7679_v35  ;;  %6580 = vmatpush3.msra.mxu1 %v7990_v27 }
0x1635   :  { %6581 = vmatprep.subr.mxu1 %v7982_v56 }
0x1636   :  { %v1961_v48 = vsel %vm968_vm5, %v1960_v45, 0.0  ;;  %6582 = vmatpush3.msra.mxu1 %v7982_v56 }
0x1637   :  { %1962 = vadd.xlane.f32.xlu1 %v1961_v48  ;;  %6583 = vmatprep.subr.mxu1 %v8000_v28 }
0x1638   :  { %6584 = vmatpush3.msra.mxu1 %v8000_v28 }
0x1639   :  { %6599 = vmatprep.subr.mxu1 %v7231_v0 }
0x1648   :  { %1978 = vrot.lane.b32.xlu1 %v7670_v57, %s7240_s22 }
0x164c   :  { %2661 = vrot.lane.b32.xlu1 %v7703_v22, %s7240_s22 }
0x16c0   :  { %v1963_v42 = vpop.xlane.xlu1 %1962 }
0x16c1   :  { %v1964_v49 = vmul.f32 0.03125, %v1963_v42 }
0x16c3   :  { %v1965_v19 = vsub.f32 %v1960_v45, %v1964_v49 }
0x16c4   :  { %v1979_v35 = vpop.permute.xlu1 %1978 }
0x16c5   :  { %v1966_v60 = vmul.f32 %v1965_v19, %v1965_v19 }
0x16c7   :  { %v1967_v61 = vsel %vm968_vm5, %v1966_v60, 0.0 }
0x16c8   :  { %1968 = vadd.xlane.f32.xlu0 %v1967_v61  ;;  %v2662_v21 = vpop.permute.xlu1 %2661  ;;  %v8017_v61 = vld [vmem:[#allocation8 + $0x143] ss:$0 sm:$0xff] }
0x16de   :  { %1974 = vrot.lane.b32.xlu0 %v7670_v57, %s7237_s21 }
0x16f1   :  { %v6576_v30 = vpop.f32.mrf.mxu1 }
0x16f2   :  { %v2742_v26 = vadd.f32 %v6576_v30, %v2662_v21 }
0x16f3   :  { %v2736_v22 = vpop.f32.mrf.mxu1 }
0x16f4   :  { %v2737_v23 = vadd.f32 %v2736_v22, %v2662_v21  ;;  %v2751_v52 = vsel %vm424_vm6, %v2742_v26, 0.0 }
0x16f6   :  { %v2748_v51 = vsel %vm424_vm6, %v2737_v23, 0.0 }
0x16f7   :  { %2749 = vadd.xlane.f32.xlu1 %v2748_v51 }
0x1708   :  { %2888 = vrot.lane.b32.xlu1 %v7969_v4, %s7236_s20 }
0x170c   :  { %2002 = vrot.lane.b32.xlu1 %v7978_v55, %s7236_s20 }
0x1710   :  { %2884 = vrot.lane.b32.xlu1 %v7982_v56, %s7236_s20 }
0x1751   :  { %v1969_v57 = vpop.xlane.xlu0 %1968 }
0x1752   :  { %v1970_v7 = vmul.f32 0.03125, %v1969_v57 }
0x1754   :  { %v1971_v10 = vadd.f32 1e-05, %v1970_v7 }
0x1755   :  { %v1975_v33 = vpop.permute.xlu0 %1974 }
0x1756   :  { %6967 = vrsqrt.f32 %v1971_v10 }
0x1763   :  { %v6968_v11 = vpop.eup %6967 }
0x1764   :  { %v1973_v16 = vmul.f32 %v6968_v11, %v1965_v19 }
0x1766   :  { %v1977_v40 = vmul.f32 %v1975_v33, %v1973_v16 }
0x1768   :  { %v1981_v12 = vadd.f32 %v1979_v35, %v1977_v40 }
0x176a   :  { %v1983_v6 = vsel %vm968_vm5, %v1981_v12, 0.0 }
0x176b   :  { %1984 = vadd.xlane.f32.xlu0 %v1983_v6 }
0x176f   :  { %2752 = vadd.xlane.f32.xlu0 %v2751_v52 }
0x1780   :  { %v2750_v8 = vpop.xlane.xlu1 %2749 }
0x1781   :  { %v2754_v58 = vmul.f32 0.03125, %v2750_v8 }
0x1783   :  { %v2756_v24 = vsub.f32 %v2737_v23, %v2754_v58 }
0x1784   :  { %v2889_v47 = vpop.permute.xlu1 %2888 }
0x1785   :  { %v2758_v15 = vmul.f32 %v2756_v24, %v2756_v24  ;;  %6589 = vmatpush3.msra.mxu0 %v2889_v47 }
0x1786   :  { %6590 = vmatprep.subr.mxu0 %v7231_v0 }
0x1787   :  { %v2760_v25 = vsel %vm424_vm6, %v2758_v15, 0.0 }
0x1788   :  { %2761 = vadd.xlane.f32.xlu1 %v2760_v25  ;;  %v2003_v3 = vpop.permute.xlu1 %2002 }
0x178c   :  { %v2885_v32 = vpop.permute.xlu1 %2884 }
0x1799   :  { %2781 = vrot.lane.b32.xlu1 %v7995_v2, %s7236_s20 }
0x17f4   :  { %v1985_v29 = vpop.xlane.xlu0 %1984 }
0x17f5   :  { %v1986_v1 = vmul.f32 0.03125, %v1985_v29 }
0x17f7   :  { %v1987_v50 = vsub.f32 %v1981_v12, %v1986_v1 }
0x17f8   :  { %v2753_v34 = vpop.xlane.xlu0 %2752 }
0x17f9   :  { %v1988_v20 = vmul.f32 %v1987_v50, %v1987_v50  ;;  %v2755_v37 = vmul.f32 0.03125, %v2753_v34 }
0x17fb   :  { %v1989_v59 = vsel %vm968_vm5, %v1988_v20, 0.0  ;;  %v2757_v48 = vsub.f32 %v2742_v26, %v2755_v37  ;;  %vm5832_vm5 = vcmp.eq.s32.totalorder %v7397_v9, 1 }
0x17fc   :  { %1990 = vadd.xlane.f32.xlu0 %v1989_v59 }
0x17fd   :  { %v2759_v19 = vmul.f32 %v2757_v48, %v2757_v48 }
0x17ff   :  { %v2763_v60 = vsel %vm424_vm6, %v2759_v19, 0.0 }
0x1811   :  { %v2762_v39 = vpop.xlane.xlu1 %2761 }
0x1812   :  { %v2766_v38 = vmul.f32 0.03125, %v2762_v39  ;;  %2886 = vrot.lane.b32.xlu0 %v7990_v27, %s7236_s20 }
0x1814   :  { %v2768_v43 = vadd.f32 1e-05, %v2766_v38 }
0x1815   :  { %v2782_v13 = vpop.permute.xlu1 %2781 }
0x1816   :  { %6969 = vrsqrt.f32 %v2768_v43 }
0x1823   :  { %v6970_v54 = vpop.eup %6969 }
0x1824   :  { %v2772_v44 = vmul.f32 %v6970_v54, %v2756_v24 }
0x1826   :  { %v2778_v45 = vmul.f32 %v7995_v2, %v2772_v44 }
0x1828   :  { %v8009_v42 = vadd.f32 %v2782_v13, %v2778_v45 }
0x182a   :  { %v2786_v49 = vadd.f32 %v8009_v42, %v7681_v36 }
0x182c   :  { %6585 = vmatprep.mubr.msk.f32.mxu1 %vm424_vm6, %v2786_v49 }
0x1831   :  { %2764 = vadd.xlane.f32.xlu0 %v2763_v60 }
0x1847   :  { %2882 = vrot.lane.b32.xlu0 %v8000_v28, %s7236_s20 }
0x184b   :  { %2895 = vrot.lane.b32.xlu0 %v8017_v61, %s7236_s20 }
0x1885   :  { %v1991_v35 = vpop.xlane.xlu0 %1990 }
0x1886   :  { %v1992_v21 = vmul.f32 0.03125, %v1991_v35 }
0x1888   :  { %v1993_v22 = vadd.f32 1e-05, %v1992_v21 }
0x1889   :  { %v2887_v30 = vpop.permute.xlu0 %2886 }
0x188a   :  { %6591 = vmatpush3.msra.mxu0 %v2887_v30  ;;  %6971 = vrsqrt.f32 %v1993_v22 }
0x188b   :  { %6592 = vmatprep.subr.mxu0 %v7231_v0 }
0x188c   :  { %6593 = vmatpush3.msra.mxu0 %v2885_v32 }
0x188d   :  { %6594 = vmatprep.subr.mxu0 %v7231_v0 }
0x1897   :  { %v6972_v23 = vpop.eup %6971 }
0x1898   :  { %v1995_v51 = vmul.f32 %v6972_v23, %v1987_v50 }
0x189a   :  { %v2000_v57 = vmul.f32 %v7978_v55, %v1995_v51 }
0x189c   :  { %v8024_v7 = vadd.f32 %v2003_v3, %v2000_v57 }
0x189e   :  { %v8028_v40 = vadd.f32 %v8024_v7, %v7322_v18 }
0x18ba   :  { %v2765_v10 = vpop.xlane.xlu0 %2764 }
0x18bb   :  { %v2767_v11 = vmul.f32 0.03125, %v2765_v10  ;;  %v8084_v10 = vsel %vm5832_vm5, 0.0, %v7239_v17  ;;  %vm5837_vm5 = vcmp.eq.s32.totalorder %v7397_v9, 6 }
0x18bd   :  { %v2769_v33 = vadd.f32 1e-05, %v2767_v11 }
0x18be   :  { %v2883_v16 = vpop.permute.xlu0 %2882 }
0x18bf   :  { %6973 = vrsqrt.f32 %v2769_v33  ;;  %6595 = vmatpush3.msra.mxu0 %v2883_v16  ;;  %v8087_v33 = vsel %vm5831_vm13, 0.0, %v7239_v17 }
0x18c0   :  { %6597 = vmatmul.mubr.msk.f32.vlgmr.msra.gmra.mxu0 %vm424_vm6, %v8028_v40 }
0x18c2   :  { %v2896_v18 = vpop.permute.xlu0 %2895 }
0x18cc   :  { %v6974_v12 = vpop.eup %6973 }
0x18cd   :  { %v2773_v26 = vmul.f32 %v6974_v12, %v2757_v48 }
0x18cf   :  { %v2779_v6 = vmul.f32 %v7995_v2, %v2773_v26 }
0x18d1   :  { %v8033_v55 = vadd.f32 %v2782_v13, %v2779_v6 }
0x18d3   :  { %v2787_v52 = vadd.f32 %v8033_v55, %v7681_v36 }
0x18d5   :  { %6586 = vmatmul.mubr.msk.f32.vlgmr.msra.gmra.mxu1 %vm424_vm6, %v2787_v52 }
0x18d6   :  { %6607 = vmatprep.mubr.msk.f32.mxu1 %vm7232_vm0, %v7231_v0 }
0x1980   :  { %v2967_v8 = vpop.f32.mrf.mxu0 }
0x1981   :  { %v2968_v58 = vadd.f32 %v2967_v8, %v2896_v18  ;;  %v8099_v18 = vsel %vm5834_vm14, 0.0, %v7239_v17 }
0x1982   :  { %v6598_v24 = vpop.f32.mrf.mxu0 }
0x1983   :  { %v3096_v47 = vrot.slane %v2968_v58, 6  ;;  %v3092_v15 = vrot.slane %v2968_v58, 4  ;;  %v3088_v25 = vrot.slane %v2968_v58, 2 }
0x1985   :  { %3097 = vrot.lane.b32.xlu0 %v3096_v47, %s7235_s19  ;;  %3093 = vrot.lane.b32.xlu1 %v3092_v15, %s7233_s0 }
0x1989   :  { %3089 = vrot.lane.b32.xlu1 %v3088_v25, %s7234_s3 }
0x1995   :  { %v6587_v29 = vpop.f32.mrf.mxu1 }
0x1996   :  { %v2875_v36 = vadd.f32 %v6587_v29, %v8017_v61  ;;  %v8110_v29 = vsel %vm5836_vm10, 0.0, %v7239_v17 }
0x1997   :  { %v2869_v1 = vpop.f32.mrf.mxu1 }
0x1998   :  { %v2870_v50 = vadd.f32 %v8017_v61, %v2869_v1  ;;  %3063 = vrot.lane.b32.xlu1 %v2875_v36, %s7234_s3  ;;  %v3080_v34 = vmul.f32 0.35355338, %v2875_v36  ;;  %v8113_v1 = vsel %vm5835_vm11, 0.0, %v7239_v17 }
0x199a   :  { %3061 = vrot.lane.b32.xlu0 %v2870_v50, %s7234_s3  ;;  %v3079_v20 = vmul.f32 0.35355338, %v2870_v50 }
0x199c   :  { %3069 = vrot.lane.b32.xlu1 %v2875_v36, %s7233_s0  ;;  %6616 = vmatprep.mubr.msk.f32.mxu0 %vm636_vm8, %v3079_v20 }
0x199e   :  { %3067 = vrot.lane.b32.xlu0 %v2870_v50, %s7233_s0 }
0x19a0   :  { %3075 = vrot.lane.b32.xlu1 %v2875_v36, %s7235_s19 }
0x19a2   :  { %3073 = vrot.lane.b32.xlu0 %v2870_v50, %s7235_s19 }
0x19a4   :  { %2975 = vrot.lane.b32.xlu1 %v7990_v27, %s7237_s21 }
0x19a6   :  { %2977 = vrot.lane.b32.xlu0 %v7969_v4, %s7237_s21 }
0x19a8   :  { %2971 = vrot.lane.b32.xlu1 %v8000_v28, %s7237_s21 }
0x19aa   :  { %2973 = vrot.lane.b32.xlu0 %v7982_v56, %s7237_s21 }
0x19f7   :  { %v3098_v59 = vpop.permute.xlu0 %3097  ;;  %v3094_v3 = vpop.permute.xlu1 %3093 }
0x19f8   :  { %v3102_v32 = vsel %vm93_vm2, %v3094_v3, %v3098_v59 }
0x19f9   :  { %6610 = vmatprep.subr.msk.mxu0 %vm636_vm8, %v3102_v32 }
0x19fa   :  { %6611 = vmatpush3.xpose.msk.msra.mxu0 %vm636_vm8, %v3102_v32  ;;  %v8121_v32 = vsel %vm5838_vm12, 0.0, %v7239_v17 }
0x19fb   :  { %v3090_v39 = vpop.permute.xlu1 %3089 }
0x19fc   :  { %v3101_v38 = vsel %vm97_vm4, %v3090_v39, %v3094_v3  ;;  %v3100_v43 = vsel %vm604_vm7, %v2968_v58, %v3090_v39  ;;  %v8102_v58 = vsel %vm5833_vm1, 0.0, %v7239_v17 }
0x19fd   :  { %6612 = vmatprep.subr.msk.mxu0 %vm636_vm8, %v3101_v38 }
0x19fe   :  { %6613 = vmatpush3.xpose.msk.msra.mxu0 %vm636_vm8, %v3101_v38  ;;  %v8124_v38 = vsel %vm5837_vm5, 0.0, %v7239_v17 }
0x19ff   :  { %6614 = vmatprep.subr.msk.mxu0 %vm636_vm8, %v3100_v43 }
0x1a02   :  { %6615 = vmatpush3.xpose.msk.msra.mxu0 %vm636_vm8, %v3100_v43 }
0x1a05   :  { %6617 = vmatmul.mubr.msk.f32.vlgmr.msra.gmra.mxu0 %vm636_vm8, %v3080_v34 }
0x1a0a   :  { %v3064_v54 = vpop.permute.xlu1 %3063 }
0x1a0b   :  { %v3082_v13 = vmul.f32 0.35355338, %v3064_v54 }
0x1a0c   :  { %v3062_v37 = vpop.permute.xlu0 %3061 }
0x1a0d   :  { %v3081_v44 = vmul.f32 0.35355338, %v3062_v37 }
0x1a0e   :  { %v3070_v45 = vpop.permute.xlu1 %3069 }
0x1a0f   :  { %6619 = vmatprep.mubr.msk.f32.mxu0 %vm636_vm8, %v3081_v44  ;;  %v3084_v19 = vmul.f32 0.35355338, %v3070_v45 }
0x1a10   :  { %v3068_v48 = vpop.permute.xlu0 %3067  ;;  %6620 = vmatmul.mubr.msk.f32.gmra.mxu0 %vm636_vm8, %v3082_v13 }
0x1a11   :  { %v3083_v49 = vmul.f32 0.35355338, %v3068_v48 }
0x1a12   :  { %v3076_v60 = vpop.permute.xlu1 %3075 }
0x1a13   :  { %6622 = vmatprep.mubr.msk.f32.mxu0 %vm636_vm8, %v3083_v49  ;;  %v3086_v21 = vmul.f32 0.35355338, %v3076_v60 }
0x1a14   :  { %v3074_v35 = vpop.permute.xlu0 %3073  ;;  %6623 = vmatmul.mubr.msk.f32.gmra.mxu0 %vm636_vm8, %v3084_v19 }
0x1a15   :  { %v3085_v30 = vmul.f32 0.35355338, %v3074_v35 }
0x1a16   :  { %v2976_v22 = vpop.permute.xlu1 %2975 }
0x1a17   :  { %6625 = vmatprep.mubr.msk.f32.mxu0 %vm636_vm8, %v3085_v30 }
0x1a18   :  { %v2978_v23 = vpop.permute.xlu0 %2977  ;;  %6626 = vmatmul.mubr.msk.f32.gmra.mxu0 %vm636_vm8, %v3086_v21 }
0x1a19   :  { %6600 = vmatpush3.msra.mxu1 %v2978_v23 }
0x1a1a   :  { %6601 = vmatprep.subr.mxu1 %v7231_v0  ;;  %v2972_v57 = vpop.permute.xlu1 %2971 }
0x1a1b   :  { %6602 = vmatpush3.msra.mxu1 %v2976_v22 }
0x1a1c   :  { %v2974_v51 = vpop.permute.xlu0 %2973  ;;  %6603 = vmatprep.subr.mxu1 %v7231_v0 }
0x1a1d   :  { %6604 = vmatpush3.msra.mxu1 %v2974_v51 }
0x1a1e   :  { %6605 = vmatprep.subr.mxu1 %v7231_v0 }
0x1a1f   :  { %6606 = vmatpush3.msra.mxu1 %v2972_v57 }
0x1a20   :  { %6608 = vmatmul.mubr.msk.f32.vlgmr.msra.gmra.mxu1 %vm424_vm6, %v8024_v7 }
0x1ac5   :  { %v6618_v11 = vpop.f32.mrf.mxu0 }
0x1ac6   :  { %v3224_v16 = vadd.f32 %v6618_v11, %v8084_v10 }
0x1ac7   :  { %v3218_v12 = vpop.f32.mrf.mxu0 }
0x1ac8   :  { %v8091_v26 = vadd.f32 %v3218_v12, %v8087_v33  ;;  %v3260_v6 = vsel %vm732_vm15, %v3224_v16, -inf }
0x1ac9   :  { %3261 = vmax.xlane.f32.xlu1 %v3260_v6 }
0x1aca   :  { %v3257_v52 = vsel %vm732_vm15, %v8091_v26, -inf }
0x1acb   :  { %3258 = vmax.xlane.f32.xlu0 %v3257_v52 }
0x1ad0   :  { %v6621_v8 = vpop.f32.mrf.mxu0 }
0x1ad1   :  { %v3234_v24 = vadd.f32 %v6621_v8, %v8099_v18 }
0x1ad2   :  { %v3228_v47 = vpop.f32.mrf.mxu0 }
0x1ad3   :  { %v3229_v15 = vadd.f32 %v3228_v47, %v8102_v58  ;;  %v3266_v25 = vsel %vm732_vm15, %v3234_v24, -inf }
0x1ad4   :  { %3267 = vmax.xlane.f32.xlu0 %v3266_v25  ;;  %v6624_v36 = vpop.f32.mrf.mxu0 }
0x1ad5   :  { %v3244_v20 = vadd.f32 %v6624_v36, %v8110_v29  ;;  %v3263_v3 = vsel %vm732_vm15, %v3229_v15, -inf }
0x1ad6   :  { %v3238_v50 = vpop.f32.mrf.mxu0 }
0x1ad7   :  { %v3239_v59 = vadd.f32 %v3238_v50, %v8113_v1  ;;  %v3272_v37 = vsel %vm732_vm15, %v3244_v20, -inf }
0x1ad8   :  { %3264 = vmax.xlane.f32.xlu0 %v3263_v3  ;;  %v6627_v39 = vpop.f32.mrf.mxu0 }
0x1ad9   :  { %v3269_v43 = vsel %vm732_vm15, %v3239_v59, -inf  ;;  %v3254_v9 = vadd.f32 %v6627_v39, %v8121_v32 }
0x1ada   :  { %3270 = vmax.xlane.f32.xlu1 %v3269_v43  ;;  %v3248_v34 = vpop.f32.mrf.mxu0 }
0x1adb   :  { %v3249_v54 = vadd.f32 %v3248_v34, %v8124_v38  ;;  %v3278_v13 = vsel %vm732_vm15, %v3254_v9, -inf }
0x1adc   :  { %3273 = vmax.xlane.f32.xlu0 %v3272_v37 }
0x1add   :  { %v3275_v44 = vsel %vm732_vm15, %v3249_v54, -inf }
0x1ade   :  { %3276 = vmax.xlane.f32.xlu1 %v3275_v44 }
0x1ae0   :  { %3279 = vmax.xlane.f32.xlu0 %v3278_v13  ;;  %v3055_v45 = vpop.f32.mrf.mxu1 }
0x1ae2   :  { %v6609_v17 = vpop.f32.mrf.mxu1 }
0x1aef   :  { %2983 = vrot.lane.b32.xlu1 %v8017_v61, %s7237_s21 }
0x1b52   :  { %v3262_v48 = vpop.xlane.xlu1 %3261 }
0x1b53   :  { %v3282_v11 = vsub.f32 %v3224_v16, %v3262_v48 }
0x1b54   :  { %v3259_v23 = vpop.xlane.xlu0 %3258 }
0x1b55   :  { %v3291_v6 = vmul.f32 1.442695, %v3282_v11  ;;  %v3281_v52 = vsub.f32 %v8091_v26, %v3259_v23 }
0x1b57   :  { %v3289_v47 = vmul.f32 1.442695, %v3281_v52 }
0x1b5d   :  { %v3268_v57 = vpop.xlane.xlu0 %3267 }
0x1b5e   :  { %v3284_v25 = vsub.f32 %v3234_v24, %v3268_v57 }
0x1b60   :  { %v3295_v50 = vmul.f32 1.442695, %v3284_v25 }
0x1b61   :  { %v3265_v8 = vpop.xlane.xlu0 %3264 }
0x1b63   :  { %v3271_v49 = vpop.xlane.xlu1 %3270 }
0x1b64   :  { %v3285_v19 = vsub.f32 %v3239_v59, %v3271_v49  ;;  %v3283_v59 = vsub.f32 %v3229_v15, %v3265_v8 }
0x1b65   :  { %v3274_v36 = vpop.xlane.xlu0 %3273 }
0x1b66   :  { %v3297_v60 = vmul.f32 1.442695, %v3285_v19  ;;  %v3293_v3 = vmul.f32 1.442695, %v3283_v59  ;;  %v3286_v39 = vsub.f32 %v3244_v20, %v3274_v36 }
0x1b67   :  { %v3277_v35 = vpop.xlane.xlu1 %3276 }
0x1b68   :  { %6975 = vpow2.f32 %v3297_v60  ;;  %v3299_v34 = vmul.f32 1.442695, %v3286_v39  ;;  %v3287_v44 = vsub.f32 %v3249_v54, %v3277_v35 }
0x1b69   :  { %6977 = vpow2.f32 %v3291_v6  ;;  %v3280_v43 = vpop.xlane.xlu0 %3279 }
0x1b6a   :  { %6979 = vpow2.f32 %v3289_v47  ;;  %v3288_v37 = vsub.f32 %v3254_v9, %v3280_v43 }
0x1b6b   :  { %v2984_v30 = vpop.permute.xlu1 %2983  ;;  %6981 = vpow2.f32 %v3295_v50 }
0x1b6c   :  { %v8134_v21 = vadd.f32 %v3055_v45, %v2984_v30  ;;  %6983 = vpow2.f32 %v3293_v3  ;;  %v3303_v24 = vmul.f32 1.442695, %v3288_v37  ;;  %v3301_v45 = vmul.f32 1.442695, %v3287_v44 }
0x1b6d   :  { %6985 = vpow2.f32 %v3299_v34 }
0x1b6e   :  { %v3108_v22 = vrot.slane %v8134_v21, 4  ;;  %v3104_v16 = vrot.slane %v8134_v21, 2  ;;  %6987 = vpow2.f32 %v3303_v24  ;;  %v3112_v23 = vrot.slane %v8134_v21, 6 }
0x1b6f   :  { %6989 = vpow2.f32 %v3301_v45 }
0x1b70   :  { %3109 = vrot.lane.b32.xlu0 %v3108_v22, %s7233_s0 }
0x1b75   :  { %v8138_v51 = vpop.eup %6975 }
0x1b76   :  { %v3317_v12 = vsel %vm732_vm15, %v8138_v51, 0.0  ;;  %v8145_v26 = vpop.eup %6977 }
0x1b77   :  { %3318 = vadd.xlane.f32.xlu1 %v3317_v12  ;;  %v3308_v13 = vsel %vm732_vm15, %v8145_v26, 0.0  ;;  %v6980_v15 = vpop.eup %6979 }
0x1b78   :  { %v3305_v20 = vsel %vm732_vm15, %v6980_v15, 0.0  ;;  %v6982_v17 = vpop.eup %6981 }
0x1b79   :  { %v3314_v48 = vsel %vm732_vm15, %v6982_v17, 0.0  ;;  %v6984_v9 = vpop.eup %6983 }
0x1b7a   :  { %v3311_v49 = vsel %vm732_vm15, %v6984_v9, 0.0  ;;  %v6986_v54 = vpop.eup %6985 }
0x1b7b   :  { %v3320_v19 = vsel %vm732_vm15, %v6986_v54, 0.0  ;;  %v6988_v60 = vpop.eup %6987 }
0x1b7c   :  { %v3326_v35 = vsel %vm732_vm15, %v6988_v60, 0.0  ;;  %v6990_v30 = vpop.eup %6989 }
0x1b7d   :  { %v3323_v22 = vsel %vm732_vm15, %v6990_v30, 0.0 }
0x1b88   :  { %3105 = vrot.lane.b32.xlu1 %v3104_v16, %s7234_s3 }
0x1b8f   :  { %3309 = vadd.xlane.f32.xlu0 %v3308_v13 }
0x1b93   :  { %3306 = vadd.xlane.f32.xlu0 %v3305_v20 }
0x1b97   :  { %3315 = vadd.xlane.f32.xlu0 %v3314_v48 }
0x1b9b   :  { %3312 = vadd.xlane.f32.xlu0 %v3311_v49 }
0x1b9f   :  { %3321 = vadd.xlane.f32.xlu0 %v3320_v19 }
0x1ba3   :  { %3327 = vadd.xlane.f32.xlu0 %v3326_v35 }
0x1ba7   :  { %3324 = vadd.xlane.f32.xlu0 %v3323_v22 }
0x1bbd   :  { %3113 = vrot.lane.b32.xlu0 %v3112_v23, %s7235_s19 }
0x1bc1   :  { %3510 = vrot.lane.b32.xlu0 %v7969_v4, %s7240_s22 }
0x1bc5   :  { %3508 = vrot.lane.b32.xlu0 %v7990_v27, %s7240_s22 }
0x1bc9   :  { %3506 = vrot.lane.b32.xlu0 %v7982_v56, %s7240_s22 }
0x1be2   :  { %v3110_v57 = vpop.permute.xlu0 %3109 }
0x1c00   :  { %v3319_v36 = vpop.xlane.xlu1 %3318 }
0x1c04   :  { %v3106_v56 = vpop.permute.xlu1 %3105 }
0x1c05   :  { %v3117_v39 = vsel %vm97_vm4, %v3106_v56, %v3110_v57  ;;  %v3116_v43 = vsel %vm604_vm7, %v8134_v21, %v3106_v56 }
0x1c18   :  { %v3310_v11 = vpop.xlane.xlu0 %3309 }
0x1c1c   :  { %v3307_v12 = vpop.xlane.xlu0 %3306 }
0x1c1d   :  { %6991 = vrcp.f32 %v3307_v12 }
0x1c1e   :  { %6993 = vrcp.f32 %v3310_v11 }
0x1c20   :  { %v3316_v6 = vpop.xlane.xlu0 %3315 }
0x1c24   :  { %v3313_v52 = vpop.xlane.xlu0 %3312 }
0x1c25   :  { %6995 = vrcp.f32 %v3313_v52 }
0x1c26   :  { %6997 = vrcp.f32 %v3316_v6 }
0x1c27   :  { %6999 = vrcp.f32 %v3319_v36 }
0x1c28   :  { %v3322_v8 = vpop.xlane.xlu0 %3321 }
0x1c29   :  { %7001 = vrcp.f32 %v3322_v8 }
0x1c2a   :  { %v6992_v47 = vpop.eup %6991 }
0x1c2b   :  { %v3330_v25 = vmul.f32 %v6992_v47, %v6980_v15  ;;  %v6994_v3 = vpop.eup %6993 }
0x1c2c   :  { %v3328_v50 = vpop.xlane.xlu0 %3327  ;;  %v3332_v34 = vmul.f32 %v6994_v3, %v8145_v26 }
0x1c2d   :  { %6634 = vmatprep.mubr.msk.f32.mxu1 %vm732_vm15, %v3330_v25 }
0x1c30   :  { %v3325_v4 = vpop.xlane.xlu0 %3324 }
0x1c31   :  { %7003 = vrcp.f32 %v3325_v4 }
0x1c32   :  { %7005 = vrcp.f32 %v3328_v50  ;;  %v6996_v16 = vpop.eup %6995 }
0x1c33   :  { %v6998_v37 = vpop.eup %6997  ;;  %v3334_v44 = vmul.f32 %v6996_v16, %v6984_v9 }
0x1c34   :  { %v3114_v27 = vpop.permute.xlu0 %3113  ;;  %v7000_v24 = vpop.eup %6999  ;;  %v3336_v13 = vmul.f32 %v6998_v37, %v6982_v17 }
0x1c35   :  { %v3118_v59 = vsel %vm93_vm2, %v3110_v57, %v3114_v27  ;;  %v3338_v45 = vmul.f32 %v7000_v24, %v8138_v51  ;;  %v7095_v24 = vld [vmem:[#allocation8 + $0x138] sm:$0xff] }
0x1c36   :  { %6628 = vmatprep.subr.mxu1 %v3118_v59  ;;  %v7002_v15 = vpop.eup %7001 }
0x1c37   :  { %6629 = vmatpush3.msra.mxu1 %v3118_v59  ;;  %v3340_v21 = vmul.f32 %v7002_v15, %v6986_v54  ;;  %v7097_v15 = vld [vmem:[#allocation8 + $0x120] sm:$0xff] }
0x1c38   :  { %6630 = vmatprep.subr.mxu1 %v3117_v39  ;;  %v3511_v49 = vpop.permute.xlu0 %3510 }
0x1c39   :  { %6631 = vmatpush3.msra.mxu1 %v3117_v39 }
0x1c3a   :  { %6632 = vmatprep.subr.mxu1 %v3116_v43 }
0x1c3b   :  { %6633 = vmatpush3.msra.mxu1 %v3116_v43 }
0x1c3c   :  { %6635 = vmatmul.mubr.msk.f32.vlgmr.msra.gmra.mxu1 %vm732_vm15, %v3332_v34  ;;  %6646 = vmatprep.subr.mxu1 %v3511_v49  ;;  %v3509_v17 = vpop.permute.xlu0 %3508 }
0x1c3d   :  { %6637 = vmatprep.mubr.msk.f32.mxu1 %vm732_vm15, %v3334_v44  ;;  %6647 = vmatpush3.msra.mxu1 %v3511_v49 }
0x1c3e   :  { %v7004_v20 = vpop.eup %7003  ;;  %6648 = vmatprep.subr.mxu1 %v3509_v17 }
0x1c3f   :  { %v7006_v48 = vpop.eup %7005  ;;  %v3342_v26 = vmul.f32 %v7004_v20, %v6990_v30  ;;  %6649 = vmatpush3.msra.mxu1 %v3509_v17 }
0x1c40   :  { %6638 = vmatmul.mubr.msk.f32.gmra.mxu1 %vm732_vm15, %v3336_v13  ;;  %v3344_v9 = vmul.f32 %v7006_v48, %v6988_v60  ;;  %v3507_v51 = vpop.permute.xlu0 %3506  ;;  %v7096_v13 = vld [vmem:[#allocation8 + $0x130] sm:$0xff] }
0x1c41   :  { %6640 = vmatprep.mubr.msk.f32.mxu1 %vm732_vm15, %v3338_v45  ;;  %6650 = vmatprep.subr.mxu1 %v3507_v51 }
0x1c42   :  { %6651 = vmatpush3.msra.mxu1 %v3507_v51 }
0x1c44   :  { %6641 = vmatmul.mubr.msk.f32.gmra.mxu1 %vm732_vm15, %v3340_v21 }
0x1c45   :  { %6643 = vmatprep.mubr.msk.f32.mxu1 %vm732_vm15, %v3342_v26 }
0x1c48   :  { %6644 = vmatmul.mubr.msk.f32.gmra.mxu1 %vm732_vm15, %v3344_v9 }
0x1cfc   :  { %v6636_v19 = vpop.f32.mrf.mxu1 }
0x1cfe   :  { %v3435_v54 = vpop.f32.mrf.mxu1 }
0x1d00   :  { %v6639_v35 = vpop.f32.mrf.mxu1 }
0x1d01   :  { %3478 = vrot.lane.b32.xlu1 %v6639_v35, %s7230_s14  ;;  %v7100_v35 = vld [vmem:[#allocation8 + $0x128] sm:$0xff] }
0x1d02   :  { %v3445_v30 = vpop.f32.mrf.mxu1 }
0x1d03   :  { %3476 = vrot.lane.b32.xlu0 %v3445_v30, %s7230_s14  ;;  %v3640_v30 = vld [vmem:[#allocation8 + $0xf0] sm:$0xff] }
0x1d04   :  { %v6642_v60 = vpop.f32.mrf.mxu1 }
0x1d05   :  { %3486 = vrot.lane.b32.xlu1 %v6642_v60, %s7242_s24 }
0x1d06   :  { %v3455_v22 = vpop.f32.mrf.mxu1 }
0x1d07   :  { %3484 = vrot.lane.b32.xlu0 %v3455_v22, %s7242_s24  ;;  %v3639_v22 = vld [vmem:[#allocation8 + $0xe8] sm:$0xff] }
0x1d08   :  { %v6645_v23 = vpop.f32.mrf.mxu1 }
0x1d09   :  { %3504 = vrot.lane.b32.xlu1 %v8000_v28, %s7240_s22 }
0x1d0a   :  { %v3465_v57 = vpop.f32.mrf.mxu1 }
0x1d0b   :  { %3492 = vrot.lane.b32.xlu0 %v3465_v57, %s7241_s23  ;;  %v3638_v57 = vld [vmem:[#allocation8 + $0xe0] sm:$0xff] }
0x1d0d   :  { %3516 = vrot.lane.b32.xlu1 %v8017_v61, %s7240_s22 }
0x1d0f   :  { %3494 = vrot.lane.b32.xlu0 %v6645_v23, %s7241_s23  ;;  %v7101_v23 = vld [vmem:[#allocation8 + $0x118] sm:$0xff] }
0x1d73   :  { %v3479_v11 = vpop.permute.xlu1 %3478 }
0x1d74   :  { %v3499_v61 = vsel %vm636_vm8, %v6636_v19, %v3479_v11  ;;  %v7102_v11 = vld [vmem:[#allocation8 + $0x108] sm:$0xff] }
0x1d75   :  { %v3477_v12 = vpop.permute.xlu0 %3476 }
0x1d76   :  { %v3498_v47 = vsel %vm636_vm8, %v3435_v54, %v3477_v12  ;;  %v3641_v54 = vld [vmem:[#allocation8 + $0xf8] sm:$0xff] }
0x1d77   :  { %v3487_v6 = vpop.permute.xlu1 %3486  ;;  %6657 = vmatprep.subr.mxu0 %v3641_v54 }
0x1d78   :  { %v3501_v50 = vsel %vm875_vm3, %v3499_v61, %v3487_v6  ;;  %6658 = vmatpush3.msra.mxu0 %v3641_v54 }
0x1d79   :  { %v3485_v52 = vpop.permute.xlu0 %3484  ;;  %6659 = vmatprep.subr.mxu0 %v3640_v30 }
0x1d7a   :  { %v3500_v25 = vsel %vm875_vm3, %v3498_v47, %v3485_v52  ;;  %6660 = vmatpush3.msra.mxu0 %v3640_v30 }
0x1d7b   :  { %v3505_v8 = vpop.permute.xlu1 %3504  ;;  %6661 = vmatprep.subr.mxu0 %v3639_v22 }
0x1d7c   :  { %6652 = vmatprep.subr.mxu1 %v3505_v8  ;;  %6662 = vmatpush3.msra.mxu0 %v3639_v22 }
0x1d7d   :  { %v3493_v36 = vpop.permute.xlu0 %3492  ;;  %6653 = vmatpush3.msra.mxu1 %v3505_v8  ;;  %6663 = vmatprep.subr.mxu0 %v3638_v57 }
0x1d7e   :  { %v3502_v28 = vsel %vm732_vm15, %v3500_v25, %v3493_v36  ;;  %6664 = vmatpush3.msra.mxu0 %v3638_v57 }
0x1d7f   :  { %6654 = vmatprep.mubr.msk.f32.mxu1 %vm424_vm6, %v3502_v28  ;;  %v3517_v27 = vpop.permute.xlu1 %3516 }
0x1d81   :  { %v3495_v4 = vpop.permute.xlu0 %3494 }
0x1d82   :  { %v3503_v56 = vsel %vm732_vm15, %v3501_v50, %v3495_v4 }
0x1d83   :  { %6655 = vmatmul.mubr.msk.f32.vlgmr.msra.gmra.mxu1 %vm424_vm6, %v3503_v56 }
0x1e43   :  { %v6656_v59 = vpop.f32.mrf.mxu1 }
0x1e44   :  { %v3597_v3 = vadd.f32 %v6656_v59, %v3517_v27 }
0x1e45   :  { %v3591_v39 = vpop.f32.mrf.mxu1 }
0x1e46   :  { %v3601_v16 = vadd.f32 %v3597_v3, %v8033_v55  ;;  %v3592_v43 = vadd.f32 %v3591_v39, %v3517_v27  ;;  %v7098_v55 = vld [vmem:[#allocation8 + $0x110] sm:$0xff] }
0x1e48   :  { %v3600_v34 = vadd.f32 %v3592_v43, %v8009_v42  ;;  %v3605_v37 = vsel %vm424_vm6, %v3601_v16, 0.0  ;;  %v7099_v42 = vld [vmem:[#allocation8 + $0x100] sm:$0xff] }
0x1e49   :  { %3606 = vadd.xlane.f32.xlu1 %v3605_v37 }
0x1e4a   :  { %v3602_v44 = vsel %vm424_vm6, %v3600_v34, 0.0 }
0x1e4b   :  { %3603 = vadd.xlane.f32.xlu0 %v3602_v44  ;;  %v5930_v44 = vld [vmem:[#allocation8 + $0x14e] ss:$0 sm:$0xff] }
0x1e5a   :  { %3628 = vrot.lane.b32.xlu1 %v7995_v2, %s7237_s21 }
0x1e5e   :  { %3744 = vrot.lane.b32.xlu1 %v7095_v24, %s7237_s21 }
0x1e62   :  { %3742 = vrot.lane.b32.xlu1 %v7096_v13, %s7237_s21 }
0x1e66   :  { %3738 = vrot.lane.b32.xlu1 %v7097_v15, %s7237_s21 }
0x1e6a   :  { %3734 = vrot.lane.b32.xlu1 %v7098_v55, %s7237_s21 }
0x1e6e   :  { %3730 = vrot.lane.b32.xlu1 %v7099_v42, %s7237_s21 }
0x1ed2   :  { %v3607_v45 = vpop.xlane.xlu1 %3606 }
0x1ed3   :  { %v3609_v20 = vmul.f32 0.03125, %v3607_v45 }
0x1ed4   :  { %v3604_v21 = vpop.xlane.xlu0 %3603 }
0x1ed5   :  { %v3608_v48 = vmul.f32 0.03125, %v3604_v21  ;;  %v3611_v26 = vsub.f32 %v3601_v16, %v3609_v20 }
0x1ed6   :  { %v3629_v60 = vpop.permute.xlu1 %3628 }
0x1ed7   :  { %v3610_v9 = vsub.f32 %v3600_v34, %v3608_v48  ;;  %v3613_v51 = vmul.f32 %v3611_v26, %v3611_v26 }
0x1ed9   :  { %v3612_v49 = vmul.f32 %v3610_v9, %v3610_v9  ;;  %v3617_v19 = vsel %vm424_vm6, %v3613_v51, 0.0 }
0x1edb   :  { %v3614_v17 = vsel %vm424_vm6, %v3612_v49, 0.0 }
0x1edc   :  { %3615 = vadd.xlane.f32.xlu0 %v3614_v17 }
0x1ee0   :  { %3618 = vadd.xlane.f32.xlu0 %v3617_v19 }
0x1ef6   :  { %3633 = vrot.lane.b32.xlu0 %v7995_v2, %s7240_s22  ;;  %v3745_v2 = vpop.permute.xlu1 %3744 }
0x1ef7   :  { %6668 = vmatprep.subr.mxu1 %v3745_v2 }
0x1ef8   :  { %6669 = vmatpush3.msra.mxu1 %v3745_v2 }
0x1efa   :  { %3740 = vrot.lane.b32.xlu0 %v7100_v35, %s7237_s21  ;;  %v3743_v12 = vpop.permute.xlu1 %3742 }
0x1efb   :  { %6670 = vmatprep.subr.mxu1 %v3743_v12 }
0x1efc   :  { %6671 = vmatpush3.msra.mxu1 %v3743_v12 }
0x1efe   :  { %3736 = vrot.lane.b32.xlu0 %v7101_v23, %s7237_s21  ;;  %v3739_v61 = vpop.permute.xlu1 %3738 }
0x1f02   :  { %3732 = vrot.lane.b32.xlu0 %v7102_v11, %s7237_s21  ;;  %v3735_v56 = vpop.permute.xlu1 %3734 }
0x1f06   :  { %3755 = vrot.lane.b32.xlu0 %v5930_v44, %s7237_s21  ;;  %v3731_v13 = vpop.permute.xlu1 %3730 }
0x1f65   :  { %v3616_v6 = vpop.xlane.xlu0 %3615 }
0x1f66   :  { %v3620_v52 = vmul.f32 0.03125, %v3616_v6 }
0x1f68   :  { %v3622_v8 = vadd.f32 1e-05, %v3620_v52 }
0x1f69   :  { %v3619_v47 = vpop.xlane.xlu0 %3618 }
0x1f6a   :  { %7007 = vrsqrt.f32 %v3622_v8  ;;  %v3621_v25 = vmul.f32 0.03125, %v3619_v47  ;;  %v8222_v8 = vld [vmem:[#allocation8 + $0x98] sm:$0xff]  ;;  %v5935_v47 = vld [vmem:[#allocation8 + $0x149] ss:$0 sm:$0xff] }
0x1f6b   :  { %6687 = vmatprep.subr.mxu0 %v8222_v8 }
0x1f6c   :  { %v3623_v36 = vadd.f32 1e-05, %v3621_v25  ;;  %v8227_v25 = vld [vmem:[#allocation8 + $0x90] sm:$0xff] }
0x1f6d   :  { %v3634_v28 = vpop.permute.xlu0 %3633 }
0x1f6e   :  { %7009 = vrsqrt.f32 %v3623_v36  ;;  %v8230_v36 = vld [vmem:[#allocation8 + $0x88] sm:$0xff] }
0x1f71   :  { %v3741_v50 = vpop.permute.xlu0 %3740 }
0x1f72   :  { %6672 = vmatprep.subr.mxu1 %v3741_v50 }
0x1f73   :  { %6673 = vmatpush3.msra.mxu1 %v3741_v50 }
0x1f74   :  { %6674 = vmatprep.subr.mxu1 %v3739_v61 }
0x1f75   :  { %6675 = vmatpush3.msra.mxu1 %v3739_v61  ;;  %v3737_v4 = vpop.permute.xlu0 %3736 }
0x1f76   :  { %6676 = vmatprep.subr.mxu1 %v3737_v4 }
0x1f77   :  { %v7008_v27 = vpop.eup %7007  ;;  %6677 = vmatpush3.msra.mxu1 %v3737_v4 }
0x1f78   :  { %v3626_v59 = vmul.f32 %v7008_v27, %v3610_v9  ;;  %6678 = vmatprep.subr.mxu1 %v3735_v56 }
0x1f79   :  { %6679 = vmatpush3.msra.mxu1 %v3735_v56  ;;  %v3733_v24 = vpop.permute.xlu0 %3732 }
0x1f7a   :  { %v3631_v3 = vmul.f32 %v3629_v60, %v3626_v59  ;;  %6680 = vmatprep.subr.mxu1 %v3733_v24 }
0x1f7b   :  { %v7010_v39 = vpop.eup %7009  ;;  %6681 = vmatpush3.msra.mxu1 %v3733_v24 }
0x1f7c   :  { %v3627_v16 = vmul.f32 %v7010_v39, %v3611_v26  ;;  %v3636_v43 = vadd.f32 %v3634_v28, %v3631_v3  ;;  %6682 = vmatprep.subr.mxu1 %v3731_v13 }
0x1f7d   :  { %6683 = vmatpush3.msra.mxu1 %v3731_v13  ;;  %v3756_v48 = vpop.permute.xlu0 %3755 }
0x1f7e   :  { %v3632_v34 = vmul.f32 %v3629_v60, %v3627_v16  ;;  %6665 = vmatprep.mubr.msk.f32.mxu0 %vm424_vm6, %v3636_v43 }
0x1f80   :  { %v3637_v37 = vadd.f32 %v3634_v28, %v3632_v34  ;;  %v8233_v28 = vld [vmem:[#allocation8 + $0x80] sm:$0xff] }
0x1f82   :  { %6666 = vmatmul.mubr.msk.f32.vlgmr.msra.gmra.mxu0 %vm424_vm6, %v3637_v37 }
0x1f83   :  { %6688 = vmatpush3.msra.mxu0 %v8222_v8 }
0x1f84   :  { %6689 = vmatprep.subr.mxu0 %v8227_v25 }
0x1f85   :  { %6690 = vmatpush3.msra.mxu0 %v8227_v25 }
0x1f86   :  { %6691 = vmatprep.subr.mxu0 %v8230_v36 }
0x1f87   :  { %6692 = vmatpush3.msra.mxu0 %v8230_v36 }
0x1f88   :  { %6693 = vmatprep.subr.mxu0 %v8233_v28 }
0x1f89   :  { %6694 = vmatpush3.msra.mxu0 %v8233_v28 }
0x2042   :  { %v6667_v15 = vpop.f32.mrf.mxu0 }
0x2043   :  { %v3725_v55 = vadd.f32 %v6667_v15, %v5930_v44  ;;  %v8243_v15 = vld [vmem:[#allocation7] sm:$0xff] }
0x2044   :  { %v3719_v42 = vpop.f32.mrf.mxu0 }
0x2045   :  { %v3720_v45 = vadd.f32 %v5930_v44, %v3719_v42  ;;  %v3729_v21 = vmax.f32 %v3725_v55, 0.0 }
0x2047   :  { %v3728_v20 = vmax.f32 %v3720_v45, 0.0  ;;  %v8253_v45 = vld [vmem:[#allocation8 + $0x144] ss:$0 sm:$0xff] }
0x2049   :  { %6684 = vmatprep.mubr.msk.f32.mxu1 %vm1088_vm9, %v3728_v20 }
0x204a   :  { %6685 = vmatmul.mubr.msk.f32.vlgmr.msra.gmra.mxu1 %vm1088_vm9, %v3729_v21 }
0x210a   :  { %v6686_v26 = vpop.f32.mrf.mxu1 }
0x210b   :  { %v3836_v9 = vadd.f32 %v6686_v26, %v3756_v48 }
0x210c   :  { %v3830_v49 = vpop.f32.mrf.mxu1 }
0x210d   :  { %v3831_v17 = vadd.f32 %v3830_v49, %v3756_v48  ;;  %v3840_v51 = vadd.f32 %v3836_v9, %v3637_v37 }
0x210f   :  { %v3839_v19 = vadd.f32 %v3831_v17, %v3636_v43  ;;  %v3845_v54 = vsel %vm424_vm6, %v3840_v51, 0.0 }
0x2110   :  { %3846 = vadd.xlane.f32.xlu0 %v3845_v54 }
0x2111   :  { %v3842_v35 = vsel %vm424_vm6, %v3839_v19, 0.0 }
0x2112   :  { %3843 = vadd.xlane.f32.xlu1 %v3842_v35 }
0x2199   :  { %v3847_v30 = vpop.xlane.xlu0 %3846 }
0x219a   :  { %v3849_v60 = vmul.f32 0.03125, %v3847_v30 }
0x219b   :  { %v3844_v22 = vpop.xlane.xlu1 %3843 }
0x219c   :  { %v3851_v23 = vsub.f32 %v3840_v51, %v3849_v60  ;;  %v3848_v57 = vmul.f32 0.03125, %v3844_v22 }
0x219e   :  { %v3850_v11 = vsub.f32 %v3839_v19, %v3848_v57  ;;  %v3853_v2 = vmul.f32 %v3851_v23, %v3851_v23 }
0x21a0   :  { %v3857_v12 = vsel %vm424_vm6, %v3853_v2, 0.0  ;;  %v3852_v6 = vmul.f32 %v3850_v11, %v3850_v11 }
0x21a1   :  { %3858 = vadd.xlane.f32.xlu1 %v3857_v12 }
0x21a2   :  { %v3854_v52 = vsel %vm424_vm6, %v3852_v6, 0.0 }
0x21a3   :  { %3855 = vadd.xlane.f32.xlu0 %v3854_v52 }
0x21b9   :  { %3875 = vrot.lane.b32.xlu0 %v5935_v47, %s7236_s20 }
0x222a   :  { %v3859_v61 = vpop.xlane.xlu1 %3858 }
0x222b   :  { %v3861_v50 = vmul.f32 0.03125, %v3859_v61 }
0x222c   :  { %v3856_v4 = vpop.xlane.xlu0 %3855 }
0x222d   :  { %v3863_v56 = vadd.f32 1e-05, %v3861_v50  ;;  %v3860_v27 = vmul.f32 0.03125, %v3856_v4 }
0x222f   :  { %7011 = vrsqrt.f32 %v3863_v56  ;;  %v3862_v59 = vadd.f32 1e-05, %v3860_v27 }
0x2230   :  { %v3876_v34 = vpop.permute.xlu0 %3875 }
0x2231   :  { %7013 = vrsqrt.f32 %v3862_v59 }
0x223c   :  { %v7012_v3 = vpop.eup %7011 }
0x223d   :  { %v3867_v39 = vmul.f32 %v7012_v3, %v3851_v23 }
0x223e   :  { %v7014_v16 = vpop.eup %7013 }
0x223f   :  { %v3866_v43 = vmul.f32 %v7014_v16, %v3850_v11  ;;  %v3873_v37 = vmul.f32 %v5935_v47, %v3867_v39 }
0x2241   :  { %v3872_v44 = vmul.f32 %v5935_v47, %v3866_v43  ;;  %v8239_v24 = vadd.f32 %v3876_v34, %v3873_v37 }
0x2243   :  { %v8241_v13 = vadd.f32 %v3876_v34, %v3872_v44  ;;  %v3881_v42 = vadd.f32 %v8243_v15, %v8239_v24 }
0x2245   :  { %v3880_v55 = vadd.f32 %v8243_v15, %v8241_v13 }
0x2247   :  { %6695 = vmatprep.mubr.msk.f32.mxu0 %vm424_vm6, %v3880_v55 }
0x2248   :  { %6696 = vmatmul.mubr.msk.f32.vlgmr.msra.gmra.mxu0 %vm424_vm6, %v3881_v42 }
0x2249   :  { %6706 = vmatprep.mubr.msk.f32.mxu0 %vm424_vm6, %v8241_v13 }
0x2308   :  { %v6697_v20 = vpop.f32.mrf.mxu0 }
0x2309   :  { %v8256_v21 = vadd.f32 %v6697_v20, %v8253_v45 }
0x230a   :  { %v3963_v48 = vpop.f32.mrf.mxu0 }
0x230b   :  { %v3964_v26 = vadd.f32 %v8253_v45, %v3963_v48  ;;  %4083 = vrot.lane.b32.xlu0 %v8256_v21, %s7233_s0  ;;  %4089 = vrot.lane.b32.xlu1 %v8256_v21, %s7235_s19  ;;  %v4094_v50 = vmul.f32 0.35355338, %v8256_v21 }
0x230d   :  { %v4093_v9 = vmul.f32 0.35355338, %v3964_v26 }
0x230f   :  { %4077 = vrot.lane.b32.xlu0 %v8256_v21, %s7234_s3  ;;  %4087 = vrot.lane.b32.xlu1 %v3964_v26, %s7235_s19 }
0x2310   :  { %6725 = vmatprep.mubr.msk.f32.mxu1 %vm636_vm8, %v4093_v9 }
0x2313   :  { %4081 = vrot.lane.b32.xlu1 %v3964_v26, %s7233_s0 }
0x2317   :  { %4075 = vrot.lane.b32.xlu1 %v3964_v26, %s7234_s3 }
0x237d   :  { %v8269_v49 = vpop.permute.xlu1 %4089  ;;  %v4084_v17 = vpop.permute.xlu0 %4083 }
0x237e   :  { %4135 = vrot.lane.b32.xlu0 %v8269_v49, %s7236_s20  ;;  %v4098_v59 = vmul.f32 0.35355338, %v4084_v17  ;;  %v4100_v39 = vmul.f32 0.35355338, %v8269_v49 }
0x2381   :  { %v4088_v51 = vpop.permute.xlu1 %4087  ;;  %v4078_v19 = vpop.permute.xlu0 %4077 }
0x2382   :  { %4131 = vrot.lane.b32.xlu0 %v4084_v17, %s7236_s20  ;;  %4133 = vrot.lane.b32.xlu1 %v4088_v51, %s7236_s20  ;;  %v4096_v56 = vmul.f32 0.35355338, %v4078_v19  ;;  %v4099_v3 = vmul.f32 0.35355338, %v4088_v51 }
0x2385   :  { %v4082_v54 = vpop.permute.xlu1 %4081 }
0x2386   :  { %4127 = vrot.lane.b32.xlu0 %v4078_v19, %s7236_s20  ;;  %4129 = vrot.lane.b32.xlu1 %v4082_v54, %s7236_s20  ;;  %v4097_v27 = vmul.f32 0.35355338, %v4082_v54 }
0x2389   :  { %v4076_v35 = vpop.permute.xlu1 %4075 }
0x238a   :  { %4123 = vrot.lane.b32.xlu0 %v8256_v21, %s7236_s20  ;;  %4125 = vrot.lane.b32.xlu1 %v4076_v35, %s7236_s20  ;;  %v4095_v4 = vmul.f32 0.35355338, %v4076_v35 }
0x238e   :  { %4121 = vrot.lane.b32.xlu1 %v3964_v26, %s7236_s20  ;;  %3982 = vrot.lane.b32.xlu0 %v8222_v8, %s7237_s21 }
0x2392   :  { %3980 = vrot.lane.b32.xlu1 %v8227_v25, %s7237_s21  ;;  %3978 = vrot.lane.b32.xlu0 %v8230_v36, %s7237_s21 }
0x2396   :  { %3976 = vrot.lane.b32.xlu1 %v8233_v28, %s7237_s21 }
0x23f0   :  { %v4136_v30 = vpop.permute.xlu0 %4135 }
0x23f1   :  { %6709 = vmatprep.subr.msk.mxu1 %vm636_vm8, %v4136_v30 }
0x23f2   :  { %6710 = vmatpush3.xpose.msk.msra.mxu1 %vm636_vm8, %v4136_v30 }
0x23f4   :  { %v4132_v60 = vpop.permute.xlu0 %4131  ;;  %v4134_v22 = vpop.permute.xlu1 %4133 }
0x23f5   :  { %6711 = vmatprep.subr.msk.mxu1 %vm636_vm8, %v4134_v22 }
0x23f6   :  { %6712 = vmatpush3.xpose.msk.msra.mxu1 %vm636_vm8, %v4134_v22 }
0x23f7   :  { %6713 = vmatprep.subr.msk.mxu1 %vm636_vm8, %v4132_v60 }
0x23f8   :  { %v4128_v23 = vpop.permute.xlu0 %4127  ;;  %v4130_v57 = vpop.permute.xlu1 %4129 }
0x23fa   :  { %6714 = vmatpush3.xpose.msk.msra.mxu1 %vm636_vm8, %v4132_v60 }
0x23fb   :  { %6715 = vmatprep.subr.msk.mxu1 %vm636_vm8, %v4130_v57 }
0x23fc   :  { %v4124_v11 = vpop.permute.xlu0 %4123  ;;  %v4126_v2 = vpop.permute.xlu1 %4125 }
0x23fe   :  { %6716 = vmatpush3.xpose.msk.msra.mxu1 %vm636_vm8, %v4130_v57 }
0x23ff   :  { %6717 = vmatprep.subr.msk.mxu1 %vm636_vm8, %v4128_v23 }
0x2400   :  { %v4122_v12 = vpop.permute.xlu1 %4121  ;;  %v3983_v6 = vpop.permute.xlu0 %3982 }
0x2401   :  { %6698 = vmatprep.subr.mxu0 %v3983_v6 }
0x2402   :  { %6718 = vmatpush3.xpose.msk.msra.mxu1 %vm636_vm8, %v4128_v23  ;;  %6699 = vmatpush3.msra.mxu0 %v3983_v6 }
0x2403   :  { %6719 = vmatprep.subr.msk.mxu1 %vm636_vm8, %v4126_v2 }
0x2404   :  { %v3981_v52 = vpop.permute.xlu1 %3980  ;;  %v3979_v47 = vpop.permute.xlu0 %3978 }
0x2405   :  { %6700 = vmatprep.subr.mxu0 %v3981_v52 }
0x2406   :  { %6701 = vmatpush3.msra.mxu0 %v3981_v52  ;;  %6720 = vmatpush3.xpose.msk.msra.mxu1 %vm636_vm8, %v4126_v2 }
0x2407   :  { %6702 = vmatprep.subr.mxu0 %v3979_v47  ;;  %6721 = vmatprep.subr.msk.mxu1 %vm636_vm8, %v4124_v11 }
0x2408   :  { %6703 = vmatpush3.msra.mxu0 %v3979_v47  ;;  %v3977_v61 = vpop.permute.xlu1 %3976 }
0x2409   :  { %6704 = vmatprep.subr.mxu0 %v3977_v61 }
0x240a   :  { %6705 = vmatpush3.msra.mxu0 %v3977_v61  ;;  %6722 = vmatpush3.xpose.msk.msra.mxu1 %vm636_vm8, %v4124_v11 }
0x240b   :  { %6707 = vmatmul.mubr.msk.f32.vlgmr.msra.gmra.mxu0 %vm424_vm6, %v8239_v24  ;;  %6723 = vmatprep.subr.msk.mxu1 %vm636_vm8, %v4122_v12 }
0x240e   :  { %6724 = vmatpush3.xpose.msk.msra.mxu1 %vm636_vm8, %v4122_v12 }
0x240f   :  { %6787 = vmatprep.subr.mxu1 %v7231_v0 }
0x2411   :  { %6726 = vmatmul.mubr.msk.f32.vlgmr.msra.gmra.mxu1 %vm636_vm8, %v4094_v50 }
0x2412   :  { %6728 = vmatprep.mubr.msk.f32.mxu1 %vm636_vm8, %v4095_v4 }
0x2415   :  { %6729 = vmatmul.mubr.msk.f32.gmra.mxu1 %vm636_vm8, %v4096_v56 }
0x2416   :  { %6731 = vmatprep.mubr.msk.f32.mxu1 %vm636_vm8, %v4097_v27 }
0x2419   :  { %6732 = vmatmul.mubr.msk.f32.gmra.mxu1 %vm636_vm8, %v4098_v59 }
0x241a   :  { %6734 = vmatprep.mubr.msk.f32.mxu1 %vm636_vm8, %v4099_v3 }
0x241d   :  { %6735 = vmatmul.mubr.msk.f32.gmra.mxu1 %vm636_vm8, %v4100_v39 }
0x241e   :  { %6795 = vmatprep.mubr.msk.f32.mxu1 %vm7232_vm0, %v7231_v0 }
0x24cb   :  { %v6708_v22 = vpop.f32.mrf.mxu0 }
0x24cd   :  { %v4064_v57 = vpop.f32.mrf.mxu0 }
0x24d1   :  { %v6727_v16 = vpop.f32.mrf.mxu1 }
0x24d2   :  { %v4249_v43 = vadd.f32 %v6727_v16, %v7832_v63 }
0x24d3   :  { %v4243_v34 = vpop.f32.mrf.mxu1 }
0x24d4   :  { %v4244_v37 = vadd.f32 %v4243_v34, %v7835_v5  ;;  %v4285_v44 = vsel %vm1088_vm9, %v4249_v43, -inf }
0x24d5   :  { %4286 = vmax.xlane.f32.xlu1 %v4285_v44  ;;  %v6730_v55 = vpop.f32.mrf.mxu1 }
0x24d6   :  { %v4259_v42 = vadd.f32 %v6730_v55, %v7839_v46  ;;  %v4282_v20 = vsel %vm1088_vm9, %v4244_v37, -inf }
0x24d7   :  { %v4253_v21 = vpop.f32.mrf.mxu1  ;;  %4283 = vmax.xlane.f32.xlu0 %v4282_v20 }
0x24d8   :  { %v4254_v26 = vadd.f32 %v4253_v21, %v7844_v53  ;;  %v4291_v9 = vsel %vm1088_vm9, %v4259_v42, -inf }
0x24d9   :  { %v6733_v48 = vpop.f32.mrf.mxu1 }
0x24da   :  { %v4269_v17 = vadd.f32 %v6733_v48, %v7849_v62  ;;  %v4288_v46 = vsel %vm1088_vm9, %v4254_v26, -inf }
0x24db   :  { %v4263_v49 = vpop.f32.mrf.mxu1  ;;  %4292 = vmax.xlane.f32.xlu0 %v4291_v9 }
0x24dc   :  { %v4264_v63 = vadd.f32 %v4263_v49, %v7853_v31  ;;  %v4297_v30 = vsel %vm1088_vm9, %v4269_v17, -inf }
0x24dd   :  { %v6736_v5 = vpop.f32.mrf.mxu1 }
0x24de   :  { %v4294_v51 = vsel %vm1088_vm9, %v4264_v63, -inf  ;;  %v4279_v53 = vadd.f32 %v6736_v5, %v7859_v41 }
0x24df   :  { %v4273_v19 = vpop.f32.mrf.mxu1  ;;  %4295 = vmax.xlane.f32.xlu1 %v4294_v51  ;;  %4289 = vmax.xlane.f32.xlu0 %v4288_v46 }
0x24e0   :  { %v4274_v54 = vadd.f32 %v4273_v19, %v7863_v14  ;;  %v4303_v31 = vsel %vm1088_vm9, %v4279_v53, -inf }
0x24e2   :  { %v4300_v35 = vsel %vm1088_vm9, %v4274_v54, -inf }
0x24e3   :  { %4301 = vmax.xlane.f32.xlu1 %v4300_v35  ;;  %4298 = vmax.xlane.f32.xlu0 %v4297_v30 }
0x24e7   :  { %4304 = vmax.xlane.f32.xlu0 %v4303_v31 }
0x24f4   :  { %3989 = vrot.lane.b32.xlu1 %v8253_v45, %s7237_s21 }
0x255e   :  { %v4287_v62 = vpop.xlane.xlu1 %4286 }
0x255f   :  { %v4307_v6 = vsub.f32 %v4249_v43, %v4287_v62 }
0x2560   :  { %v4284_v2 = vpop.xlane.xlu0 %4283 }
0x2561   :  { %v4316_v52 = vmul.f32 1.442695, %v4307_v6  ;;  %v4306_v47 = vsub.f32 %v4244_v37, %v4284_v2 }
0x2563   :  { %7015 = vpow2.f32 %v4316_v52  ;;  %v4314_v50 = vmul.f32 1.442695, %v4306_v47 }
0x2564   :  { %v4293_v12 = vpop.xlane.xlu0 %4292 }
0x2565   :  { %v4309_v4 = vsub.f32 %v4259_v42, %v4293_v12  ;;  %7017 = vpow2.f32 %v4314_v50 }
0x2567   :  { %v4320_v27 = vmul.f32 1.442695, %v4309_v4 }
0x2568   :  { %v4296_v60 = vpop.xlane.xlu1 %4295  ;;  %v4290_v61 = vpop.xlane.xlu0 %4289 }
0x2569   :  { %v4308_v59 = vsub.f32 %v4254_v26, %v4290_v61  ;;  %v4310_v3 = vsub.f32 %v4264_v63, %v4296_v60  ;;  %7019 = vpow2.f32 %v4320_v27 }
0x256b   :  { %v4318_v39 = vmul.f32 1.442695, %v4308_v59  ;;  %v4322_v34 = vmul.f32 1.442695, %v4310_v3 }
0x256c   :  { %v4302_v23 = vpop.xlane.xlu1 %4301  ;;  %v4299_v56 = vpop.xlane.xlu0 %4298 }
0x256d   :  { %v4311_v16 = vsub.f32 %v4269_v17, %v4299_v56  ;;  %7021 = vpow2.f32 %v4318_v39  ;;  %v4312_v37 = vsub.f32 %v4274_v54, %v4302_v23 }
0x256e   :  { %7023 = vpow2.f32 %v4322_v34 }
0x256f   :  { %v4324_v43 = vmul.f32 1.442695, %v4311_v16  ;;  %v4326_v26 = vmul.f32 1.442695, %v4312_v37 }
0x2570   :  { %v3990_v14 = vpop.permute.xlu1 %3989  ;;  %v4305_v44 = vpop.xlane.xlu0 %4304 }
0x2571   :  { %v8337_v11 = vadd.f32 %v4064_v57, %v3990_v14  ;;  %v8339_v41 = vadd.f32 %v6708_v22, %v3990_v14  ;;  %v4313_v55 = vsub.f32 %v4279_v53, %v4305_v44  ;;  %v8349_v20 = vpop.eup %7015  ;;  %7025 = vpow2.f32 %v4324_v43 }
0x2572   :  { %v4333_v42 = vsel %vm1088_vm9, %v8349_v20, 0.0  ;;  %v7018_v48 = vpop.eup %7017 }
0x2573   :  { %4115 = vrot.lane.b32.xlu1 %v8337_v11, %s7235_s19  ;;  %4117 = vrot.lane.b32.xlu0 %v8339_v41, %s7235_s19  ;;  %v4328_v21 = vmul.f32 1.442695, %v4313_v55  ;;  %v4330_v9 = vsel %vm1088_vm9, %v7018_v48, 0.0 }
0x2575   :  { %7027 = vpow2.f32 %v4328_v21 }
0x2576   :  { %v8354_v49 = vpop.eup %7019  ;;  %7029 = vpow2.f32 %v4326_v26 }
0x2577   :  { %4111 = vrot.lane.b32.xlu1 %v8339_v41, %s7233_s0  ;;  %v4339_v63 = vsel %vm1088_vm9, %v8354_v49, 0.0 }
0x257a   :  { %v8358_v5 = vpop.eup %7021 }
0x257b   :  { %4109 = vrot.lane.b32.xlu1 %v8337_v11, %s7233_s0  ;;  %v8360_v17 = vpop.eup %7023  ;;  %v4336_v51 = vsel %vm1088_vm9, %v8358_v5, 0.0 }
0x257c   :  { %v4342_v19 = vsel %vm1088_vm9, %v8360_v17, 0.0 }
0x257e   :  { %v8364_v46 = vpop.eup %7025 }
0x257f   :  { %v4345_v54 = vsel %vm1088_vm9, %v8364_v46, 0.0 }
0x2582   :  { %v8370_v53 = vpop.eup %7027 }
0x2583   :  { %v4351_v35 = vsel %vm1088_vm9, %v8370_v53, 0.0  ;;  %v8374_v30 = vpop.eup %7029 }
0x2584   :  { %v4348_v31 = vsel %vm1088_vm9, %v8374_v30, 0.0 }
0x2592   :  { %4334 = vadd.xlane.f32.xlu0 %v4333_v42 }
0x2596   :  { %4331 = vadd.xlane.f32.xlu0 %v4330_v9 }
0x259a   :  { %4340 = vadd.xlane.f32.xlu0 %v4339_v63 }
0x259e   :  { %4337 = vadd.xlane.f32.xlu0 %v4336_v51 }
0x259f   :  { %4343 = vadd.xlane.f32.xlu1 %v4342_v19 }
0x25a2   :  { %4346 = vadd.xlane.f32.xlu0 %v4345_v54 }
0x25a6   :  { %4352 = vadd.xlane.f32.xlu0 %v4351_v35 }
0x25aa   :  { %4349 = vadd.xlane.f32.xlu0 %v4348_v31 }
0x25b0   :  { %4105 = vrot.lane.b32.xlu1 %v8339_v41, %s7234_s3 }
0x25b4   :  { %4535 = vrot.lane.b32.xlu1 %v8222_v8, %s7240_s22 }
0x25b8   :  { %4533 = vrot.lane.b32.xlu1 %v8227_v25, %s7240_s22 }
0x25bc   :  { %4531 = vrot.lane.b32.xlu1 %v8230_v36, %s7240_s22 }
0x25c0   :  { %4103 = vrot.lane.b32.xlu0 %v8337_v11, %s7234_s3 }
0x25e5   :  { %v4116_v62 = vpop.permute.xlu1 %4115  ;;  %v4118_v60 = vpop.permute.xlu0 %4117 }
0x25e6   :  { %6737 = vmatprep.subr.mxu0 %v4118_v60 }
0x25e7   :  { %6738 = vmatpush3.msra.mxu0 %v4118_v60 }
0x25e8   :  { %6739 = vmatprep.subr.mxu0 %v4116_v62 }
0x25e9   :  { %v4112_v22 = vpop.permute.xlu1 %4111  ;;  %6740 = vmatpush3.msra.mxu0 %v4116_v62 }
0x25ea   :  { %6741 = vmatprep.subr.mxu0 %v4112_v22 }
0x25eb   :  { %6742 = vmatpush3.msra.mxu0 %v4112_v22 }
0x25ed   :  { %v4110_v23 = vpop.permute.xlu1 %4109 }
0x25ee   :  { %6743 = vmatprep.subr.mxu0 %v4110_v23 }
0x25ef   :  { %6744 = vmatpush3.msra.mxu0 %v4110_v23 }
0x261b   :  { %v4335_v8 = vpop.xlane.xlu0 %4334 }
0x261f   :  { %v4332_v25 = vpop.xlane.xlu0 %4331 }
0x2620   :  { %7031 = vrcp.f32 %v4332_v25 }
0x2621   :  { %7033 = vrcp.f32 %v4335_v8 }
0x2623   :  { %v4341_v57 = vpop.xlane.xlu0 %4340 }
0x2627   :  { %v4338_v36 = vpop.xlane.xlu0 %4337 }
0x2628   :  { %v4344_v14 = vpop.xlane.xlu1 %4343  ;;  %7035 = vrcp.f32 %v4338_v36 }
0x2629   :  { %7037 = vrcp.f32 %v4341_v57 }
0x262a   :  { %7039 = vrcp.f32 %v4344_v14 }
0x262b   :  { %v4347_v2 = vpop.xlane.xlu0 %4346 }
0x262c   :  { %v4106_v12 = vpop.permute.xlu1 %4105  ;;  %7041 = vrcp.f32 %v4347_v2 }
0x262d   :  { %v7032_v6 = vpop.eup %7031  ;;  %6745 = vmatprep.subr.mxu0 %v4106_v12 }
0x262e   :  { %6746 = vmatpush3.msra.mxu0 %v4106_v12  ;;  %v4355_v52 = vmul.f32 %v7032_v6, %v7018_v48  ;;  %v7034_v4 = vpop.eup %7033 }
0x262f   :  { %v4353_v47 = vpop.xlane.xlu0 %4352  ;;  %v4357_v27 = vmul.f32 %v7034_v4, %v8349_v20 }
0x2630   :  { %6753 = vmatprep.mubr.msk.f32.mxu0 %vm1088_vm9, %v4355_v52  ;;  %v4536_v37 = vpop.permute.xlu1 %4535 }
0x2633   :  { %v4350_v61 = vpop.xlane.xlu0 %4349 }
0x2634   :  { %7043 = vrcp.f32 %v4350_v61  ;;  %v4534_v21 = vpop.permute.xlu1 %4533  ;;  %v8434_v61 = vld [vmem:[#allocation8 + $0xa8] sm:$0xff] }
0x2635   :  { %7045 = vrcp.f32 %v4353_v47  ;;  %v7036_v56 = vpop.eup %7035  ;;  %v8429_v47 = vld [vmem:[#allocation8 + $0xb8] sm:$0xff] }
0x2636   :  { %v7038_v59 = vpop.eup %7037  ;;  %v4359_v3 = vmul.f32 %v7036_v56, %v8358_v5 }
0x2637   :  { %v4104_v50 = vpop.permute.xlu0 %4103  ;;  %v7040_v39 = vpop.eup %7039  ;;  %v4361_v16 = vmul.f32 %v7038_v59, %v8354_v49 }
0x2638   :  { %6747 = vmatprep.subr.mxu0 %v4104_v50  ;;  %v4363_v44 = vmul.f32 %v7040_v39, %v8360_v17  ;;  %v4532_v42 = vpop.permute.xlu1 %4531 }
0x2639   :  { %6748 = vmatpush3.msra.mxu0 %v4104_v50  ;;  %v7042_v34 = vpop.eup %7041  ;;  %v8436_v50 = vld [vmem:[#allocation8 + $0xb0] sm:$0xff] }
0x263a   :  { %6749 = vmatprep.subr.mxu0 %v8339_v41  ;;  %v4365_v43 = vmul.f32 %v7042_v34, %v8364_v46 }
0x263b   :  { %6750 = vmatpush3.msra.mxu0 %v8339_v41 }
0x263c   :  { %6751 = vmatprep.subr.mxu0 %v8337_v11 }
0x263d   :  { %6752 = vmatpush3.msra.mxu0 %v8337_v11 }
0x263e   :  { %6754 = vmatmul.mubr.msk.f32.vlgmr.msra.gmra.mxu0 %vm1088_vm9, %v4357_v27  ;;  %6765 = vmatprep.subr.mxu0 %v4536_v37 }
0x263f   :  { %6756 = vmatprep.mubr.msk.f32.mxu0 %vm1088_vm9, %v4359_v3  ;;  %6766 = vmatpush3.msra.mxu0 %v4536_v37 }
0x2640   :  { %6767 = vmatprep.subr.mxu0 %v4534_v21 }
0x2641   :  { %v7044_v41 = vpop.eup %7043  ;;  %6768 = vmatpush3.msra.mxu0 %v4534_v21 }
0x2642   :  { %6757 = vmatmul.mubr.msk.f32.gmra.mxu0 %vm1088_vm9, %v4361_v16  ;;  %v7046_v11 = vpop.eup %7045  ;;  %v4367_v55 = vmul.f32 %v7044_v41, %v8374_v30  ;;  %6769 = vmatprep.subr.mxu0 %v4532_v42 }
0x2643   :  { %6759 = vmatprep.mubr.msk.f32.mxu0 %vm1088_vm9, %v4363_v44  ;;  %v4369_v20 = vmul.f32 %v7046_v11, %v8370_v53  ;;  %6770 = vmatpush3.msra.mxu0 %v4532_v42  ;;  %v8461_v11 = vld [vmem:[#allocation8 + $0x145] ss:$0 sm:$0xff] }
0x2646   :  { %6760 = vmatmul.mubr.msk.f32.gmra.mxu0 %vm1088_vm9, %v4365_v43  ;;  %v8457_v43 = vld [vmem:[#allocation8 + $0x14a] ss:$0 sm:$0xff] }
0x2647   :  { %6762 = vmatprep.mubr.msk.f32.mxu0 %vm1088_vm9, %v4367_v55 }
0x264a   :  { %6763 = vmatmul.mubr.msk.f32.gmra.mxu0 %vm1088_vm9, %v4369_v20 }
0x26fe   :  { %v6755_v48 = vpop.f32.mrf.mxu0 }
0x2700   :  { %v4460_v26 = vpop.f32.mrf.mxu0 }
0x2702   :  { %v6758_v9 = vpop.f32.mrf.mxu0 }
0x2703   :  { %4503 = vrot.lane.b32.xlu1 %v6758_v9, %s7230_s14 }
0x2704   :  { %v4470_v49 = vpop.f32.mrf.mxu0 }
0x2706   :  { %v6761_v63 = vpop.f32.mrf.mxu0 }
0x2707   :  { %4501 = vrot.lane.b32.xlu1 %v4470_v49, %s7230_s14 }
0x2708   :  { %v4480_v5 = vpop.f32.mrf.mxu0 }
0x2709   :  { %4509 = vrot.lane.b32.xlu0 %v4480_v5, %s7242_s24 }
0x270a   :  { %v6764_v17 = vpop.f32.mrf.mxu0 }
0x270b   :  { %4511 = vrot.lane.b32.xlu1 %v6761_v63, %s7242_s24 }
0x270c   :  { %v4490_v51 = vpop.f32.mrf.mxu0 }
0x270d   :  { %4517 = vrot.lane.b32.xlu0 %v4490_v51, %s7241_s23 }
0x270f   :  { %4529 = vrot.lane.b32.xlu1 %v8233_v28, %s7240_s22 }
0x2711   :  { %4519 = vrot.lane.b32.xlu0 %v6764_v17, %s7241_s23 }
0x2713   :  { %4541 = vrot.lane.b32.xlu1 %v8253_v45, %s7240_s22 }
0x2775   :  { %v4504_v46 = vpop.permute.xlu1 %4503 }
0x2776   :  { %v4524_v28 = vsel %vm636_vm8, %v6755_v48, %v4504_v46 }
0x2779   :  { %v4502_v19 = vpop.permute.xlu1 %4501 }
0x277a   :  { %v4523_v53 = vsel %vm636_vm8, %v4460_v26, %v4502_v19 }
0x277b   :  { %v4510_v54 = vpop.permute.xlu0 %4509 }
0x277c   :  { %v4525_v30 = vsel %vm875_vm3, %v4523_v53, %v4510_v54 }
0x277d   :  { %v4512_v35 = vpop.permute.xlu1 %4511 }
0x277e   :  { %v4526_v22 = vsel %vm875_vm3, %v4524_v28, %v4512_v35 }
0x277f   :  { %v4518_v31 = vpop.permute.xlu0 %4517 }
0x2780   :  { %v4527_v62 = vsel %vm732_vm15, %v4525_v30, %v4518_v31 }
0x2781   :  { %v4530_v60 = vpop.permute.xlu1 %4529  ;;  %6773 = vmatprep.mubr.msk.f32.mxu0 %vm424_vm6, %v4527_v62 }
0x2782   :  { %6771 = vmatprep.subr.mxu0 %v4530_v60 }
0x2783   :  { %6772 = vmatpush3.msra.mxu0 %v4530_v60  ;;  %v4520_v45 = vpop.permute.xlu0 %4519 }
0x2784   :  { %v4528_v23 = vsel %vm732_vm15, %v4526_v22, %v4520_v45  ;;  %6776 = vmatprep.subr.mxu0 %v8429_v47 }
0x2785   :  { %6774 = vmatmul.mubr.msk.f32.vlgmr.msra.gmra.mxu0 %vm424_vm6, %v4528_v23  ;;  %v4542_v8 = vpop.permute.xlu1 %4541 }
0x2786   :  { %6777 = vmatpush3.msra.mxu0 %v8429_v47 }
0x2787   :  { %6778 = vmatprep.subr.mxu0 %v8436_v50 }
0x2788   :  { %6779 = vmatpush3.msra.mxu0 %v8436_v50 }
0x2789   :  { %6780 = vmatprep.subr.mxu0 %v8434_v61 }
0x278a   :  { %6781 = vmatpush3.msra.mxu0 %v8434_v61 }
0x2845   :  { %v6775_v25 = vpop.f32.mrf.mxu0 }
0x2846   :  { %v4622_v57 = vadd.f32 %v6775_v25, %v4542_v8 }
0x2847   :  { %v4616_v36 = vpop.f32.mrf.mxu0 }
0x2848   :  { %v4626_v14 = vadd.f32 %v4622_v57, %v8239_v24  ;;  %v4617_v2 = vadd.f32 %v4616_v36, %v4542_v8  ;;  %v8445_v24 = vld [vmem:[#allocation8 + $0xa0] sm:$0xff] }
0x2849   :  { %6782 = vmatprep.subr.mxu0 %v8445_v24 }
0x284a   :  { %v4625_v12 = vadd.f32 %v4617_v2, %v8241_v13  ;;  %v4631_v6 = vsel %vm424_vm6, %v4626_v14, 0.0  ;;  %6783 = vmatpush3.msra.mxu0 %v8445_v24 }
0x284b   :  { %4632 = vadd.xlane.f32.xlu1 %v4631_v6  ;;  %6798 = vmatprep.subr.mxu0 %v7231_v0 }
0x284c   :  { %v4628_v52 = vsel %vm424_vm6, %v4625_v12, 0.0 }
0x284d   :  { %4629 = vadd.xlane.f32.xlu0 %v4628_v52 }
0x285c   :  { %4768 = vrot.lane.b32.xlu1 %v8429_v47, %s7236_s20 }
0x2860   :  { %4764 = vrot.lane.b32.xlu1 %v8434_v61, %s7236_s20 }
0x2864   :  { %4762 = vrot.lane.b32.xlu1 %v8445_v24, %s7236_s20 }
0x2868   :  { %4775 = vrot.lane.b32.xlu1 %v8461_v11, %s7236_s20 }
0x28d4   :  { %v4633_v13 = vpop.xlane.xlu1 %4632 }
0x28d5   :  { %v4635_v4 = vmul.f32 0.03125, %v4633_v13 }
0x28d6   :  { %v4630_v56 = vpop.xlane.xlu0 %4629 }
0x28d7   :  { %v4637_v27 = vsub.f32 %v4626_v14, %v4635_v4  ;;  %v4634_v59 = vmul.f32 0.03125, %v4630_v56 }
0x28d8   :  { %v4769_v41 = vpop.permute.xlu1 %4768 }
0x28d9   :  { %v4636_v3 = vsub.f32 %v4625_v12, %v4634_v59  ;;  %v4639_v39 = vmul.f32 %v4637_v27, %v4637_v27  ;;  %6788 = vmatpush3.msra.mxu1 %v4769_v41 }
0x28da   :  { %6789 = vmatprep.subr.mxu1 %v7231_v0 }
0x28db   :  { %v4643_v16 = vsel %vm424_vm6, %v4639_v39, 0.0  ;;  %v4638_v34 = vmul.f32 %v4636_v3, %v4636_v3 }
0x28dc   :  { %4644 = vadd.xlane.f32.xlu0 %v4643_v16  ;;  %v4765_v42 = vpop.permute.xlu1 %4764 }
0x28dd   :  { %v4640_v44 = vsel %vm424_vm6, %v4638_v34, 0.0 }
0x28e0   :  { %4641 = vadd.xlane.f32.xlu0 %v4640_v44  ;;  %v4763_v49 = vpop.permute.xlu1 %4762 }
0x28f6   :  { %4766 = vrot.lane.b32.xlu0 %v8436_v50, %s7236_s20 }
0x28fa   :  { %4661 = vrot.lane.b32.xlu0 %v8457_v43, %s7236_s20 }
0x2965   :  { %v4645_v55 = vpop.xlane.xlu0 %4644 }
0x2966   :  { %v4647_v20 = vmul.f32 0.03125, %v4645_v55 }
0x2968   :  { %v4649_v37 = vadd.f32 1e-05, %v4647_v20 }
0x2969   :  { %v4642_v21 = vpop.xlane.xlu0 %4641 }
0x296a   :  { %7047 = vrsqrt.f32 %v4649_v37  ;;  %v4646_v48 = vmul.f32 0.03125, %v4642_v21 }
0x296c   :  { %v4648_v26 = vadd.f32 1e-05, %v4646_v48 }
0x296d   :  { %v4767_v9 = vpop.permute.xlu0 %4766 }
0x296e   :  { %7049 = vrsqrt.f32 %v4648_v26  ;;  %6790 = vmatpush3.msra.mxu1 %v4767_v9 }
0x296f   :  { %6791 = vmatprep.subr.mxu1 %v7231_v0 }
0x2970   :  { %6792 = vmatpush3.msra.mxu1 %v4765_v42 }
0x2971   :  { %6793 = vmatprep.subr.mxu1 %v7231_v0  ;;  %v4662_v19 = vpop.permute.xlu0 %4661 }
0x2972   :  { %6794 = vmatpush3.msra.mxu1 %v4763_v49 }
0x2973   :  { %6796 = vmatmul.mubr.msk.f32.vlgmr.msra.gmra.mxu1 %vm424_vm6, %v8028_v40  ;;  %v4776_v40 = vpop.permute.xlu1 %4775 }
0x2977   :  { %v7048_v63 = vpop.eup %7047 }
0x2978   :  { %v4653_v5 = vmul.f32 %v7048_v63, %v4637_v27 }
0x297a   :  { %v4659_v51 = vmul.f32 %v8457_v43, %v4653_v5 }
0x297b   :  { %v7050_v17 = vpop.eup %7049 }
0x297c   :  { %v4652_v46 = vmul.f32 %v7050_v17, %v4636_v3  ;;  %v8471_v53 = vadd.f32 %v4662_v19, %v4659_v51 }
0x297e   :  { %v4658_v54 = vmul.f32 %v8457_v43, %v4652_v46  ;;  %v4667_v31 = vadd.f32 %v8243_v15, %v8471_v53 }
0x2980   :  { %v8473_v35 = vadd.f32 %v4662_v19, %v4658_v54 }
0x2982   :  { %v4666_v30 = vadd.f32 %v8243_v15, %v8473_v35 }
0x2984   :  { %6784 = vmatprep.mubr.msk.f32.mxu0 %vm424_vm6, %v4666_v30 }
0x2985   :  { %6785 = vmatmul.mubr.msk.f32.vlgmr.msra.gmra.mxu0 %vm424_vm6, %v4667_v31 }
0x2986   :  { %6806 = vmatprep.mubr.msk.f32.mxu0 %vm7232_vm0, %v7231_v0 }
0x2a33   :  { %v4844_v62 = vpop.f32.mrf.mxu1 }
0x2a34   :  { %v4845_v60 = vadd.f32 %v4844_v62, %v4776_v40 }
0x2a35   :  { %v6797_v28 = vpop.f32.mrf.mxu1 }
0x2a36   :  { %v4970_v22 = vrot.slane %v4845_v60, 6  ;;  %v4966_v45 = vrot.slane %v4845_v60, 4  ;;  %v4962_v23 = vrot.slane %v4845_v60, 2 }
0x2a38   :  { %4971 = vrot.lane.b32.xlu1 %v4970_v22, %s7235_s19  ;;  %4967 = vrot.lane.b32.xlu0 %v4966_v45, %s7233_s0 }
0x2a3c   :  { %4963 = vrot.lane.b32.xlu0 %v4962_v23, %s7234_s3 }
0x2a45   :  { %v6786_v15 = vpop.f32.mrf.mxu0 }
0x2a46   :  { %v4755_v8 = vadd.f32 %v6786_v15, %v8461_v11 }
0x2a47   :  { %v4749_v25 = vpop.f32.mrf.mxu0 }
0x2a48   :  { %v4750_v57 = vadd.f32 %v8461_v11, %v4749_v25  ;;  %4937 = vrot.lane.b32.xlu0 %v4755_v8, %s7234_s3  ;;  %v4954_v4 = vmul.f32 0.35355338, %v4755_v8 }
0x2a4a   :  { %4935 = vrot.lane.b32.xlu1 %v4750_v57, %s7234_s3  ;;  %v4953_v36 = vmul.f32 0.35355338, %v4750_v57 }
0x2a4c   :  { %4943 = vrot.lane.b32.xlu0 %v4755_v8, %s7233_s0  ;;  %6815 = vmatprep.mubr.msk.f32.mxu1 %vm636_vm8, %v4953_v36 }
0x2a4e   :  { %4941 = vrot.lane.b32.xlu1 %v4750_v57, %s7233_s0 }
0x2a50   :  { %4949 = vrot.lane.b32.xlu0 %v4755_v8, %s7235_s19 }
0x2a52   :  { %4947 = vrot.lane.b32.xlu1 %v4750_v57, %s7235_s19 }
0x2a54   :  { %4852 = vrot.lane.b32.xlu0 %v8436_v50, %s7237_s21 }
0x2a56   :  { %4854 = vrot.lane.b32.xlu1 %v8429_v47, %s7237_s21 }
0x2a58   :  { %4848 = vrot.lane.b32.xlu0 %v8445_v24, %s7237_s21 }
0x2a5a   :  { %4850 = vrot.lane.b32.xlu1 %v8434_v61, %s7237_s21 }
0x2aaa   :  { %v4972_v14 = vpop.permute.xlu1 %4971  ;;  %v4968_v2 = vpop.permute.xlu0 %4967 }
0x2aab   :  { %v4976_v12 = vsel %vm93_vm2, %v4968_v2, %v4972_v14 }
0x2aac   :  { %6809 = vmatprep.subr.msk.mxu1 %vm636_vm8, %v4976_v12 }
0x2aad   :  { %6810 = vmatpush3.xpose.msk.msra.mxu1 %vm636_vm8, %v4976_v12 }
0x2aae   :  { %v4964_v6 = vpop.permute.xlu0 %4963 }
0x2aaf   :  { %v4975_v52 = vsel %vm97_vm4, %v4964_v6, %v4968_v2  ;;  %v4974_v13 = vsel %vm604_vm7, %v4845_v60, %v4964_v6 }
0x2ab0   :  { %6811 = vmatprep.subr.msk.mxu1 %vm636_vm8, %v4975_v52 }
0x2ab1   :  { %6812 = vmatpush3.xpose.msk.msra.mxu1 %vm636_vm8, %v4975_v52 }
0x2ab2   :  { %6813 = vmatprep.subr.msk.mxu1 %vm636_vm8, %v4974_v13 }
0x2ab5   :  { %6814 = vmatpush3.xpose.msk.msra.mxu1 %vm636_vm8, %v4974_v13 }
0x2ab8   :  { %6816 = vmatmul.mubr.msk.f32.vlgmr.msra.gmra.mxu1 %vm636_vm8, %v4954_v4 }
0x2aba   :  { %v4938_v56 = vpop.permute.xlu0 %4937 }
0x2abb   :  { %v4956_v3 = vmul.f32 0.35355338, %v4938_v56 }
0x2abc   :  { %v4936_v27 = vpop.permute.xlu1 %4935 }
0x2abd   :  { %v4955_v59 = vmul.f32 0.35355338, %v4936_v27 }
0x2abe   :  { %v4944_v39 = vpop.permute.xlu0 %4943 }
0x2abf   :  { %6818 = vmatprep.mubr.msk.f32.mxu1 %vm636_vm8, %v4955_v59  ;;  %v4958_v44 = vmul.f32 0.35355338, %v4944_v39 }
0x2ac0   :  { %v4942_v16 = vpop.permute.xlu1 %4941  ;;  %6819 = vmatmul.mubr.msk.f32.gmra.mxu1 %vm636_vm8, %v4956_v3 }
0x2ac1   :  { %v4957_v34 = vmul.f32 0.35355338, %v4942_v16 }
0x2ac2   :  { %v4950_v41 = vpop.permute.xlu0 %4949 }
0x2ac3   :  { %6821 = vmatprep.mubr.msk.f32.mxu1 %vm636_vm8, %v4957_v34  ;;  %v4960_v37 = vmul.f32 0.35355338, %v4950_v41 }
0x2ac4   :  { %v4948_v55 = vpop.permute.xlu1 %4947  ;;  %6822 = vmatmul.mubr.msk.f32.gmra.mxu1 %vm636_vm8, %v4958_v44 }
0x2ac5   :  { %v4959_v20 = vmul.f32 0.35355338, %v4948_v55 }
0x2ac6   :  { %v4853_v21 = vpop.permute.xlu0 %4852 }
0x2ac7   :  { %6824 = vmatprep.mubr.msk.f32.mxu1 %vm636_vm8, %v4959_v20 }
0x2ac8   :  { %v4855_v42 = vpop.permute.xlu1 %4854  ;;  %6825 = vmatmul.mubr.msk.f32.gmra.mxu1 %vm636_vm8, %v4960_v37 }
0x2ac9   :  { %6799 = vmatpush3.msra.mxu0 %v4855_v42 }
0x2aca   :  { %6800 = vmatprep.subr.mxu0 %v7231_v0  ;;  %v4849_v26 = vpop.permute.xlu0 %4848 }
0x2acb   :  { %6801 = vmatpush3.msra.mxu0 %v4853_v21 }
0x2acc   :  { %v4851_v48 = vpop.permute.xlu1 %4850  ;;  %6802 = vmatprep.subr.mxu0 %v7231_v0 }
0x2acd   :  { %6803 = vmatpush3.msra.mxu0 %v4851_v48 }
0x2ace   :  { %6804 = vmatprep.subr.mxu0 %v7231_v0 }
0x2acf   :  { %6805 = vmatpush3.msra.mxu0 %v4849_v26 }
0x2ad0   :  { %6807 = vmatmul.mubr.msk.f32.vlgmr.msra.gmra.mxu0 %vm424_vm6, %v8024_v7 }
0x2b78   :  { %v6817_v9 = vpop.f32.mrf.mxu1 }
0x2b79   :  { %v5098_v49 = vadd.f32 %v6817_v9, %v8084_v10 }
0x2b7a   :  { %v5092_v63 = vpop.f32.mrf.mxu1 }
0x2b7b   :  { %v5093_v5 = vadd.f32 %v5092_v63, %v8087_v33  ;;  %v5134_v17 = vsel %vm732_vm15, %v5098_v49, -inf }
0x2b7c   :  { %5135 = vmax.xlane.f32.xlu0 %v5134_v17 }
0x2b7d   :  { %v5131_v51 = vsel %vm732_vm15, %v5093_v5, -inf }
0x2b7e   :  { %5132 = vmax.xlane.f32.xlu1 %v5131_v51 }
0x2b80   :  { %v6820_v46 = vpop.f32.mrf.mxu1 }
0x2b81   :  { %v5108_v19 = vadd.f32 %v6820_v46, %v8099_v18 }
0x2b82   :  { %v5102_v0 = vpop.f32.mrf.mxu1 }
0x2b83   :  { %v5103_v54 = vadd.f32 %v5102_v0, %v8102_v58  ;;  %v5140_v7 = vsel %vm732_vm15, %v5108_v19, -inf }
0x2b84   :  { %5141 = vmax.xlane.f32.xlu1 %v5140_v7  ;;  %v6823_v30 = vpop.f32.mrf.mxu1 }
0x2b85   :  { %v5118_v10 = vadd.f32 %v6823_v30, %v8110_v29  ;;  %v5137_v33 = vsel %vm732_vm15, %v5103_v54, -inf }
0x2b86   :  { %5138 = vmax.xlane.f32.xlu0 %v5137_v33  ;;  %v5112_v31 = vpop.f32.mrf.mxu1 }
0x2b87   :  { %v5113_v40 = vadd.f32 %v5112_v31, %v8113_v1  ;;  %v5146_v62 = vsel %vm732_vm15, %v5118_v10, -inf }
0x2b88   :  { %5147 = vmax.xlane.f32.xlu1 %v5146_v62  ;;  %v6826_v60 = vpop.f32.mrf.mxu1 }
0x2b89   :  { %v5128_v18 = vadd.f32 %v6826_v60, %v8121_v32  ;;  %v5143_v58 = vsel %vm732_vm15, %v5113_v40, -inf }
0x2b8a   :  { %5144 = vmax.xlane.f32.xlu0 %v5143_v58  ;;  %v5122_v28 = vpop.f32.mrf.mxu1 }
0x2b8b   :  { %v5123_v22 = vadd.f32 %v5122_v28, %v8124_v38  ;;  %v5152_v29 = vsel %vm732_vm15, %v5128_v18, -inf }
0x2b8c   :  { %5153 = vmax.xlane.f32.xlu1 %v5152_v29 }
0x2b8d   :  { %v5149_v45 = vsel %vm732_vm15, %v5123_v22, -inf }
0x2b8e   :  { %5150 = vmax.xlane.f32.xlu0 %v5149_v45 }
0x2b90   :  { %v4929_v23 = vpop.f32.mrf.mxu0 }
0x2b92   :  { %v6808_v1 = vpop.f32.mrf.mxu0 }
0x2ba4   :  { %4860 = vrot.lane.b32.xlu0 %v8461_v11, %s7237_s21 }
0x2c05   :  { %v5136_v15 = vpop.xlane.xlu0 %5135 }
0x2c06   :  { %v5156_v8 = vsub.f32 %v5098_v49, %v5136_v15 }
0x2c07   :  { %v5133_v32 = vpop.xlane.xlu1 %5132 }
0x2c08   :  { %v5165_v25 = vmul.f32 1.442695, %v5156_v8  ;;  %v5155_v57 = vsub.f32 %v5093_v5, %v5133_v32 }
0x2c0a   :  { %7051 = vpow2.f32 %v5165_v25  ;;  %v5163_v36 = vmul.f32 1.442695, %v5155_v57 }
0x2c0c   :  { %7053 = vpow2.f32 %v5163_v36 }
0x2c0d   :  { %v5142_v38 = vpop.xlane.xlu1 %5141 }
0x2c0e   :  { %v5158_v14 = vsub.f32 %v5108_v19, %v5142_v38 }
0x2c0f   :  { %v5139_v2 = vpop.xlane.xlu0 %5138 }
0x2c10   :  { %v5169_v12 = vmul.f32 1.442695, %v5158_v14  ;;  %v5157_v6 = vsub.f32 %v5103_v54, %v5139_v2 }
0x2c11   :  { %v5148_v52 = vpop.xlane.xlu1 %5147 }
0x2c12   :  { %7055 = vpow2.f32 %v5169_v12  ;;  %v5167_v13 = vmul.f32 1.442695, %v5157_v6  ;;  %v5160_v4 = vsub.f32 %v5118_v10, %v5148_v52 }
0x2c13   :  { %v5145_v41 = vpop.xlane.xlu0 %5144 }
0x2c14   :  { %7057 = vpow2.f32 %v5167_v13  ;;  %v5173_v56 = vmul.f32 1.442695, %v5160_v4  ;;  %v5159_v49 = vsub.f32 %v5113_v40, %v5145_v41 }
0x2c15   :  { %v5154_v63 = vpop.xlane.xlu1 %5153 }
0x2c16   :  { %7059 = vpow2.f32 %v5173_v56  ;;  %v5171_v5 = vmul.f32 1.442695, %v5159_v49  ;;  %v5162_v17 = vsub.f32 %v5128_v18, %v5154_v63 }
0x2c17   :  { %v8542_v27 = vpop.eup %7051  ;;  %v5151_v21 = vpop.xlane.xlu0 %5150 }
0x2c18   :  { %v5182_v59 = vsel %vm732_vm15, %v8542_v27, 0.0  ;;  %7061 = vpow2.f32 %v5171_v5  ;;  %v5177_v51 = vmul.f32 1.442695, %v5162_v17  ;;  %v5161_v46 = vsub.f32 %v5123_v22, %v5151_v21 }
0x2c19   :  { %v7054_v3 = vpop.eup %7053  ;;  %5183 = vadd.xlane.f32.xlu1 %v5182_v59 }
0x2c1a   :  { %v5179_v39 = vsel %vm732_vm15, %v7054_v3, 0.0  ;;  %7063 = vpow2.f32 %v5177_v51  ;;  %v5175_v19 = vmul.f32 1.442695, %v5161_v46 }
0x2c1b   :  { %v4861_v42 = vpop.permute.xlu0 %4860 }
0x2c1c   :  { %v4930_v48 = vadd.f32 %v4929_v23, %v4861_v42  ;;  %7065 = vpow2.f32 %v5175_v19 }
0x2c1d   :  { %5180 = vadd.xlane.f32.xlu1 %v5179_v39 }
0x2c1e   :  { %v4982_v26 = vrot.slane %v4930_v48, 4  ;;  %v4986_v9 = vrot.slane %v4930_v48, 6  ;;  %v4978_v33 = vrot.slane %v4930_v48, 2 }
0x2c1f   :  { %v8547_v16 = vpop.eup %7055 }
0x2c20   :  { %v5188_v34 = vsel %vm732_vm15, %v8547_v16, 0.0 }
0x2c21   :  { %v8551_v44 = vpop.eup %7057  ;;  %5189 = vadd.xlane.f32.xlu1 %v5188_v34 }
0x2c22   :  { %v5185_v37 = vsel %vm732_vm15, %v8551_v44, 0.0 }
0x2c23   :  { %v8553_v55 = vpop.eup %7059 }
0x2c24   :  { %v5194_v20 = vsel %vm732_vm15, %v8553_v55, 0.0 }
0x2c25   :  { %5195 = vadd.xlane.f32.xlu0 %v5194_v20  ;;  %5186 = vadd.xlane.f32.xlu1 %v5185_v37  ;;  %v7062_v0 = vpop.eup %7061 }
0x2c26   :  { %v5191_v54 = vsel %vm732_vm15, %v7062_v0, 0.0 }
0x2c27   :  { %v7064_v7 = vpop.eup %7063 }
0x2c28   :  { %v5200_v30 = vsel %vm732_vm15, %v7064_v7, 0.0 }
0x2c29   :  { %v7066_v10 = vpop.eup %7065 }
0x2c36   :  { %4983 = vrot.lane.b32.xlu1 %v4982_v26, %s7233_s0 }
0x2c3a   :  { %4987 = vrot.lane.b32.xlu1 %v4986_v9, %s7235_s19 }
0x2c3b   :  { %5384 = vrot.lane.b32.xlu0 %v8429_v47, %s7240_s22  ;;  %v5197_v47 = vsel %vm732_vm15, %v7066_v10, 0.0 }
0x2c5e   :  { %5192 = vadd.xlane.f32.xlu1 %v5191_v54 }
0x2c62   :  { %5201 = vadd.xlane.f32.xlu1 %v5200_v30 }
0x2c66   :  { %5198 = vadd.xlane.f32.xlu1 %v5197_v47 }
0x2c77   :  { %4979 = vrot.lane.b32.xlu1 %v4978_v33, %s7234_s3 }
0x2c7b   :  { %5382 = vrot.lane.b32.xlu1 %v8436_v50, %s7240_s22 }
0x2c7f   :  { %5380 = vrot.lane.b32.xlu1 %v8434_v61, %s7240_s22 }
0x2ca2   :  { %v5184_v31 = vpop.xlane.xlu1 %5183 }
0x2ca6   :  { %v5181_v40 = vpop.xlane.xlu1 %5180 }
0x2ca7   :  { %7067 = vrcp.f32 %v5181_v40 }
0x2ca8   :  { %7069 = vrcp.f32 %v5184_v31 }
0x2caa   :  { %v5190_v62 = vpop.xlane.xlu1 %5189 }
0x2cae   :  { %v5187_v60 = vpop.xlane.xlu1 %5186  ;;  %v5196_v45 = vpop.xlane.xlu0 %5195 }
0x2caf   :  { %7071 = vrcp.f32 %v5187_v60  ;;  %v7105_v60 = vld [vmem:[#allocation8 + $0xf8] sm:$0xff] }
0x2cb0   :  { %7073 = vrcp.f32 %v5190_v62  ;;  %v7104_v62 = vld [vmem:[#allocation8 + $0xf0] sm:$0xff] }
0x2cb2   :  { %v4984_v18 = vpop.permute.xlu1 %4983 }
0x2cb4   :  { %v7068_v58 = vpop.eup %7067 }
0x2cb5   :  { %v5204_v28 = vmul.f32 %v7068_v58, %v7054_v3  ;;  %v7070_v15 = vpop.eup %7069  ;;  %v5385_v3 = vpop.permute.xlu0 %5384 }
0x2cb6   :  { %v4988_v22 = vpop.permute.xlu1 %4987  ;;  %v5206_v57 = vmul.f32 %v7070_v15, %v8542_v27  ;;  %v7106_v15 = vld [vmem:[#allocation8 + $0x138] sm:$0xff] }
0x2cb7   :  { %6833 = vmatprep.mubr.msk.f32.mxu0 %vm732_vm15, %v5204_v28  ;;  %v4992_v29 = vsel %vm93_vm2, %v4984_v18, %v4988_v22 }
0x2cb8   :  { %6827 = vmatprep.subr.mxu0 %v4992_v29 }
0x2cb9   :  { %6828 = vmatpush3.msra.mxu0 %v4992_v29 }
0x2cbc   :  { %v7072_v32 = vpop.eup %7071 }
0x2cbd   :  { %v7074_v36 = vpop.eup %7073  ;;  %v5208_v38 = vmul.f32 %v7072_v32, %v8551_v44  ;;  %v7108_v32 = vld [vmem:[#allocation8 + $0x128] sm:$0xff] }
0x2cbe   :  { %v5210_v2 = vmul.f32 %v7074_v36, %v8547_v16  ;;  %v7111_v36 = vld [vmem:[#allocation8 + $0x130] sm:$0xff] }
0x2ce7   :  { %v5193_v50 = vpop.xlane.xlu1 %5192 }
0x2ce8   :  { %7075 = vrcp.f32 %v5193_v50 }
0x2ce9   :  { %7077 = vrcp.f32 %v5196_v45 }
0x2ceb   :  { %v5202_v61 = vpop.xlane.xlu1 %5201 }
0x2cef   :  { %v5199_v23 = vpop.xlane.xlu1 %5198 }
0x2cf0   :  { %7079 = vrcp.f32 %v5199_v23 }
0x2cf1   :  { %7081 = vrcp.f32 %v5202_v61 }
0x2cf3   :  { %v4980_v1 = vpop.permute.xlu1 %4979 }
0x2cf4   :  { %v4991_v8 = vsel %vm97_vm4, %v4980_v1, %v4984_v18  ;;  %v4990_v25 = vsel %vm604_vm7, %v4930_v48, %v4980_v1 }
0x2cf5   :  { %6829 = vmatprep.subr.mxu0 %v4991_v8  ;;  %v7076_v14 = vpop.eup %7075 }
0x2cf6   :  { %6830 = vmatpush3.msra.mxu0 %v4991_v8  ;;  %v7078_v12 = vpop.eup %7077  ;;  %v5212_v6 = vmul.f32 %v7076_v14, %v7062_v0  ;;  %v7107_v8 = vld [vmem:[#allocation8 + $0xe8] sm:$0xff]  ;;  %v7114_v14 = vld [vmem:[#allocation8 + $0x110] sm:$0xff] }
0x2cf7   :  { %6831 = vmatprep.subr.mxu0 %v4990_v25  ;;  %v5214_v13 = vmul.f32 %v7078_v12, %v8553_v55  ;;  %v5383_v59 = vpop.permute.xlu1 %5382 }
0x2cf8   :  { %6832 = vmatpush3.msra.mxu0 %v4990_v25  ;;  %v7109_v25 = vld [vmem:[#allocation8 + $0xe0] sm:$0xff] }
0x2cf9   :  { %6834 = vmatmul.mubr.msk.f32.vlgmr.msra.gmra.mxu0 %vm732_vm15, %v5206_v57  ;;  %6845 = vmatprep.subr.mxu0 %v5385_v3  ;;  %v7110_v57 = vld [vmem:[#allocation8 + $0x118] sm:$0xff] }
0x2cfa   :  { %6836 = vmatprep.mubr.msk.f32.mxu0 %vm732_vm15, %v5208_v38  ;;  %6846 = vmatpush3.msra.mxu0 %v5385_v3  ;;  %v7112_v38 = vld [vmem:[#allocation8 + $0x108] sm:$0xff] }
0x2cfb   :  { %6847 = vmatprep.subr.mxu0 %v5383_v59  ;;  %v5381_v39 = vpop.permute.xlu1 %5380 }
0x2cfc   :  { %6848 = vmatpush3.msra.mxu0 %v5383_v59 }
0x2cfd   :  { %v7080_v52 = vpop.eup %7079  ;;  %6837 = vmatmul.mubr.msk.f32.gmra.mxu0 %vm732_vm15, %v5210_v2  ;;  %6849 = vmatprep.subr.mxu0 %v5381_v39  ;;  %v7115_v2 = vld [vmem:[#allocation8 + $0x100] sm:$0xff] }
0x2cfe   :  { %6839 = vmatprep.mubr.msk.f32.mxu0 %vm732_vm15, %v5212_v6  ;;  %v7082_v4 = vpop.eup %7081  ;;  %v5216_v56 = vmul.f32 %v7080_v52, %v7066_v10  ;;  %6850 = vmatpush3.msra.mxu0 %v5381_v39 }
0x2cff   :  { %v5218_v27 = vmul.f32 %v7082_v4, %v7064_v7 }
0x2d01   :  { %6840 = vmatmul.mubr.msk.f32.gmra.mxu0 %vm732_vm15, %v5214_v13 }
0x2d02   :  { %6842 = vmatprep.mubr.msk.f32.mxu0 %vm732_vm15, %v5216_v56 }
0x2d05   :  { %6843 = vmatmul.mubr.msk.f32.gmra.mxu0 %vm732_vm15, %v5218_v27 }
0x2db9   :  { %v6835_v16 = vpop.f32.mrf.mxu0 }
0x2dbb   :  { %v5309_v34 = vpop.f32.mrf.mxu0 }
0x2dbd   :  { %v6838_v44 = vpop.f32.mrf.mxu0 }
0x2dbe   :  { %5352 = vrot.lane.b32.xlu1 %v6838_v44, %s7230_s14 }
0x2dbf   :  { %v5319_v41 = vpop.f32.mrf.mxu0 }
0x2dc1   :  { %v6841_v55 = vpop.f32.mrf.mxu0 }
0x2dc2   :  { %5350 = vrot.lane.b32.xlu1 %v5319_v41, %s7230_s14  ;;  %5360 = vrot.lane.b32.xlu0 %v6841_v55, %s7242_s24 }
0x2dc3   :  { %v5329_v20 = vpop.f32.mrf.mxu0 }
0x2dc5   :  { %v6844_v37 = vpop.f32.mrf.mxu0 }
0x2dc6   :  { %5358 = vrot.lane.b32.xlu1 %v5329_v20, %s7242_s24  ;;  %5378 = vrot.lane.b32.xlu0 %v8445_v24, %s7240_s22 }
0x2dc7   :  { %v5339_v21 = vpop.f32.mrf.mxu0 }
0x2dca   :  { %5366 = vrot.lane.b32.xlu1 %v5339_v21, %s7241_s23  ;;  %5390 = vrot.lane.b32.xlu0 %v8461_v11, %s7240_s22 }
0x2dce   :  { %5368 = vrot.lane.b32.xlu1 %v6844_v37, %s7241_s23 }
0x2e30   :  { %v5353_v42 = vpop.permute.xlu1 %5352 }
0x2e31   :  { %v5373_v11 = vsel %vm636_vm8, %v6835_v16, %v5353_v42 }
0x2e34   :  { %v5351_v48 = vpop.permute.xlu1 %5350  ;;  %v5361_v26 = vpop.permute.xlu0 %5360 }
0x2e35   :  { %v5372_v63 = vsel %vm636_vm8, %v5309_v34, %v5351_v48  ;;  %v5375_v51 = vsel %vm875_vm3, %v5373_v11, %v5361_v26 }
0x2e38   :  { %v5359_v9 = vpop.permute.xlu1 %5358  ;;  %v5379_v49 = vpop.permute.xlu0 %5378 }
0x2e39   :  { %6851 = vmatprep.subr.mxu0 %v5379_v49  ;;  %v5374_v5 = vsel %vm875_vm3, %v5372_v63, %v5359_v9  ;;  %v5994_v63 = vld [vmem:[#allocation8 + $0x14f] ss:$0 sm:$0xff] }
0x2e3a   :  { %6852 = vmatpush3.msra.mxu0 %v5379_v49 }
0x2e3c   :  { %v5367_v24 = vpop.permute.xlu1 %5366  ;;  %v5391_v0 = vpop.permute.xlu0 %5390 }
0x2e3d   :  { %v5376_v17 = vsel %vm732_vm15, %v5374_v5, %v5367_v24 }
0x2e3e   :  { %6853 = vmatprep.mubr.msk.f32.mxu0 %vm424_vm6, %v5376_v17 }
0x2e40   :  { %v5369_v46 = vpop.permute.xlu1 %5368 }
0x2e41   :  { %v5377_v19 = vsel %vm732_vm15, %v5375_v51, %v5369_v46 }
0x2e42   :  { %6854 = vmatmul.mubr.msk.f32.vlgmr.msra.gmra.mxu0 %vm424_vm6, %v5377_v19 }
0x2f02   :  { %v6855_v54 = vpop.f32.mrf.mxu0 }
0x2f03   :  { %v5471_v7 = vadd.f32 %v6855_v54, %v5391_v0 }
0x2f04   :  { %v5465_v30 = vpop.f32.mrf.mxu0 }
0x2f05   :  { %v5466_v10 = vadd.f32 %v5465_v30, %v5391_v0  ;;  %v5475_v47 = vadd.f32 %v5471_v7, %v8471_v53 }
0x2f07   :  { %v5474_v33 = vadd.f32 %v5466_v10, %v8473_v35  ;;  %v5479_v31 = vsel %vm424_vm6, %v5475_v47, 0.0 }
0x2f08   :  { %5480 = vadd.xlane.f32.xlu0 %v5479_v31 }
0x2f09   :  { %v5476_v40 = vsel %vm424_vm6, %v5474_v33, 0.0 }
0x2f0a   :  { %5477 = vadd.xlane.f32.xlu1 %v5476_v40 }
0x2f1b   :  { %5525 = vrot.lane.b32.xlu1 %v7104_v62, %s7237_s21 }
0x2f1e   :  { %5527 = vrot.lane.b32.xlu0 %v7105_v60, %s7237_s21 }
0x2f1f   :  { %5502 = vrot.lane.b32.xlu1 %v8457_v43, %s7237_s21 }
0x2f91   :  { %v5481_v18 = vpop.xlane.xlu0 %5480 }
0x2f92   :  { %v5483_v58 = vmul.f32 0.03125, %v5481_v18  ;;  %v5999_v18 = vld [vmem:[#allocation8 + $0x14b] ss:$0 sm:$0xff] }
0x2f93   :  { %v5478_v53 = vpop.xlane.xlu1 %5477 }
0x2f94   :  { %v8612_v28 = vsub.f32 %v5475_v47, %v5483_v58  ;;  %v5482_v35 = vmul.f32 0.03125, %v5478_v53  ;;  %v7116_v58 = vld [vmem:[#allocation8 + $0x150] ss:$0 sm:$0xff] }
0x2f95   :  { %v5528_v22 = vpop.permute.xlu0 %5527 }
0x2f96   :  { %v8614_v29 = vsub.f32 %v5474_v33, %v5482_v35  ;;  %v5487_v50 = vmul.f32 %v8612_v28, %v8612_v28  ;;  %6856 = vmatprep.subr.mxu1 %v5528_v22 }
0x2f97   :  { %6857 = vmatpush3.msra.mxu1 %v5528_v22  ;;  %v5526_v61 = vpop.permute.xlu1 %5525 }
0x2f98   :  { %v5491_v45 = vsel %vm424_vm6, %v5487_v50, 0.0  ;;  %v5486_v23 = vmul.f32 %v8614_v29, %v8614_v29  ;;  %6858 = vmatprep.subr.mxu1 %v5526_v61 }
0x2f99   :  { %5492 = vadd.xlane.f32.xlu1 %v5491_v45  ;;  %6859 = vmatpush3.msra.mxu1 %v5526_v61 }
0x2f9a   :  { %v5488_v1 = vsel %vm424_vm6, %v5486_v23, 0.0 }
0x2f9b   :  { %5489 = vadd.xlane.f32.xlu0 %v5488_v1  ;;  %v5503_v12 = vpop.permute.xlu1 %5502 }
0x2faa   :  { %5507 = vrot.lane.b32.xlu1 %v8457_v43, %s7240_s22  ;;  %v7113_v43 = vld [vmem:[#allocation8 + $0x120] sm:$0xff] }
0x2fae   :  { %5630 = vrot.lane.b32.xlu1 %v7106_v15, %s7240_s22 }
0x2fb1   :  { %5523 = vrot.lane.b32.xlu0 %v7107_v8, %s7237_s21 }
0x2fb2   :  { %5626 = vrot.lane.b32.xlu1 %v7108_v32, %s7240_s22 }
0x2fb5   :  { %5521 = vrot.lane.b32.xlu0 %v7109_v25, %s7237_s21 }
0x2fb6   :  { %5622 = vrot.lane.b32.xlu1 %v7110_v57, %s7240_s22 }
0x2fb9   :  { %5628 = vrot.lane.b32.xlu0 %v7111_v36, %s7240_s22 }
0x2fba   :  { %5618 = vrot.lane.b32.xlu1 %v7112_v38, %s7240_s22 }
0x2fbd   :  { %5624 = vrot.lane.b32.xlu0 %v7113_v43, %s7240_s22 }
0x2fbe   :  { %5641 = vrot.lane.b32.xlu1 %v5994_v63, %s7237_s21 }
0x2fc1   :  { %5620 = vrot.lane.b32.xlu0 %v7114_v14, %s7240_s22 }
0x2fc5   :  { %5616 = vrot.lane.b32.xlu0 %v7115_v2, %s7240_s22 }
0x3022   :  { %v5493_v6 = vpop.xlane.xlu1 %5492 }
0x3023   :  { %v5495_v52 = vmul.f32 0.03125, %v5493_v6 }
0x3024   :  { %v5490_v13 = vpop.xlane.xlu0 %5489 }
0x3025   :  { %v5497_v4 = vadd.f32 1e-05, %v5495_v52  ;;  %v5494_v56 = vmul.f32 0.03125, %v5490_v13 }
0x3026   :  { %v5508_v27 = vpop.permute.xlu1 %5507 }
0x3027   :  { %7083 = vrsqrt.f32 %v5497_v4  ;;  %v5496_v59 = vadd.f32 1e-05, %v5494_v56 }
0x3028   :  { %v5524_v3 = vpop.permute.xlu0 %5523 }
0x3029   :  { %7085 = vrsqrt.f32 %v5496_v59  ;;  %6860 = vmatprep.subr.mxu1 %v5524_v3 }
0x302a   :  { %6861 = vmatpush3.msra.mxu1 %v5524_v3  ;;  %v5631_v39 = vpop.permute.xlu1 %5630 }
0x302b   :  { %6867 = vmatprep.subr.mxu0 %v5631_v39 }
0x302c   :  { %v5522_v16 = vpop.permute.xlu0 %5521  ;;  %6868 = vmatpush3.msra.mxu0 %v5631_v39 }
0x302d   :  { %6862 = vmatprep.subr.mxu1 %v5522_v16 }
0x302e   :  { %6863 = vmatpush3.msra.mxu1 %v5522_v16  ;;  %v5627_v34 = vpop.permute.xlu1 %5626 }
0x3030   :  { %v5629_v44 = vpop.permute.xlu0 %5628 }
0x3031   :  { %6869 = vmatprep.subr.mxu0 %v5629_v44 }
0x3032   :  { %6870 = vmatpush3.msra.mxu0 %v5629_v44  ;;  %v5623_v20 = vpop.permute.xlu1 %5622 }
0x3033   :  { %6871 = vmatprep.subr.mxu0 %v5627_v34 }
0x3034   :  { %v7084_v41 = vpop.eup %7083  ;;  %v5625_v55 = vpop.permute.xlu0 %5624  ;;  %6872 = vmatpush3.msra.mxu0 %v5627_v34 }
0x3035   :  { %v5501_v37 = vmul.f32 %v7084_v41, %v8612_v28  ;;  %6873 = vmatprep.subr.mxu0 %v5625_v55 }
0x3036   :  { %v7086_v21 = vpop.eup %7085  ;;  %6874 = vmatpush3.msra.mxu0 %v5625_v55  ;;  %v5619_v24 = vpop.permute.xlu1 %5618 }
0x3037   :  { %v5500_v42 = vmul.f32 %v7086_v21, %v8614_v29  ;;  %6875 = vmatprep.subr.mxu0 %v5623_v20  ;;  %v5506_v48 = vmul.f32 %v5503_v12, %v5501_v37 }
0x3038   :  { %6876 = vmatpush3.msra.mxu0 %v5623_v20  ;;  %v5621_v5 = vpop.permute.xlu0 %5620 }
0x3039   :  { %v5505_v26 = vmul.f32 %v5503_v12, %v5500_v42  ;;  %v5511_v49 = vadd.f32 %v5508_v27, %v5506_v48  ;;  %6877 = vmatprep.subr.mxu0 %v5621_v5 }
0x303a   :  { %6878 = vmatpush3.msra.mxu0 %v5621_v5  ;;  %v5642_v7 = vpop.permute.xlu1 %5641 }
0x303b   :  { %v5510_v9 = vadd.f32 %v5508_v27, %v5505_v26  ;;  %6879 = vmatprep.subr.mxu0 %v5619_v24 }
0x303c   :  { %v5617_v17 = vpop.permute.xlu0 %5616  ;;  %6880 = vmatpush3.msra.mxu0 %v5619_v24 }
0x303d   :  { %6864 = vmatprep.mubr.msk.f32.mxu1 %vm424_vm6, %v5510_v9  ;;  %6881 = vmatprep.subr.mxu0 %v5617_v17 }
0x303e   :  { %6865 = vmatmul.mubr.msk.f32.vlgmr.msra.gmra.mxu1 %vm424_vm6, %v5511_v49  ;;  %6882 = vmatpush3.msra.mxu0 %v5617_v17 }
0x30fe   :  { %v6866_v11 = vpop.f32.mrf.mxu1 }
0x30ff   :  { %v5611_v51 = vadd.f32 %v6866_v11, %v5994_v63 }
0x3100   :  { %v5605_v46 = vpop.f32.mrf.mxu1 }
0x3101   :  { %v5606_v19 = vadd.f32 %v5994_v63, %v5605_v46  ;;  %v5615_v54 = vmax.f32 %v5611_v51, 0.0 }
0x3103   :  { %v5614_v0 = vmax.f32 %v5606_v19, 0.0 }
0x3105   :  { %6883 = vmatprep.mubr.msk.f32.mxu0 %vm1088_vm9, %v5614_v0 }
0x3106   :  { %6884 = vmatmul.mubr.msk.f32.vlgmr.msra.gmra.mxu0 %vm1088_vm9, %v5615_v54 }
0x31c6   :  { %v6885_v30 = vpop.f32.mrf.mxu0 }
0x31c7   :  { %v5722_v10 = vadd.f32 %v6885_v30, %v5642_v7 }
0x31c8   :  { %v5716_v47 = vpop.f32.mrf.mxu0 }
0x31c9   :  { %v5717_v33 = vadd.f32 %v5716_v47, %v5642_v7  ;;  %v5726_v31 = vadd.f32 %v5722_v10, %v5511_v49 }
0x31cb   :  { %v5725_v40 = vadd.f32 %v5717_v33, %v5510_v9  ;;  %v5731_v62 = vsel %vm424_vm6, %v5726_v31, 0.0 }
0x31cc   :  { %5732 = vadd.xlane.f32.xlu1 %v5731_v62 }
0x31cd   :  { %v5728_v60 = vsel %vm424_vm6, %v5725_v40, 0.0 }
0x31ce   :  { %5729 = vadd.xlane.f32.xlu0 %v5728_v60 }
0x31dd   :  { %5761 = vrot.lane.b32.xlu1 %v5999_v18, %s7236_s20 }
0x31e1   :  { %5792 = vrot.lane.b32.xlu1 %v7116_v58, %s7237_s21 }
0x3255   :  { %v5733_v53 = vpop.xlane.xlu1 %5732 }
0x3256   :  { %v5735_v28 = vmul.f32 0.03125, %v5733_v53 }
0x3257   :  { %v5730_v35 = vpop.xlane.xlu0 %5729 }
0x3258   :  { %v5734_v22 = vmul.f32 0.03125, %v5730_v35  ;;  %v5737_v29 = vsub.f32 %v5726_v31, %v5735_v28 }
0x3259   :  { %v5762_v14 = vpop.permute.xlu1 %5761 }
0x325a   :  { %v5736_v50 = vsub.f32 %v5725_v40, %v5734_v22  ;;  %v5739_v23 = vmul.f32 %v5737_v29, %v5737_v29 }
0x325c   :  { %v5738_v61 = vmul.f32 %v5736_v50, %v5736_v50  ;;  %v5743_v1 = vsel %vm424_vm6, %v5739_v23, 0.0 }
0x325d   :  { %v5793_v5 = vpop.permute.xlu1 %5792 }
0x325e   :  { %v5740_v45 = vsel %vm424_vm6, %v5738_v61, 0.0 }
0x325f   :  { %5741 = vadd.xlane.f32.xlu0 %v5740_v45 }
0x3263   :  { %5744 = vadd.xlane.f32.xlu0 %v5743_v1 }
0x32e8   :  { %v5742_v15 = vpop.xlane.xlu0 %5741 }
0x32e9   :  { %v5746_v8 = vmul.f32 0.03125, %v5742_v15 }
0x32eb   :  { %v5748_v32 = vadd.f32 1e-05, %v5746_v8 }
0x32ec   :  { %v5745_v25 = vpop.xlane.xlu0 %5744 }
0x32ed   :  { %7087 = vrsqrt.f32 %v5748_v32  ;;  %v5747_v57 = vmul.f32 0.03125, %v5745_v25 }
0x32ef   :  { %v5749_v36 = vadd.f32 1e-05, %v5747_v57 }
0x32f1   :  { %7089 = vrsqrt.f32 %v5749_v36 }
0x32fa   :  { %v7088_v38 = vpop.eup %7087 }
0x32fb   :  { %v5752_v43 = vmul.f32 %v7088_v38, %v5736_v50 }
0x32fd   :  { %v5758_v2 = vmul.f32 %v5999_v18, %v5752_v43 }
0x32fe   :  { %v7090_v12 = vpop.eup %7089 }
0x32ff   :  { %v5753_v6 = vmul.f32 %v7090_v12, %v5737_v29  ;;  %v5764_v52 = vadd.f32 %v5762_v14, %v5758_v2 }
0x3301   :  { %v5759_v13 = vmul.f32 %v5999_v18, %v5753_v6  ;;  %v5766_v4 = vsel %vm424_vm6, %v5764_v52, 0.0 }
0x3302   :  { %5767 = vadd.xlane.f32.xlu0 %v5766_v4 }
0x3303   :  { %v5765_v56 = vadd.f32 %v5762_v14, %v5759_v13 }
0x3305   :  { %v5769_v27 = vsel %vm424_vm6, %v5765_v56, 0.0 }
0x3306   :  { %5770 = vadd.xlane.f32.xlu0 %v5769_v27 }
0x338b   :  { %v5768_v59 = vpop.xlane.xlu0 %5767 }
0x338c   :  { %v5772_v3 = vmul.f32 0.03125, %v5768_v59 }
0x338e   :  { %v5774_v39 = vsub.f32 %v5764_v52, %v5772_v3 }
0x338f   :  { %v5771_v16 = vpop.xlane.xlu0 %5770 }
0x3390   :  { %v5773_v34 = vmul.f32 0.03125, %v5771_v16  ;;  %v5776_v44 = vmul.f32 %v5774_v39, %v5774_v39 }
0x3392   :  { %v5775_v41 = vsub.f32 %v5765_v56, %v5773_v34  ;;  %v5778_v55 = vsel %vm424_vm6, %v5776_v44, 0.0 }
0x3393   :  { %5779 = vadd.xlane.f32.xlu0 %v5778_v55 }
0x3394   :  { %v5777_v20 = vmul.f32 %v5775_v41, %v5775_v41 }
0x3396   :  { %v5781_v37 = vsel %vm424_vm6, %v5777_v20, 0.0 }
0x3397   :  { %5782 = vadd.xlane.f32.xlu0 %v5781_v37 }
0x33ad   :  { %5797 = vrot.lane.b32.xlu0 %v7116_v58, %s7240_s22 }
0x341c   :  { %v5780_v21 = vpop.xlane.xlu0 %5779 }
0x341d   :  { %v5784_v42 = vmul.f32 0.03125, %v5780_v21 }
0x341f   :  { %v5786_v48 = vadd.f32 1e-05, %v5784_v42 }
0x3420   :  { %v5783_v26 = vpop.xlane.xlu0 %5782 }
0x3421   :  { %7091 = vrsqrt.f32 %v5786_v48  ;;  %v5785_v9 = vmul.f32 0.03125, %v5783_v26 }
0x3423   :  { %v5787_v49 = vadd.f32 1e-05, %v5785_v9 }
0x3424   :  { %v5798_v17 = vpop.permute.xlu0 %5797 }
0x3425   :  { %7093 = vrsqrt.f32 %v5787_v49 }
0x342e   :  { %v7092_v63 = vpop.eup %7091 }
0x342f   :  { %v5790_v24 = vmul.f32 %v7092_v63, %v5774_v39 }
0x3431   :  { %v5795_v11 = vmul.f32 %v5793_v5, %v5790_v24 }
0x3432   :  { %v7094_v51 = vpop.eup %7093 }
0x3433   :  { %v5791_v46 = vmul.f32 %v7094_v51, %v5775_v41  ;;  %v5800_v19 = vadd.f32 %v5798_v17, %v5795_v11 }
0x3435   :  { %v5796_v0 = vmul.f32 %v5793_v5, %v5791_v46  ;;  %5802 = vst.msk [vmem:[#allocation10] sm:$0xff] %vm424_vm6, %v5800_v19 }
0x3437   :  { %v5801_v54 = vadd.f32 %v5798_v17, %v5796_v0 }
0x3439   :  { %5803 = vst.msk [vmem:[#allocation10 + $0x8] sm:$0xff] %vm424_vm6, %v5801_v54 }
0x343a   :  { %7208 = shalt.err (!%p7205_p10)
}
0x343b   :  { %5815 = dma.vmem_to_hbm [thread:$0]  %s5810_s26, 256, %s8666_s6, [#allocation4], %s7229_s1, %s7229_s1, %s7230_s14  }
0x343c   :  { %7223 = dma.done.wait [#allocation4], 256  }
0x343d   :  { %7224 = vsyncadd [#allocation4], 4294967040 }
0x343e   :  { %5819 = vsyncpa [#allocation3], 1 }
0x343f   :  { %5820 = vsyncpa [#allocation6], 1 }
0x3440   :  { %5821 = vsyncpa [#allocation9], 1 }
0x3441   :  { %5822 = vsyncpa [#allocation4], 1 }

</bundles_post_ra>
